<compile_context>
chip_gen: v6e
topology: v6e:2x2x1
jax: 0.10.0
libtpu: 0.0.40
codegen_flags: <defaults>
</compile_context>

<pallas_src>
import jax
import jax.numpy as jnp
from jax.experimental import pallas as pl
from jax.experimental.pallas import tpu as pltpu


# --------------------- bilinear operator (host / XLA side) ---------------------


def _interp_matrix(out_len, in_len):
    """1-D linear interpolation matrix matching F.interpolate(align_corners=False)."""
    if out_len == in_len:
        return jnp.eye(out_len, dtype=jnp.float32)
    scale = in_len / out_len
    src = jnp.maximum(
        (jnp.arange(out_len, dtype=jnp.float32) + 0.5) * scale - 0.5, 0.0)
    i0 = jnp.clip(jnp.floor(src).astype(jnp.int32), 0, in_len - 1)
    i1 = jnp.minimum(i0 + 1, in_len - 1)
    frac = src - i0.astype(jnp.float32)
    a = (1.0 - frac)[:, None] * jax.nn.one_hot(i0, in_len, dtype=jnp.float32)
    return a + frac[:, None] * jax.nn.one_hot(i1, in_len, dtype=jnp.float32)


def _bilinear_operator(hw_out, hw_in):
    """(Hout*Wout, Hin*Win) operator so that flat_out = A @ flat_in (separable)."""
    ah = _interp_matrix(hw_out[0], hw_in[0])
    aw = _interp_matrix(hw_out[1], hw_in[1])
    return jnp.kron(ah, aw)


# ------------------------------ fused FPN kernel --------------------------------


def _make_fpn_kernel(hw5, hw4, hw3):
    (H5, W5), (H4, W4), (H3, W3) = hw5, hw4, hw3

    def lateral(p_ref, wl_ref, bl_ref):
        # 1x1 conv with bias: (H*W, Cin) @ (Cin, C) + (1, C)
        return (jnp.dot(p_ref[0], wl_ref[...],
                        preferred_element_type=jnp.float32) + bl_ref[...])

    def dw_sep(m, H, W, dw_ref, pw_ref, pad_ref, o_ref):
        # depthwise 3x3 (stride 1, pad 1, no bias) + pointwise 1x1 (no bias),
        # fully fused in VMEM.
        C = m.shape[-1]
        pad_ref[...] = jnp.zeros_like(pad_ref)             # zero halo (VMEM only)
        pad_ref[1:H + 1, 1:W + 1, :] = m.reshape(H, W, C)  # interior write
        xp = pad_ref[...]
        k = dw_ref[...]
        acc = xp[0:H, 0:W, :] * k[0, 0, :]                 # seed with first tap
        for dh in range(3):
            for dw in range(3):
                if dh == 0 and dw == 0:
                    continue
                acc = acc + xp[dh:dh + H, dw:dw + W, :] * k[dh, dw, :]
        o_ref[0] = jnp.dot(acc.reshape(H * W, C), pw_ref[...],
                           preferred_element_type=jnp.float32)

    def kernel(p5_ref, p4_ref, p3_ref,
               wl5_ref, bl5_ref, wl4_ref, bl4_ref, wl3_ref, bl3_ref,
               a54_ref, a43_ref,
               dw5_ref, pw5_ref, dw4_ref, pw4_ref, dw3_ref, pw3_ref,
               o5_ref, o4_ref, o3_ref,
               pad5_ref, pad4_ref, pad3_ref):
        # lateral 1x1 convs
        m5 = lateral(p5_ref, wl5_ref, bl5_ref)                       # (S5, C)
        # top-down merges; bilinear upsample = one 2-D GEMM with kron operator
        m4 = lateral(p4_ref, wl4_ref, bl4_ref) + jnp.dot(
            a54_ref[...], m5, preferred_element_type=jnp.float32)    # (S4, C)
        m3 = lateral(p3_ref, wl3_ref, bl3_ref) + jnp.dot(
            a43_ref[...], m4, preferred_element_type=jnp.float32)    # (S3, C)
        # output depthwise-separable convs (M5/M4/M3 never leave VMEM)
        dw_sep(m5, H5, W5, dw5_ref, pw5_ref, pad5_ref, o5_ref)
        dw_sep(m4, H4, W4, dw4_ref, pw4_ref, pad4_ref, o4_ref)
        dw_sep(m3, H3, W3, dw3_ref, pw3_ref, pad3_ref, o3_ref)

    return kernel


# ------------------------------ params & forward --------------------------------


def init_fpn_params(key, in_channels_list, out_channels):
    params = {"lateral": [], "output": []}
    for c_in in in_channels_list:
        key, k1, k2 = jax.random.split(key, 3)
        params["lateral"].append({
            "w": 0.1 * jax.random.normal(k1, (c_in, out_channels), jnp.float32),
            "b": 0.1 * jax.random.normal(k2, (out_channels,), jnp.float32),
        })
    for _ in in_channels_list:
        key, k1, k2 = jax.random.split(key, 3)
        params["output"].append({
            "dw": 0.1 * jax.random.normal(k1, (3, 3, out_channels), jnp.float32),
            "pw": 0.1 * jax.random.normal(k2, (out_channels, out_channels),
                                          jnp.float32),
        })
    return params


@jax.jit
def fpn_forward(params, P5, P4, P3):
    """Inputs / outputs NCHW (PyTorch convention). Returns [O3, O4, O5]."""
    C = params["lateral"][0]["w"].shape[1]
    N = P5.shape[0]

    def to_flat(x):  # NCHW -> (N, H*W, C), channels in the lane dim
        n, c, h, w = x.shape
        return jnp.transpose(x, (0, 2, 3, 1)).reshape(n, h * w, c), (h, w)

    p5, hw5 = to_flat(P5)
    p4, hw4 = to_flat(P4)
    p3, hw3 = to_flat(P3)
    S5, S4, S3 = hw5[0] * hw5[1], hw4[0] * hw4[1], hw3[0] * hw3[1]

    a54 = _bilinear_operator(hw4, hw5)   # (S4, S5)
    a43 = _bilinear_operator(hw3, hw4)   # (S3, S4)

    lat, outp = params["lateral"], params["output"]
    wl5, bl5 = lat[2]["w"], lat[2]["b"].reshape(1, C)
    wl4, bl4 = lat[1]["w"], lat[1]["b"].reshape(1, C)
    wl3, bl3 = lat[0]["w"], lat[0]["b"].reshape(1, C)
    dw5, pw5 = outp[2]["dw"], outp[2]["pw"]
    dw4, pw4 = outp[1]["dw"], outp[1]["pw"]
    dw3, pw3 = outp[0]["dw"], outp[0]["pw"]

    def rep(a):     # grid-invariant (replicated) operand: whole array, one block
        return pl.BlockSpec(a.shape, lambda n, nd=a.ndim: (0,) * nd)

    def per_batch(S, c):
        return pl.BlockSpec((1, S, c), lambda n: (n, 0, 0))

    grid_spec = pltpu.PrefetchScalarGridSpec(
        num_scalar_prefetch=0,
        grid=(N,),
        in_specs=[
            per_batch(S5, p5.shape[-1]),
            per_batch(S4, p4.shape[-1]),
            per_batch(S3, p3.shape[-1]),
            rep(wl5), rep(bl5), rep(wl4), rep(bl4), rep(wl3), rep(bl3),
            rep(a54), rep(a43),
            rep(dw5), rep(pw5), rep(dw4), rep(pw4), rep(dw3), rep(pw3),
        ],
        out_specs=[per_batch(S5, C), per_batch(S4, C), per_batch(S3, C)],
        scratch_shapes=[
            pltpu.VMEM((hw5[0] + 2, hw5[1] + 2, C), jnp.float32),
            pltpu.VMEM((hw4[0] + 2, hw4[1] + 2, C), jnp.float32),
            pltpu.VMEM((hw3[0] + 2, hw3[1] + 2, C), jnp.float32),
        ],
    )

    o5, o4, o3 = pl.pallas_call(
        _make_fpn_kernel(hw5, hw4, hw3),
        grid_spec=grid_spec,
        out_shape=[
            jax.ShapeDtypeStruct((N, S5, C), jnp.float32),
            jax.ShapeDtypeStruct((N, S4, C), jnp.float32),
            jax.ShapeDtypeStruct((N, S3, C), jnp.float32),
        ],
        compiler_params=pltpu.CompilerParams(
            dimension_semantics=("parallel",)),
    )(p5, p4, p3, wl5, bl5, wl4, bl4, wl3, bl3, a54, a43,
      dw5, pw5, dw4, pw4, dw3, pw3)

    def to_nchw(o, hw):
        return jnp.transpose(o.reshape(N, hw[0], hw[1], C), (0, 3, 1, 2))

    return [to_nchw(o3, hw3), to_nchw(o4, hw4), to_nchw(o5, hw5)]


# ----------------------- pure-JAX reference (for checking) ----------------------


def fpn_reference(params, P5, P4, P3):
    def conv1x1(x, w, b):
        return jnp.einsum("nchw,cd->ndhw", x, w) + b[None, :, None, None]

    def upsample_to(x, hw):
        ah = _interp_matrix(hw[0], x.shape[2])
        aw = _interp_matrix(hw[1], x.shape[3])
        return jnp.einsum("oh,nchw,qw->ncoq", ah, x, aw)

    def dw_sep(x, dw, pw):
        H, W = x.shape[2], x.shape[3]
        xp = jnp.pad(x, ((0, 0), (0, 0), (1, 1), (1, 1)))
        acc = jnp.zeros_like(x)
        for dh in range(3):
            for dwi in range(3):
                acc = acc + (xp[:, :, dh:dh + H, dwi:dwi + W]
                             * dw[dh, dwi][None, :, None, None])
        return jnp.einsum("nchw,cd->ndhw", acc, pw)

    lat, outp = params["lateral"], params["output"]
    M5 = conv1x1(P5, lat[2]["w"], lat[2]["b"])
    M4 = conv1x1(P4, lat[1]["w"], lat[1]["b"])
    M3 = conv1x1(P3, lat[0]["w"], lat[0]["b"])
    M4 = M4 + upsample_to(M5, M4.shape[2:])
    M3 = M3 + upsample_to(M4, M3.shape[2:])
    O5 = dw_sep(M5, outp[2]["dw"], outp[2]["pw"])
    O4 = dw_sep(M4, outp[1]["dw"], outp[1]["pw"])
    O3 = dw_sep(M3, outp[0]["dw"], outp[0]["pw"])
    return [O3, O4, O5]


# ----------------------------------- main ---------------------------------------

if __name__ == "__main__":
    key = jax.random.PRNGKey(0)
    in_channels_list = [8, 16, 32]   # [C3, C4, C5]
    out_channels = 16

    key, kp, k3, k4, k5 = jax.random.split(key, 5)
    params = init_fpn_params(kp, in_channels_list, out_channels)

    # NCHW inputs: P3 is the largest feature map, P5 the smallest.
    P3 = jax.random.normal(k3, (2, in_channels_list[0], 16, 16), jnp.float32)
    P4 = jax.random.normal(k4, (2, in_channels_list[1], 8, 8), jnp.float32)
    P5 = jax.random.normal(k5, (2, in_channels_list[2], 4, 4), jnp.float32)

    O3, O4, O5 = fpn_forward(params, P5, P4, P3)
    jax.block_until_ready((O3, O4, O5))

    assert O3.shape == (2, out_channels, 16, 16)
    assert O4.shape == (2, out_channels, 8, 8)
    assert O5.shape == (2, out_channels, 4, 4)

    R3, R4, R5 = fpn_reference(params, P5, P4, P3)
    for got, want in ((O3, R3), (O4, R4), (O5, R5)):
        err = float(jnp.max(jnp.abs(got - want)))
        assert err < 2e-2, f"max abs err {err}"

    print("KERNEL_OK")
</pallas_src>

<mosaic_0001>
module attributes {stable_mosaic.version = 11 : i64} {
  func.func @kernel(%arg0: i32, %arg1: memref<1x16x32xf32, #tpu.memory_space<vmem>>, %arg2: memref<1x64x16xf32, #tpu.memory_space<vmem>>, %arg3: memref<1x256x8xf32, #tpu.memory_space<vmem>>, %arg4: memref<32x16xf32, #tpu.memory_space<vmem>>, %arg5: memref<1x16xf32, #tpu.memory_space<vmem>>, %arg6: memref<16x16xf32, #tpu.memory_space<vmem>>, %arg7: memref<1x16xf32, #tpu.memory_space<vmem>>, %arg8: memref<8x16xf32, #tpu.memory_space<vmem>>, %arg9: memref<1x16xf32, #tpu.memory_space<vmem>>, %arg10: memref<64x16xf32, #tpu.memory_space<vmem>>, %arg11: memref<256x64xf32, #tpu.memory_space<vmem>>, %arg12: memref<3x3x16xf32, #tpu.memory_space<vmem>>, %arg13: memref<16x16xf32, #tpu.memory_space<vmem>>, %arg14: memref<3x3x16xf32, #tpu.memory_space<vmem>>, %arg15: memref<16x16xf32, #tpu.memory_space<vmem>>, %arg16: memref<3x3x16xf32, #tpu.memory_space<vmem>>, %arg17: memref<16x16xf32, #tpu.memory_space<vmem>>, %arg18: memref<1x16x16xf32, #tpu.memory_space<vmem>>, %arg19: memref<1x64x16xf32, #tpu.memory_space<vmem>>, %arg20: memref<1x256x16xf32, #tpu.memory_space<vmem>>, %arg21: memref<6x6x16xf32, #tpu.memory_space<vmem>>, %arg22: memref<10x10x16xf32, #tpu.memory_space<vmem>>, %arg23: memref<18x18x16xf32, #tpu.memory_space<vmem>>) attributes {dimension_semantics = [#tpu.dimension_semantics<parallel>], iteration_bounds = array<i64: 2>, scalar_prefetch = 0 : i64, scratch_operands = 3 : i64, tpu.core_type = #tpu.core_type<tc>, window_params = [{transform_indices = @transform_0, window_bounds = array<i64: 1, 16, 32>}, {transform_indices = @transform_1, window_bounds = array<i64: 1, 64, 16>}, {transform_indices = @transform_2, window_bounds = array<i64: 1, 256, 8>}, {pipeline_mode = #tpu.pipeline_mode<synchronous>, transform_indices = @transform_3, window_bounds = array<i64: 32, 16>}, {pipeline_mode = #tpu.pipeline_mode<synchronous>, transform_indices = @transform_4, window_bounds = array<i64: 1, 16>}, {pipeline_mode = #tpu.pipeline_mode<synchronous>, transform_indices = @transform_5, window_bounds = array<i64: 16, 16>}, {pipeline_mode = #tpu.pipeline_mode<synchronous>, transform_indices = @transform_6, window_bounds = array<i64: 1, 16>}, {pipeline_mode = #tpu.pipeline_mode<synchronous>, transform_indices = @transform_7, window_bounds = array<i64: 8, 16>}, {pipeline_mode = #tpu.pipeline_mode<synchronous>, transform_indices = @transform_8, window_bounds = array<i64: 1, 16>}, {pipeline_mode = #tpu.pipeline_mode<synchronous>, transform_indices = @transform_9, window_bounds = array<i64: 64, 16>}, {pipeline_mode = #tpu.pipeline_mode<synchronous>, transform_indices = @transform_10, window_bounds = array<i64: 256, 64>}, {pipeline_mode = #tpu.pipeline_mode<synchronous>, transform_indices = @transform_11, window_bounds = array<i64: 3, 3, 16>}, {pipeline_mode = #tpu.pipeline_mode<synchronous>, transform_indices = @transform_12, window_bounds = array<i64: 16, 16>}, {pipeline_mode = #tpu.pipeline_mode<synchronous>, transform_indices = @transform_13, window_bounds = array<i64: 3, 3, 16>}, {pipeline_mode = #tpu.pipeline_mode<synchronous>, transform_indices = @transform_14, window_bounds = array<i64: 16, 16>}, {pipeline_mode = #tpu.pipeline_mode<synchronous>, transform_indices = @transform_15, window_bounds = array<i64: 3, 3, 16>}, {pipeline_mode = #tpu.pipeline_mode<synchronous>, transform_indices = @transform_16, window_bounds = array<i64: 16, 16>}, {transform_indices = @transform_17, window_bounds = array<i64: 1, 16, 16>}, {transform_indices = @transform_18, window_bounds = array<i64: 1, 64, 16>}, {transform_indices = @transform_19, window_bounds = array<i64: 1, 256, 16>}]} {
    %c0 = arith.constant 0 : index
    %c0_0 = arith.constant 0 : index
    %c0_1 = arith.constant 0 : index
    %0 = vector.load %arg1[%c0, %c0_0, %c0_1] : memref<1x16x32xf32, #tpu.memory_space<vmem>>, vector<1x16x32xf32>
    %1 = vector.shape_cast %0 : vector<1x16x32xf32> to vector<16x32xf32>
    %c0_2 = arith.constant 0 : index
    %c0_3 = arith.constant 0 : index
    %2 = vector.load %arg4[%c0_2, %c0_3] : memref<32x16xf32, #tpu.memory_space<vmem>>, vector<32x16xf32>
    %cst = arith.constant dense<0.000000e+00> : vector<16x16xf32>
    %3 = tpu.matmul %1, %2, %cst {dimension_numbers = #tpu.dot_dimension_numbers<[1], [0], [0], [1], [0, 0, 1, 1], [], []>} : vector<16x32xf32>, vector<32x16xf32>, vector<16x16xf32> -> vector<16x16xf32>
    %c0_4 = arith.constant 0 : index
    %c0_5 = arith.constant 0 : index
    %4 = vector.load %arg5[%c0_4, %c0_5] : memref<1x16xf32, #tpu.memory_space<vmem>>, vector<1x16xf32>
    %5 = vector.broadcast %4 : vector<1x16xf32> to vector<16x16xf32>
    %6 = arith.addf %3, %5 : vector<16x16xf32>
    %c0_6 = arith.constant 0 : index
    %c0_7 = arith.constant 0 : index
    %c0_8 = arith.constant 0 : index
    %7 = vector.load %arg2[%c0_6, %c0_7, %c0_8] : memref<1x64x16xf32, #tpu.memory_space<vmem>>, vector<1x64x16xf32>
    %8 = vector.shape_cast %7 : vector<1x64x16xf32> to vector<64x16xf32>
    %c0_9 = arith.constant 0 : index
    %c0_10 = arith.constant 0 : index
    %9 = vector.load %arg6[%c0_9, %c0_10] : memref<16x16xf32, #tpu.memory_space<vmem>>, vector<16x16xf32>
    %cst_11 = arith.constant dense<0.000000e+00> : vector<64x16xf32>
    %10 = tpu.matmul %8, %9, %cst_11 {dimension_numbers = #tpu.dot_dimension_numbers<[1], [0], [0], [1], [0, 0, 1, 1], [], []>} : vector<64x16xf32>, vector<16x16xf32>, vector<64x16xf32> -> vector<64x16xf32>
    %c0_12 = arith.constant 0 : index
    %c0_13 = arith.constant 0 : index
    %11 = vector.load %arg7[%c0_12, %c0_13] : memref<1x16xf32, #tpu.memory_space<vmem>>, vector<1x16xf32>
    %12 = vector.broadcast %11 : vector<1x16xf32> to vector<64x16xf32>
    %13 = arith.addf %10, %12 : vector<64x16xf32>
    %c0_14 = arith.constant 0 : index
    %c0_15 = arith.constant 0 : index
    %14 = vector.load %arg10[%c0_14, %c0_15] : memref<64x16xf32, #tpu.memory_space<vmem>>, vector<64x16xf32>
    %cst_16 = arith.constant dense<0.000000e+00> : vector<64x16xf32>
    %15 = tpu.matmul %14, %6, %cst_16 {dimension_numbers = #tpu.dot_dimension_numbers<[1], [0], [0], [1], [0, 0, 1, 1], [], []>} : vector<64x16xf32>, vector<16x16xf32>, vector<64x16xf32> -> vector<64x16xf32>
    %16 = arith.addf %13, %15 : vector<64x16xf32>
    %c0_17 = arith.constant 0 : index
    %c0_18 = arith.constant 0 : index
    %c0_19 = arith.constant 0 : index
    %17 = vector.load %arg3[%c0_17, %c0_18, %c0_19] : memref<1x256x8xf32, #tpu.memory_space<vmem>>, vector<1x256x8xf32>
    %18 = vector.shape_cast %17 : vector<1x256x8xf32> to vector<256x8xf32>
    %c0_20 = arith.constant 0 : index
    %c0_21 = arith.constant 0 : index
    %19 = vector.load %arg8[%c0_20, %c0_21] : memref<8x16xf32, #tpu.memory_space<vmem>>, vector<8x16xf32>
    %cst_22 = arith.constant dense<0.000000e+00> : vector<256x16xf32>
    %20 = tpu.matmul %18, %19, %cst_22 {dimension_numbers = #tpu.dot_dimension_numbers<[1], [0], [0], [1], [0, 0, 1, 1], [], []>} : vector<256x8xf32>, vector<8x16xf32>, vector<256x16xf32> -> vector<256x16xf32>
    %c0_23 = arith.constant 0 : index
    %c0_24 = arith.constant 0 : index
    %21 = vector.load %arg9[%c0_23, %c0_24] : memref<1x16xf32, #tpu.memory_space<vmem>>, vector<1x16xf32>
    %22 = vector.broadcast %21 : vector<1x16xf32> to vector<256x16xf32>
    %23 = arith.addf %20, %22 : vector<256x16xf32>
    %c0_25 = arith.constant 0 : index
    %c0_26 = arith.constant 0 : index
    %24 = vector.load %arg11[%c0_25, %c0_26] : memref<256x64xf32, #tpu.memory_space<vmem>>, vector<256x64xf32>
    %cst_27 = arith.constant dense<0.000000e+00> : vector<256x16xf32>
    %25 = tpu.matmul %24, %16, %cst_27 {dimension_numbers = #tpu.dot_dimension_numbers<[1], [0], [0], [1], [0, 0, 1, 1], [], []>} : vector<256x64xf32>, vector<64x16xf32>, vector<256x16xf32> -> vector<256x16xf32>
    %26 = arith.addf %23, %25 : vector<256x16xf32>
    %cst_28 = arith.constant 0.000000e+00 : f32
    %27 = vector.broadcast %cst_28 : f32 to vector<6x6x16xf32>
    %c0_29 = arith.constant 0 : index
    %c0_30 = arith.constant 0 : index
    %c0_31 = arith.constant 0 : index
    %28 = vector.load %arg21[%c0_29, %c0_30, %c0_31] : memref<6x6x16xf32, #tpu.memory_space<vmem>>, vector<6x6x16xf32>
    tpu.vector_store %arg21[%c0_29, %c0_30, %c0_31], %27 {strides = array<i32>} : memref<6x6x16xf32, #tpu.memory_space<vmem>>, vector<6x6x16xf32>,
    %29 = vector.shape_cast %6 : vector<16x16xf32> to vector<4x4x16xf32>
    %c1 = arith.constant 1 : index
    %c1_32 = arith.constant 1 : index
    %c0_33 = arith.constant 0 : index
    %30 = vector.load %arg21[%c1, %c1_32, %c0_33] : memref<6x6x16xf32, #tpu.memory_space<vmem>>, vector<4x4x16xf32>
    tpu.vector_store %arg21[%c1, %c1_32, %c0_33], %29 {strides = array<i32>} : memref<6x6x16xf32, #tpu.memory_space<vmem>>, vector<4x4x16xf32>,
    %c0_34 = arith.constant 0 : index
    %c0_35 = arith.constant 0 : index
    %c0_36 = arith.constant 0 : index
    %31 = vector.load %arg21[%c0_34, %c0_35, %c0_36] : memref<6x6x16xf32, #tpu.memory_space<vmem>>, vector<6x6x16xf32>
    %c0_37 = arith.constant 0 : index
    %c0_38 = arith.constant 0 : index
    %c0_39 = arith.constant 0 : index
    %32 = vector.load %arg12[%c0_37, %c0_38, %c0_39] : memref<3x3x16xf32, #tpu.memory_space<vmem>>, vector<3x3x16xf32>
    %33 = vector.extract_strided_slice %31 {offsets = [0, 0, 0], sizes = [4, 4, 16], strides = [1, 1, 1]} : vector<6x6x16xf32> to vector<4x4x16xf32>
    %34 = vector.extract_strided_slice %32 {offsets = [0, 0, 0], sizes = [1, 1, 16], strides = [1, 1, 1]} : vector<3x3x16xf32> to vector<1x1x16xf32>
    %35 = vector.shape_cast %34 : vector<1x1x16xf32> to vector<16xf32>
    %36 = vector.shape_cast %35 : vector<16xf32> to vector<1x1x16xf32>
    %37 = vector.broadcast %36 : vector<1x1x16xf32> to vector<4x4x16xf32>
    %38 = arith.mulf %33, %37 : vector<4x4x16xf32>
    %39 = vector.extract_strided_slice %31 {offsets = [0, 1, 0], sizes = [4, 4, 16], strides = [1, 1, 1]} : vector<6x6x16xf32> to vector<4x4x16xf32>
    %40 = vector.extract_strided_slice %32 {offsets = [0, 1, 0], sizes = [1, 1, 16], strides = [1, 1, 1]} : vector<3x3x16xf32> to vector<1x1x16xf32>
    %41 = vector.shape_cast %40 : vector<1x1x16xf32> to vector<16xf32>
    %42 = vector.shape_cast %41 : vector<16xf32> to vector<1x1x16xf32>
    %43 = vector.broadcast %42 : vector<1x1x16xf32> to vector<4x4x16xf32>
    %44 = arith.mulf %39, %43 : vector<4x4x16xf32>
    %45 = arith.addf %38, %44 : vector<4x4x16xf32>
    %46 = vector.extract_strided_slice %31 {offsets = [0, 2, 0], sizes = [4, 4, 16], strides = [1, 1, 1]} : vector<6x6x16xf32> to vector<4x4x16xf32>
    %47 = vector.extract_strided_slice %32 {offsets = [0, 2, 0], sizes = [1, 1, 16], strides = [1, 1, 1]} : vector<3x3x16xf32> to vector<1x1x16xf32>
    %48 = vector.shape_cast %47 : vector<1x1x16xf32> to vector<16xf32>
    %49 = vector.shape_cast %48 : vector<16xf32> to vector<1x1x16xf32>
    %50 = vector.broadcast %49 : vector<1x1x16xf32> to vector<4x4x16xf32>
    %51 = arith.mulf %46, %50 : vector<4x4x16xf32>
    %52 = arith.addf %45, %51 : vector<4x4x16xf32>
    %53 = vector.extract_strided_slice %31 {offsets = [1, 0, 0], sizes = [4, 4, 16], strides = [1, 1, 1]} : vector<6x6x16xf32> to vector<4x4x16xf32>
    %54 = vector.extract_strided_slice %32 {offsets = [1, 0, 0], sizes = [1, 1, 16], strides = [1, 1, 1]} : vector<3x3x16xf32> to vector<1x1x16xf32>
    %55 = vector.shape_cast %54 : vector<1x1x16xf32> to vector<16xf32>
    %56 = vector.shape_cast %55 : vector<16xf32> to vector<1x1x16xf32>
    %57 = vector.broadcast %56 : vector<1x1x16xf32> to vector<4x4x16xf32>
    %58 = arith.mulf %53, %57 : vector<4x4x16xf32>
    %59 = arith.addf %52, %58 : vector<4x4x16xf32>
    %60 = vector.extract_strided_slice %31 {offsets = [1, 1, 0], sizes = [4, 4, 16], strides = [1, 1, 1]} : vector<6x6x16xf32> to vector<4x4x16xf32>
    %61 = vector.extract_strided_slice %32 {offsets = [1, 1, 0], sizes = [1, 1, 16], strides = [1, 1, 1]} : vector<3x3x16xf32> to vector<1x1x16xf32>
    %62 = vector.shape_cast %61 : vector<1x1x16xf32> to vector<16xf32>
    %63 = vector.shape_cast %62 : vector<16xf32> to vector<1x1x16xf32>
    %64 = vector.broadcast %63 : vector<1x1x16xf32> to vector<4x4x16xf32>
    %65 = arith.mulf %60, %64 : vector<4x4x16xf32>
    %66 = arith.addf %59, %65 : vector<4x4x16xf32>
    %67 = vector.extract_strided_slice %31 {offsets = [1, 2, 0], sizes = [4, 4, 16], strides = [1, 1, 1]} : vector<6x6x16xf32> to vector<4x4x16xf32>
    %68 = vector.extract_strided_slice %32 {offsets = [1, 2, 0], sizes = [1, 1, 16], strides = [1, 1, 1]} : vector<3x3x16xf32> to vector<1x1x16xf32>
    %69 = vector.shape_cast %68 : vector<1x1x16xf32> to vector<16xf32>
    %70 = vector.shape_cast %69 : vector<16xf32> to vector<1x1x16xf32>
    %71 = vector.broadcast %70 : vector<1x1x16xf32> to vector<4x4x16xf32>
    %72 = arith.mulf %67, %71 : vector<4x4x16xf32>
    %73 = arith.addf %66, %72 : vector<4x4x16xf32>
    %74 = vector.extract_strided_slice %31 {offsets = [2, 0, 0], sizes = [4, 4, 16], strides = [1, 1, 1]} : vector<6x6x16xf32> to vector<4x4x16xf32>
    %75 = vector.extract_strided_slice %32 {offsets = [2, 0, 0], sizes = [1, 1, 16], strides = [1, 1, 1]} : vector<3x3x16xf32> to vector<1x1x16xf32>
    %76 = vector.shape_cast %75 : vector<1x1x16xf32> to vector<16xf32>
    %77 = vector.shape_cast %76 : vector<16xf32> to vector<1x1x16xf32>
    %78 = vector.broadcast %77 : vector<1x1x16xf32> to vector<4x4x16xf32>
    %79 = arith.mulf %74, %78 : vector<4x4x16xf32>
    %80 = arith.addf %73, %79 : vector<4x4x16xf32>
    %81 = vector.extract_strided_slice %31 {offsets = [2, 1, 0], sizes = [4, 4, 16], strides = [1, 1, 1]} : vector<6x6x16xf32> to vector<4x4x16xf32>
    %82 = vector.extract_strided_slice %32 {offsets = [2, 1, 0], sizes = [1, 1, 16], strides = [1, 1, 1]} : vector<3x3x16xf32> to vector<1x1x16xf32>
    %83 = vector.shape_cast %82 : vector<1x1x16xf32> to vector<16xf32>
    %84 = vector.shape_cast %83 : vector<16xf32> to vector<1x1x16xf32>
    %85 = vector.broadcast %84 : vector<1x1x16xf32> to vector<4x4x16xf32>
    %86 = arith.mulf %81, %85 : vector<4x4x16xf32>
    %87 = arith.addf %80, %86 : vector<4x4x16xf32>
    %88 = vector.extract_strided_slice %31 {offsets = [2, 2, 0], sizes = [4, 4, 16], strides = [1, 1, 1]} : vector<6x6x16xf32> to vector<4x4x16xf32>
    %89 = vector.extract_strided_slice %32 {offsets = [2, 2, 0], sizes = [1, 1, 16], strides = [1, 1, 1]} : vector<3x3x16xf32> to vector<1x1x16xf32>
    %90 = vector.shape_cast %89 : vector<1x1x16xf32> to vector<16xf32>
    %91 = vector.shape_cast %90 : vector<16xf32> to vector<1x1x16xf32>
    %92 = vector.broadcast %91 : vector<1x1x16xf32> to vector<4x4x16xf32>
    %93 = arith.mulf %88, %92 : vector<4x4x16xf32>
    %94 = arith.addf %87, %93 : vector<4x4x16xf32>
    %95 = vector.shape_cast %94 : vector<4x4x16xf32> to vector<16x16xf32>
    %c0_40 = arith.constant 0 : index
    %c0_41 = arith.constant 0 : index
    %96 = vector.load %arg13[%c0_40, %c0_41] : memref<16x16xf32, #tpu.memory_space<vmem>>, vector<16x16xf32>
    %cst_42 = arith.constant dense<0.000000e+00> : vector<16x16xf32>
    %97 = tpu.matmul %95, %96, %cst_42 {dimension_numbers = #tpu.dot_dimension_numbers<[1], [0], [0], [1], [0, 0, 1, 1], [], []>} : vector<16x16xf32>, vector<16x16xf32>, vector<16x16xf32> -> vector<16x16xf32>
    %c0_43 = arith.constant 0 : index
    %c0_44 = arith.constant 0 : index
    %c0_45 = arith.constant 0 : index
    %98 = vector.load %arg18[%c0_43, %c0_44, %c0_45] : memref<1x16x16xf32, #tpu.memory_space<vmem>>, vector<1x16x16xf32>
    %99 = vector.shape_cast %98 : vector<1x16x16xf32> to vector<16x16xf32>
    %100 = vector.shape_cast %97 : vector<16x16xf32> to vector<1x16x16xf32>
    tpu.vector_store %arg18[%c0_43, %c0_44, %c0_45], %100 {strides = array<i32>} : memref<1x16x16xf32, #tpu.memory_space<vmem>>, vector<1x16x16xf32>,
    %cst_46 = arith.constant 0.000000e+00 : f32
    %101 = vector.broadcast %cst_46 : f32 to vector<10x10x16xf32>
    %c0_47 = arith.constant 0 : index
    %c0_48 = arith.constant 0 : index
    %c0_49 = arith.constant 0 : index
    %102 = vector.load %arg22[%c0_47, %c0_48, %c0_49] : memref<10x10x16xf32, #tpu.memory_space<vmem>>, vector<10x10x16xf32>
    tpu.vector_store %arg22[%c0_47, %c0_48, %c0_49], %101 {strides = array<i32>} : memref<10x10x16xf32, #tpu.memory_space<vmem>>, vector<10x10x16xf32>,
    %103 = vector.shape_cast %16 : vector<64x16xf32> to vector<8x8x16xf32>
    %c1_50 = arith.constant 1 : index
    %c1_51 = arith.constant 1 : index
    %c0_52 = arith.constant 0 : index
    %104 = vector.load %arg22[%c1_50, %c1_51, %c0_52] : memref<10x10x16xf32, #tpu.memory_space<vmem>>, vector<8x8x16xf32>
    tpu.vector_store %arg22[%c1_50, %c1_51, %c0_52], %103 {strides = array<i32>} : memref<10x10x16xf32, #tpu.memory_space<vmem>>, vector<8x8x16xf32>,
    %c0_53 = arith.constant 0 : index
    %c0_54 = arith.constant 0 : index
    %c0_55 = arith.constant 0 : index
    %105 = vector.load %arg22[%c0_53, %c0_54, %c0_55] : memref<10x10x16xf32, #tpu.memory_space<vmem>>, vector<10x10x16xf32>
    %c0_56 = arith.constant 0 : index
    %c0_57 = arith.constant 0 : index
    %c0_58 = arith.constant 0 : index
    %106 = vector.load %arg14[%c0_56, %c0_57, %c0_58] : memref<3x3x16xf32, #tpu.memory_space<vmem>>, vector<3x3x16xf32>
    %107 = vector.extract_strided_slice %105 {offsets = [0, 0, 0], sizes = [8, 8, 16], strides = [1, 1, 1]} : vector<10x10x16xf32> to vector<8x8x16xf32>
    %108 = vector.extract_strided_slice %106 {offsets = [0, 0, 0], sizes = [1, 1, 16], strides = [1, 1, 1]} : vector<3x3x16xf32> to vector<1x1x16xf32>
    %109 = vector.shape_cast %108 : vector<1x1x16xf32> to vector<16xf32>
    %110 = vector.shape_cast %109 : vector<16xf32> to vector<1x1x16xf32>
    %111 = vector.broadcast %110 : vector<1x1x16xf32> to vector<8x8x16xf32>
    %112 = arith.mulf %107, %111 : vector<8x8x16xf32>
    %113 = vector.extract_strided_slice %105 {offsets = [0, 1, 0], sizes = [8, 8, 16], strides = [1, 1, 1]} : vector<10x10x16xf32> to vector<8x8x16xf32>
    %114 = vector.extract_strided_slice %106 {offsets = [0, 1, 0], sizes = [1, 1, 16], strides = [1, 1, 1]} : vector<3x3x16xf32> to vector<1x1x16xf32>
    %115 = vector.shape_cast %114 : vector<1x1x16xf32> to vector<16xf32>
    %116 = vector.shape_cast %115 : vector<16xf32> to vector<1x1x16xf32>
    %117 = vector.broadcast %116 : vector<1x1x16xf32> to vector<8x8x16xf32>
    %118 = arith.mulf %113, %117 : vector<8x8x16xf32>
    %119 = arith.addf %112, %118 : vector<8x8x16xf32>
    %120 = vector.extract_strided_slice %105 {offsets = [0, 2, 0], sizes = [8, 8, 16], strides = [1, 1, 1]} : vector<10x10x16xf32> to vector<8x8x16xf32>
    %121 = vector.extract_strided_slice %106 {offsets = [0, 2, 0], sizes = [1, 1, 16], strides = [1, 1, 1]} : vector<3x3x16xf32> to vector<1x1x16xf32>
    %122 = vector.shape_cast %121 : vector<1x1x16xf32> to vector<16xf32>
    %123 = vector.shape_cast %122 : vector<16xf32> to vector<1x1x16xf32>
    %124 = vector.broadcast %123 : vector<1x1x16xf32> to vector<8x8x16xf32>
    %125 = arith.mulf %120, %124 : vector<8x8x16xf32>
    %126 = arith.addf %119, %125 : vector<8x8x16xf32>
    %127 = vector.extract_strided_slice %105 {offsets = [1, 0, 0], sizes = [8, 8, 16], strides = [1, 1, 1]} : vector<10x10x16xf32> to vector<8x8x16xf32>
    %128 = vector.extract_strided_slice %106 {offsets = [1, 0, 0], sizes = [1, 1, 16], strides = [1, 1, 1]} : vector<3x3x16xf32> to vector<1x1x16xf32>
    %129 = vector.shape_cast %128 : vector<1x1x16xf32> to vector<16xf32>
    %130 = vector.shape_cast %129 : vector<16xf32> to vector<1x1x16xf32>
    %131 = vector.broadcast %130 : vector<1x1x16xf32> to vector<8x8x16xf32>
    %132 = arith.mulf %127, %131 : vector<8x8x16xf32>
    %133 = arith.addf %126, %132 : vector<8x8x16xf32>
    %134 = vector.extract_strided_slice %105 {offsets = [1, 1, 0], sizes = [8, 8, 16], strides = [1, 1, 1]} : vector<10x10x16xf32> to vector<8x8x16xf32>
    %135 = vector.extract_strided_slice %106 {offsets = [1, 1, 0], sizes = [1, 1, 16], strides = [1, 1, 1]} : vector<3x3x16xf32> to vector<1x1x16xf32>
    %136 = vector.shape_cast %135 : vector<1x1x16xf32> to vector<16xf32>
    %137 = vector.shape_cast %136 : vector<16xf32> to vector<1x1x16xf32>
    %138 = vector.broadcast %137 : vector<1x1x16xf32> to vector<8x8x16xf32>
    %139 = arith.mulf %134, %138 : vector<8x8x16xf32>
    %140 = arith.addf %133, %139 : vector<8x8x16xf32>
    %141 = vector.extract_strided_slice %105 {offsets = [1, 2, 0], sizes = [8, 8, 16], strides = [1, 1, 1]} : vector<10x10x16xf32> to vector<8x8x16xf32>
    %142 = vector.extract_strided_slice %106 {offsets = [1, 2, 0], sizes = [1, 1, 16], strides = [1, 1, 1]} : vector<3x3x16xf32> to vector<1x1x16xf32>
    %143 = vector.shape_cast %142 : vector<1x1x16xf32> to vector<16xf32>
    %144 = vector.shape_cast %143 : vector<16xf32> to vector<1x1x16xf32>
    %145 = vector.broadcast %144 : vector<1x1x16xf32> to vector<8x8x16xf32>
    %146 = arith.mulf %141, %145 : vector<8x8x16xf32>
    %147 = arith.addf %140, %146 : vector<8x8x16xf32>
    %148 = vector.extract_strided_slice %105 {offsets = [2, 0, 0], sizes = [8, 8, 16], strides = [1, 1, 1]} : vector<10x10x16xf32> to vector<8x8x16xf32>
    %149 = vector.extract_strided_slice %106 {offsets = [2, 0, 0], sizes = [1, 1, 16], strides = [1, 1, 1]} : vector<3x3x16xf32> to vector<1x1x16xf32>
    %150 = vector.shape_cast %149 : vector<1x1x16xf32> to vector<16xf32>
    %151 = vector.shape_cast %150 : vector<16xf32> to vector<1x1x16xf32>
    %152 = vector.broadcast %151 : vector<1x1x16xf32> to vector<8x8x16xf32>
    %153 = arith.mulf %148, %152 : vector<8x8x16xf32>
    %154 = arith.addf %147, %153 : vector<8x8x16xf32>
    %155 = vector.extract_strided_slice %105 {offsets = [2, 1, 0], sizes = [8, 8, 16], strides = [1, 1, 1]} : vector<10x10x16xf32> to vector<8x8x16xf32>
    %156 = vector.extract_strided_slice %106 {offsets = [2, 1, 0], sizes = [1, 1, 16], strides = [1, 1, 1]} : vector<3x3x16xf32> to vector<1x1x16xf32>
    %157 = vector.shape_cast %156 : vector<1x1x16xf32> to vector<16xf32>
    %158 = vector.shape_cast %157 : vector<16xf32> to vector<1x1x16xf32>
    %159 = vector.broadcast %158 : vector<1x1x16xf32> to vector<8x8x16xf32>
    %160 = arith.mulf %155, %159 : vector<8x8x16xf32>
    %161 = arith.addf %154, %160 : vector<8x8x16xf32>
    %162 = vector.extract_strided_slice %105 {offsets = [2, 2, 0], sizes = [8, 8, 16], strides = [1, 1, 1]} : vector<10x10x16xf32> to vector<8x8x16xf32>
    %163 = vector.extract_strided_slice %106 {offsets = [2, 2, 0], sizes = [1, 1, 16], strides = [1, 1, 1]} : vector<3x3x16xf32> to vector<1x1x16xf32>
    %164 = vector.shape_cast %163 : vector<1x1x16xf32> to vector<16xf32>
    %165 = vector.shape_cast %164 : vector<16xf32> to vector<1x1x16xf32>
    %166 = vector.broadcast %165 : vector<1x1x16xf32> to vector<8x8x16xf32>
    %167 = arith.mulf %162, %166 : vector<8x8x16xf32>
    %168 = arith.addf %161, %167 : vector<8x8x16xf32>
    %169 = vector.shape_cast %168 : vector<8x8x16xf32> to vector<64x16xf32>
    %c0_59 = arith.constant 0 : index
    %c0_60 = arith.constant 0 : index
    %170 = vector.load %arg15[%c0_59, %c0_60] : memref<16x16xf32, #tpu.memory_space<vmem>>, vector<16x16xf32>
    %cst_61 = arith.constant dense<0.000000e+00> : vector<64x16xf32>
    %171 = tpu.matmul %169, %170, %cst_61 {dimension_numbers = #tpu.dot_dimension_numbers<[1], [0], [0], [1], [0, 0, 1, 1], [], []>} : vector<64x16xf32>, vector<16x16xf32>, vector<64x16xf32> -> vector<64x16xf32>
    %c0_62 = arith.constant 0 : index
    %c0_63 = arith.constant 0 : index
    %c0_64 = arith.constant 0 : index
    %172 = vector.load %arg19[%c0_62, %c0_63, %c0_64] : memref<1x64x16xf32, #tpu.memory_space<vmem>>, vector<1x64x16xf32>
    %173 = vector.shape_cast %172 : vector<1x64x16xf32> to vector<64x16xf32>
    %174 = vector.shape_cast %171 : vector<64x16xf32> to vector<1x64x16xf32>
    tpu.vector_store %arg19[%c0_62, %c0_63, %c0_64], %174 {strides = array<i32>} : memref<1x64x16xf32, #tpu.memory_space<vmem>>, vector<1x64x16xf32>,
    %cst_65 = arith.constant 0.000000e+00 : f32
    %175 = vector.broadcast %cst_65 : f32 to vector<18x18x16xf32>
    %c0_66 = arith.constant 0 : index
    %c0_67 = arith.constant 0 : index
    %c0_68 = arith.constant 0 : index
    %176 = vector.load %arg23[%c0_66, %c0_67, %c0_68] : memref<18x18x16xf32, #tpu.memory_space<vmem>>, vector<18x18x16xf32>
    tpu.vector_store %arg23[%c0_66, %c0_67, %c0_68], %175 {strides = array<i32>} : memref<18x18x16xf32, #tpu.memory_space<vmem>>, vector<18x18x16xf32>,
    %177 = vector.shape_cast %26 : vector<256x16xf32> to vector<16x16x16xf32>
    %c1_69 = arith.constant 1 : index
    %c1_70 = arith.constant 1 : index
    %c0_71 = arith.constant 0 : index
    %178 = vector.load %arg23[%c1_69, %c1_70, %c0_71] : memref<18x18x16xf32, #tpu.memory_space<vmem>>, vector<16x16x16xf32>
    tpu.vector_store %arg23[%c1_69, %c1_70, %c0_71], %177 {strides = array<i32>} : memref<18x18x16xf32, #tpu.memory_space<vmem>>, vector<16x16x16xf32>,
    %c0_72 = arith.constant 0 : index
    %c0_73 = arith.constant 0 : index
    %c0_74 = arith.constant 0 : index
    %179 = vector.load %arg23[%c0_72, %c0_73, %c0_74] : memref<18x18x16xf32, #tpu.memory_space<vmem>>, vector<18x18x16xf32>
    %c0_75 = arith.constant 0 : index
    %c0_76 = arith.constant 0 : index
    %c0_77 = arith.constant 0 : index
    %180 = vector.load %arg16[%c0_75, %c0_76, %c0_77] : memref<3x3x16xf32, #tpu.memory_space<vmem>>, vector<3x3x16xf32>
    %181 = vector.extract_strided_slice %179 {offsets = [0, 0, 0], sizes = [16, 16, 16], strides = [1, 1, 1]} : vector<18x18x16xf32> to vector<16x16x16xf32>
    %182 = vector.extract_strided_slice %180 {offsets = [0, 0, 0], sizes = [1, 1, 16], strides = [1, 1, 1]} : vector<3x3x16xf32> to vector<1x1x16xf32>
    %183 = vector.shape_cast %182 : vector<1x1x16xf32> to vector<16xf32>
    %184 = vector.shape_cast %183 : vector<16xf32> to vector<1x1x16xf32>
    %185 = vector.broadcast %184 : vector<1x1x16xf32> to vector<16x16x16xf32>
    %186 = arith.mulf %181, %185 : vector<16x16x16xf32>
    %187 = vector.extract_strided_slice %179 {offsets = [0, 1, 0], sizes = [16, 16, 16], strides = [1, 1, 1]} : vector<18x18x16xf32> to vector<16x16x16xf32>
    %188 = vector.extract_strided_slice %180 {offsets = [0, 1, 0], sizes = [1, 1, 16], strides = [1, 1, 1]} : vector<3x3x16xf32> to vector<1x1x16xf32>
    %189 = vector.shape_cast %188 : vector<1x1x16xf32> to vector<16xf32>
    %190 = vector.shape_cast %189 : vector<16xf32> to vector<1x1x16xf32>
    %191 = vector.broadcast %190 : vector<1x1x16xf32> to vector<16x16x16xf32>
    %192 = arith.mulf %187, %191 : vector<16x16x16xf32>
    %193 = arith.addf %186, %192 : vector<16x16x16xf32>
    %194 = vector.extract_strided_slice %179 {offsets = [0, 2, 0], sizes = [16, 16, 16], strides = [1, 1, 1]} : vector<18x18x16xf32> to vector<16x16x16xf32>
    %195 = vector.extract_strided_slice %180 {offsets = [0, 2, 0], sizes = [1, 1, 16], strides = [1, 1, 1]} : vector<3x3x16xf32> to vector<1x1x16xf32>
    %196 = vector.shape_cast %195 : vector<1x1x16xf32> to vector<16xf32>
    %197 = vector.shape_cast %196 : vector<16xf32> to vector<1x1x16xf32>
    %198 = vector.broadcast %197 : vector<1x1x16xf32> to vector<16x16x16xf32>
    %199 = arith.mulf %194, %198 : vector<16x16x16xf32>
    %200 = arith.addf %193, %199 : vector<16x16x16xf32>
    %201 = vector.extract_strided_slice %179 {offsets = [1, 0, 0], sizes = [16, 16, 16], strides = [1, 1, 1]} : vector<18x18x16xf32> to vector<16x16x16xf32>
    %202 = vector.extract_strided_slice %180 {offsets = [1, 0, 0], sizes = [1, 1, 16], strides = [1, 1, 1]} : vector<3x3x16xf32> to vector<1x1x16xf32>
    %203 = vector.shape_cast %202 : vector<1x1x16xf32> to vector<16xf32>
    %204 = vector.shape_cast %203 : vector<16xf32> to vector<1x1x16xf32>
    %205 = vector.broadcast %204 : vector<1x1x16xf32> to vector<16x16x16xf32>
    %206 = arith.mulf %201, %205 : vector<16x16x16xf32>
    %207 = arith.addf %200, %206 : vector<16x16x16xf32>
    %208 = vector.extract_strided_slice %179 {offsets = [1, 1, 0], sizes = [16, 16, 16], strides = [1, 1, 1]} : vector<18x18x16xf32> to vector<16x16x16xf32>
    %209 = vector.extract_strided_slice %180 {offsets = [1, 1, 0], sizes = [1, 1, 16], strides = [1, 1, 1]} : vector<3x3x16xf32> to vector<1x1x16xf32>
    %210 = vector.shape_cast %209 : vector<1x1x16xf32> to vector<16xf32>
    %211 = vector.shape_cast %210 : vector<16xf32> to vector<1x1x16xf32>
    %212 = vector.broadcast %211 : vector<1x1x16xf32> to vector<16x16x16xf32>
    %213 = arith.mulf %208, %212 : vector<16x16x16xf32>
    %214 = arith.addf %207, %213 : vector<16x16x16xf32>
    %215 = vector.extract_strided_slice %179 {offsets = [1, 2, 0], sizes = [16, 16, 16], strides = [1, 1, 1]} : vector<18x18x16xf32> to vector<16x16x16xf32>
    %216 = vector.extract_strided_slice %180 {offsets = [1, 2, 0], sizes = [1, 1, 16], strides = [1, 1, 1]} : vector<3x3x16xf32> to vector<1x1x16xf32>
    %217 = vector.shape_cast %216 : vector<1x1x16xf32> to vector<16xf32>
    %218 = vector.shape_cast %217 : vector<16xf32> to vector<1x1x16xf32>
    %219 = vector.broadcast %218 : vector<1x1x16xf32> to vector<16x16x16xf32>
    %220 = arith.mulf %215, %219 : vector<16x16x16xf32>
    %221 = arith.addf %214, %220 : vector<16x16x16xf32>
    %222 = vector.extract_strided_slice %179 {offsets = [2, 0, 0], sizes = [16, 16, 16], strides = [1, 1, 1]} : vector<18x18x16xf32> to vector<16x16x16xf32>
    %223 = vector.extract_strided_slice %180 {offsets = [2, 0, 0], sizes = [1, 1, 16], strides = [1, 1, 1]} : vector<3x3x16xf32> to vector<1x1x16xf32>
    %224 = vector.shape_cast %223 : vector<1x1x16xf32> to vector<16xf32>
    %225 = vector.shape_cast %224 : vector<16xf32> to vector<1x1x16xf32>
    %226 = vector.broadcast %225 : vector<1x1x16xf32> to vector<16x16x16xf32>
    %227 = arith.mulf %222, %226 : vector<16x16x16xf32>
    %228 = arith.addf %221, %227 : vector<16x16x16xf32>
    %229 = vector.extract_strided_slice %179 {offsets = [2, 1, 0], sizes = [16, 16, 16], strides = [1, 1, 1]} : vector<18x18x16xf32> to vector<16x16x16xf32>
    %230 = vector.extract_strided_slice %180 {offsets = [2, 1, 0], sizes = [1, 1, 16], strides = [1, 1, 1]} : vector<3x3x16xf32> to vector<1x1x16xf32>
    %231 = vector.shape_cast %230 : vector<1x1x16xf32> to vector<16xf32>
    %232 = vector.shape_cast %231 : vector<16xf32> to vector<1x1x16xf32>
    %233 = vector.broadcast %232 : vector<1x1x16xf32> to vector<16x16x16xf32>
    %234 = arith.mulf %229, %233 : vector<16x16x16xf32>
    %235 = arith.addf %228, %234 : vector<16x16x16xf32>
    %236 = vector.extract_strided_slice %179 {offsets = [2, 2, 0], sizes = [16, 16, 16], strides = [1, 1, 1]} : vector<18x18x16xf32> to vector<16x16x16xf32>
    %237 = vector.extract_strided_slice %180 {offsets = [2, 2, 0], sizes = [1, 1, 16], strides = [1, 1, 1]} : vector<3x3x16xf32> to vector<1x1x16xf32>
    %238 = vector.shape_cast %237 : vector<1x1x16xf32> to vector<16xf32>
    %239 = vector.shape_cast %238 : vector<16xf32> to vector<1x1x16xf32>
    %240 = vector.broadcast %239 : vector<1x1x16xf32> to vector<16x16x16xf32>
    %241 = arith.mulf %236, %240 : vector<16x16x16xf32>
    %242 = arith.addf %235, %241 : vector<16x16x16xf32>
    %243 = vector.shape_cast %242 : vector<16x16x16xf32> to vector<256x16xf32>
    %c0_78 = arith.constant 0 : index
    %c0_79 = arith.constant 0 : index
    %244 = vector.load %arg17[%c0_78, %c0_79] : memref<16x16xf32, #tpu.memory_space<vmem>>, vector<16x16xf32>
    %cst_80 = arith.constant dense<0.000000e+00> : vector<256x16xf32>
    %245 = tpu.matmul %243, %244, %cst_80 {dimension_numbers = #tpu.dot_dimension_numbers<[1], [0], [0], [1], [0, 0, 1, 1], [], []>} : vector<256x16xf32>, vector<16x16xf32>, vector<256x16xf32> -> vector<256x16xf32>
    %c0_81 = arith.constant 0 : index
    %c0_82 = arith.constant 0 : index
    %c0_83 = arith.constant 0 : index
    %246 = vector.load %arg20[%c0_81, %c0_82, %c0_83] : memref<1x256x16xf32, #tpu.memory_space<vmem>>, vector<1x256x16xf32>
    %247 = vector.shape_cast %246 : vector<1x256x16xf32> to vector<256x16xf32>
    %248 = vector.shape_cast %245 : vector<256x16xf32> to vector<1x256x16xf32>
    tpu.vector_store %arg20[%c0_81, %c0_82, %c0_83], %248 {strides = array<i32>} : memref<1x256x16xf32, #tpu.memory_space<vmem>>, vector<1x256x16xf32>,
    return
  }
  func.func @transform_0(%arg0: i32) -> (i32, i32, i32) {
    %c0_i32 = arith.constant 0 : i32
    %c0_i32_0 = arith.constant 0 : i32
    %c0_i32_1 = arith.constant 0 : i32
    return %arg0, %c0_i32, %c0_i32_0 : i32, i32, i32
  }
  func.func @transform_1(%arg0: i32) -> (i32, i32, i32) {
    %c0_i32 = arith.constant 0 : i32
    %c0_i32_0 = arith.constant 0 : i32
    %c0_i32_1 = arith.constant 0 : i32
    return %arg0, %c0_i32, %c0_i32_0 : i32, i32, i32
  }
  func.func @transform_2(%arg0: i32) -> (i32, i32, i32) {
    %c0_i32 = arith.constant 0 : i32
    %c0_i32_0 = arith.constant 0 : i32
    %c0_i32_1 = arith.constant 0 : i32
    return %arg0, %c0_i32, %c0_i32_0 : i32, i32, i32
  }
  func.func @transform_3(%arg0: i32) -> (i32, i32) {
    %c0_i32 = arith.constant 0 : i32
    %c0_i32_0 = arith.constant 0 : i32
    %c0_i32_1 = arith.constant 0 : i32
    return %c0_i32, %c0_i32_0 : i32, i32
  }
  func.func @transform_4(%arg0: i32) -> (i32, i32) {
    %c0_i32 = arith.constant 0 : i32
    %c0_i32_0 = arith.constant 0 : i32
    %c0_i32_1 = arith.constant 0 : i32
    return %c0_i32, %c0_i32_0 : i32, i32
  }
  func.func @transform_5(%arg0: i32) -> (i32, i32) {
    %c0_i32 = arith.constant 0 : i32
    %c0_i32_0 = arith.constant 0 : i32
    %c0_i32_1 = arith.constant 0 : i32
    return %c0_i32, %c0_i32_0 : i32, i32
  }
  func.func @transform_6(%arg0: i32) -> (i32, i32) {
    %c0_i32 = arith.constant 0 : i32
    %c0_i32_0 = arith.constant 0 : i32
    %c0_i32_1 = arith.constant 0 : i32
    return %c0_i32, %c0_i32_0 : i32, i32
  }
  func.func @transform_7(%arg0: i32) -> (i32, i32) {
    %c0_i32 = arith.constant 0 : i32
    %c0_i32_0 = arith.constant 0 : i32
    %c0_i32_1 = arith.constant 0 : i32
    return %c0_i32, %c0_i32_0 : i32, i32
  }
  func.func @transform_8(%arg0: i32) -> (i32, i32) {
    %c0_i32 = arith.constant 0 : i32
    %c0_i32_0 = arith.constant 0 : i32
    %c0_i32_1 = arith.constant 0 : i32
    return %c0_i32, %c0_i32_0 : i32, i32
  }
  func.func @transform_9(%arg0: i32) -> (i32, i32) {
    %c0_i32 = arith.constant 0 : i32
    %c0_i32_0 = arith.constant 0 : i32
    %c0_i32_1 = arith.constant 0 : i32
    return %c0_i32, %c0_i32_0 : i32, i32
  }
  func.func @transform_10(%arg0: i32) -> (i32, i32) {
    %c0_i32 = arith.constant 0 : i32
    %c0_i32_0 = arith.constant 0 : i32
    %c0_i32_1 = arith.constant 0 : i32
    return %c0_i32, %c0_i32_0 : i32, i32
  }
  func.func @transform_11(%arg0: i32) -> (i32, i32, i32) {
    %c0_i32 = arith.constant 0 : i32
    %c0_i32_0 = arith.constant 0 : i32
    %c0_i32_1 = arith.constant 0 : i32
    %c0_i32_2 = arith.constant 0 : i32
    return %c0_i32, %c0_i32_0, %c0_i32_1 : i32, i32, i32
  }
  func.func @transform_12(%arg0: i32) -> (i32, i32) {
    %c0_i32 = arith.constant 0 : i32
    %c0_i32_0 = arith.constant 0 : i32
    %c0_i32_1 = arith.constant 0 : i32
    return %c0_i32, %c0_i32_0 : i32, i32
  }
  func.func @transform_13(%arg0: i32) -> (i32, i32, i32) {
    %c0_i32 = arith.constant 0 : i32
    %c0_i32_0 = arith.constant 0 : i32
    %c0_i32_1 = arith.constant 0 : i32
    %c0_i32_2 = arith.constant 0 : i32
    return %c0_i32, %c0_i32_0, %c0_i32_1 : i32, i32, i32
  }
  func.func @transform_14(%arg0: i32) -> (i32, i32) {
    %c0_i32 = arith.constant 0 : i32
    %c0_i32_0 = arith.constant 0 : i32
    %c0_i32_1 = arith.constant 0 : i32
    return %c0_i32, %c0_i32_0 : i32, i32
  }
  func.func @transform_15(%arg0: i32) -> (i32, i32, i32) {
    %c0_i32 = arith.constant 0 : i32
    %c0_i32_0 = arith.constant 0 : i32
    %c0_i32_1 = arith.constant 0 : i32
    %c0_i32_2 = arith.constant 0 : i32
    return %c0_i32, %c0_i32_0, %c0_i32_1 : i32, i32, i32
  }
  func.func @transform_16(%arg0: i32) -> (i32, i32) {
    %c0_i32 = arith.constant 0 : i32
    %c0_i32_0 = arith.constant 0 : i32
    %c0_i32_1 = arith.constant 0 : i32
    return %c0_i32, %c0_i32_0 : i32, i32
  }
  func.func @transform_17(%arg0: i32) -> (i32, i32, i32) {
    %c0_i32 = arith.constant 0 : i32
    %c0_i32_0 = arith.constant 0 : i32
    %c0_i32_1 = arith.constant 0 : i32
    return %arg0, %c0_i32, %c0_i32_0 : i32, i32, i32
  }
  func.func @transform_18(%arg0: i32) -> (i32, i32, i32) {
    %c0_i32 = arith.constant 0 : i32
    %c0_i32_0 = arith.constant 0 : i32
    %c0_i32_1 = arith.constant 0 : i32
    return %arg0, %c0_i32, %c0_i32_0 : i32, i32, i32
  }
  func.func @transform_19(%arg0: i32) -> (i32, i32, i32) {
    %c0_i32 = arith.constant 0 : i32
    %c0_i32_0 = arith.constant 0 : i32
    %c0_i32_1 = arith.constant 0 : i32
    return %arg0, %c0_i32, %c0_i32_0 : i32, i32, i32
  }
}

</mosaic_0001>

<bundles_post_ra>
// kernel: fpn_forward.1
= control target key start
LH: loop header
LB: loop body
LE: loop exit
PB: predicated region body
PF: predicated region fallthrough
CT: control target
= control target key end

     0   :  { %s8553_s0 = inlined_call_operand.vmem [shape: f32[2,16,32], index: 0, kind: input, shape index: {}]   ;;  %s8554_s1 = inlined_call_operand.vmem [shape: f32[2,64,16], index: 1, kind: input, shape index: {}]   ;;  %s8555_s2 = inlined_call_operand.vmem [shape: f32[2,256,8], index: 2, kind: input, shape index: {}]   ;;  %s8556_s3 = inlined_call_operand.vmem [shape: f32[32,16], index: 3, kind: input, shape index: {}]   ;;  %s8557_s4 = inlined_call_operand.vmem [shape: f32[1,16], index: 4, kind: input, shape index: {}]   ;;  %s8558_s5 = inlined_call_operand.vmem [shape: f32[16,16], index: 5, kind: input, shape index: {}]   ;;  %s8559_s6 = inlined_call_operand.vmem [shape: f32[1,16], index: 6, kind: input, shape index: {}]   ;;  %s8560_s7 = inlined_call_operand.vmem [shape: f32[8,16], index: 7, kind: input, shape index: {}]   ;;  %s8561_s8 = inlined_call_operand.vmem [shape: f32[1,16], index: 8, kind: input, shape index: {}]   ;;  %s8562_s9 = inlined_call_operand.vmem [shape: f32[64,16], index: 9, kind: input, shape index: {}]   ;;  %s8563_s10 = inlined_call_operand.vmem [shape: f32[256,64], index: 10, kind: input, shape index: {}]   ;;  %s8564_s11 = inlined_call_operand.vmem [shape: f32[3,3,16], index: 11, kind: input, shape index: {}]   ;;  %s8565_s12 = inlined_call_operand.vmem [shape: f32[16,16], index: 12, kind: input, shape index: {}]   ;;  %s8566_s13 = inlined_call_operand.vmem [shape: f32[3,3,16], index: 13, kind: input, shape index: {}]   ;;  %s8567_s14 = inlined_call_operand.vmem [shape: f32[16,16], index: 14, kind: input, shape index: {}]   ;;  %s8568_s15 = inlined_call_operand.vmem [shape: f32[3,3,16], index: 15, kind: input, shape index: {}]   ;;  %s8569_s16 = inlined_call_operand.vmem [shape: f32[16,16], index: 16, kind: input, shape index: {}]   ;;  %s8570_s17 = inlined_call_operand.hbm [shape: f32[2,16,16], index: 17, kind: output, shape index: {0}]   ;;  %s8571_s18 = inlined_call_operand.hbm [shape: f32[2,64,16], index: 18, kind: output, shape index: {1}]   ;;  %s8572_s19 = inlined_call_operand.vmem [shape: f32[2,256,16], index: 19, kind: output, shape index: {2}]  }
   0x1   :  { %8581 = sst [smem:[#allocation17_spill]] %s8553_s0 }
   0x2   :  { %8582 = sst [smem:[#allocation18_spill]] %s8554_s1 }
   0x3   :  { %8583 = sst [smem:[#allocation19_spill]] %s8555_s2 }
   0x4   :  { %8584 = sst [smem:[#allocation20_spill]] %s8556_s3 }
   0x5   :  { %8585 = sst [smem:[#allocation21_spill]] %s8557_s4 }
   0x6   :  { %8586 = sst [smem:[#allocation22_spill]] %s8558_s5 }
   0x7   :  { %8587 = sst [smem:[#allocation23_spill]] %s8559_s6 }
   0x8   :  { %8588 = sst [smem:[#allocation24_spill]] %s8560_s7 }
   0x9   :  { %8589 = sst [smem:[#allocation25_spill]] %s8561_s8 }
   0xa   :  { %8590 = sst [smem:[#allocation26_spill]] %s8562_s9 }
   0xb   :  { %8591 = sst [smem:[#allocation27_spill]] %s8571_s18 }
   0xc   :  { %25 = vsyncpa [#allocation6], 0 }
   0xd   :  { %27 = vsyncpa [#allocation6 + $0x1], 0 }
   0xe   :  { %28 = vsyncpa [#allocation8], 0 }
   0xf   :  { %30 = vsyncpa [#allocation8 + $0x1], 0  ;;  %s5909_s0 = smov 0   ;;  %s5911_s30 = smov 0  }
  0x10   :  { %s5913_s20 = smov 0   ;;  %s5915_s21 = smov 0  }
  0x11 LB: > { %8592 = sst [smem:[#allocation11_spill]] %s5790_s0  ;;  %s5930_s1 = sadd.s32 4294967295, %s5802_s21   ;;  %s5802_s21 = sphi %s5915_s21, %s8616_s21   ;;  %s5798_s20 = sphi %s5913_s20, %s8618_s20   ;;  %s5794_s30 = sphi %s5911_s30, %s8620_s30   ;;  %s5790_s0 = sphi %s5909_s0, %s8619_s0  }
  0x12   : > { %8593 = sst [smem:[#allocation12_spill]] %s5798_s20  ;;  %s5115_s22 = sadd.s32 4294967294, %s5802_s21  }
  0x13   : > { %8594 = sst [smem:[#allocation13_spill]] %s5802_s21  ;;  %s5934_s2 = sadd.s32 1, %s5802_s21  }
  0x14   : > { %8595 = sst [smem:[#allocation14_spill]] %s5934_s2  ;;  %s415_s23 = sadd.s32 1, %s5798_s20 }
  0x15   : > { %s412_s24 = ssub.s32 %s5802_s21, %s5934_s2  ;;  %p425_p0 = scmp.ne.s32.totalorder %s5798_s20, %s5794_s30 }
  0x16   : > { %p413_p1 = scmp.eq.s32.totalorder %s412_s24, 0  ;;  %p426_p2 = scmp.eq.s32.totalorder %s5930_s1, 1 }
  0x17   : > { %p431_p3 = scmp.ne.s32.totalorder %s5794_s30, %s5790_s0  ;;  %p432_p4 = scmp.eq.s32.totalorder %s5115_s22, 1 }
  0x18   : > { %s5945_s25 = scalar_select %p413_p1, %s5798_s20, %s415_s23  }
  0x19   : > { %p5947_p5 = por %p426_p2, %p425_p0  ;;  %p5951_p6 = por %p432_p4, %p431_p3 }
  0x1a   : > { %8596 = sst [smem:[#allocation15_spill]] %s5945_s25  ;;  %p5118_p7 = scmp.ge.s32.totalorder %s5802_s21, 1 }
  0x1b   : > { %s8598_s26 = scalar_select %p5951_p6, 1, 0 }
  0x1c   : > { %p568_p8 = scmp.lt.s32.totalorder %s5802_s21, 3 }
  0x1d   : > { %8599 = sst [smem:[#allocation16_spill]] %s8598_s26 }
  0x1e   : > { %p569_p9 = pnand %p5118_p7, %p568_p8 }
  0x1f   : > { %s8600_s29 = sld [smem:[#allocation20_spill]] (!%p569_p9)  ;;  %p644_p10 = scmp.lt.s32.totalorder (!%p569_p9), %s5930_s1, 1 }
  0x20   : > { %572 = sbr.rel (%p569_p9) target bundleno = 1159 (0x487), region = 88  ;;  %s8601_s5 = sld [smem:[#allocation22_spill]] (!%p569_p9) }
  0x21   : > { %s8602_s24 = sld [smem:[#allocation17_spill]] (!%p569_p9)  ;;  %s7139_s23 = sand.u32 (!%p569_p9), 1, %s5794_s30  }
  0x22   : > { %s8603_s18 = sld [smem:[#allocation18_spill]] (!%p569_p9)  ;;  %s5268_s0 = sshll.u32 (!%p569_p9), %s5930_s1, 8 }
  0x23   : > { %s8604_s9 = sld [smem:[#allocation26_spill]] (!%p569_p9) }
  0x24   : > { %s8606_s7 = sld [smem:[#allocation24_spill]] (!%p569_p9) }
  0x25   : > { %v669_v0 = vld [vmem:[%s8600_s29 + $0x18] sm:$0xff]  ;;  %v668_v1 = vld [vmem:[%s8600_s29 + $0x10] sm:$0xff]  ;;  %v667_v3 = vld [vmem:[%s8600_s29 + $0x8] sm:$0xff]  ;;  %s5971_s26 = scalar_select %p644_p10, %s5930_s1, 1  ;;  %vm677_vm0 = vcmask 261120   ;;  %vm1799_vm1 = vcmask 128000  }
  0x26   : > { %5417 = vmatprep.subr.mxu0 %v669_v0  ;;  %v768_v2 = vld [vmem:[%s8601_s5 + $0x8] sm:$0xff]  ;;  %v666_v4 = vld [vmem:[%s8600_s29] sm:$0xff]  ;;  %v5804_v7 = vmov 0.0   ;;  %vm776_vm2 = vcmask 130048   ;;  %vm1091_vm3 = vcmask 64512   ;;  %s8607_s4 = sld [smem:[#allocation21_spill]] }
  0x27   : > { %5418 = vmatpush3.msra.mxu0 %v669_v0  ;;  %5428 = vmatprep.subr.mxu1 %v768_v2  ;;  %s5264_s22 = sshll.u32 %s5971_s26, 4  ;;  %s5265_s2 = sshll.u32 %s5971_s26, 6  ;;  %1800 = vst.msk [vmem:[#allocation2] sm:$0x3f] %vm1799_vm1, %v5804_v7  ;;  %1803 = vst.msk [vmem:[#allocation2 + $0x18] sm:$0x3f] %vm1799_vm1, %v5804_v7 }
  0x28   : > { %5419 = vmatprep.subr.mxu0 %v668_v1  ;;  %5429 = vmatpush3.msra.mxu1 %v768_v2  ;;  %s648_s20 = scalar_lea.vmem %s8602_s24, %s5264_s22  ;;  %s5984_s27 = scalar_lea.vmem %s8603_s18, %s5265_s2  ;;  %1804 = vst.msk [vmem:[#allocation2 + $0x20] sm:$0x3f] %vm1799_vm1, %v5804_v7  ;;  %1805 = vst.msk [vmem:[#allocation2 + $0x28] sm:$0x3f] %vm1799_vm1, %v5804_v7  ;;  %v767_v8 = vld [vmem:[%s8601_s5] sm:$0xff]  ;;  %vm1813_vm4 = vcmask 125952  }
  0x29   : > { %5420 = vmatpush3.msra.mxu0 %v668_v1  ;;  %v664_v5 = vld [vmem:[%s648_s20] sm:$0xff]  ;;  %v665_v6 = vld [vmem:[%s648_s20 + $0x8] sm:$0xff]  ;;  %1801 = vst.msk [vmem:[#allocation2 + $0x8] sm:$0x3f] %vm1799_vm1, %v5804_v7  ;;  %1802 = vst.msk [vmem:[#allocation2 + $0x10] sm:$0x3f] %vm1799_vm1, %v5804_v7  ;;  %5430 = vmatprep.subr.mxu1 %v767_v8 }
  0x2a   : > { %5421 = vmatprep.subr.mxu0 %v667_v3  ;;  %5425 = vmatprep.mubr.msk.f32.mxu0 %vm677_vm0, %v664_v5  ;;  %v759_v9 = vld [vmem:[%s5984_s27] sm:$0xff]  ;;  %2092 = vst.msk [vmem:[#allocation3] sm:$0xff] %vm776_vm2, %v5804_v7  ;;  %2095 = vst.msk [vmem:[#allocation3 + $0x10] sm:$0xff] %vm776_vm2, %v5804_v7  ;;  %v760_v10 = vld [vmem:[%s5984_s27 + $0x8] sm:$0xff]  ;;  %s5266_s21 = sshll.u32 %s5971_s26, 8  ;;  %s8605_s24 = sld [smem:[#allocation19_spill]] }
  0x2b   : > { %5422 = vmatpush3.msra.mxu0 %v667_v3  ;;  %5431 = vmatpush3.msra.mxu1 %v767_v8  ;;  %2097 = vst.msk [vmem:[#allocation3 + $0x20] sm:$0xff] %vm776_vm2, %v5804_v7  ;;  %2099 = vst.msk [vmem:[#allocation3 + $0x30] sm:$0xff] %vm776_vm2, %v5804_v7  ;;  %v761_v11 = vld [vmem:[%s5984_s27 + $0x10] sm:$0xff]  ;;  %v906_v12 = vld [vmem:[%s8604_s9] sm:$0xff]  ;;  %vm2093_vm5 = vcmask 123904   ;;  %vm1445_vm6 = vcmask 523264   ;;  %v1827_v3 = vlaneseq  ;;  %s8125_s18 = scalar_lea.vmem %s8572_s19, %s5266_s21 }
  0x2c   : > { %5423 = vmatprep.subr.mxu0 %v666_v4  ;;  %5432 = vmatprep.mubr.msk.f32.mxu1 %vm776_vm2, %v759_v9  ;;  %2101 = vst.msk [vmem:[#allocation3 + $0x40] sm:$0xff] %vm776_vm2, %v5804_v7  ;;  %2103 = vst.msk [vmem:[#allocation3 + $0x50] sm:$0xff] %vm776_vm2, %v5804_v7  ;;  %v762_v13 = vld [vmem:[%s5984_s27 + $0x18] sm:$0xff]  ;;  %v763_v14 = vld [vmem:[%s5984_s27 + $0x20] sm:$0xff]  ;;  %s8608_s6 = sld [smem:[#allocation23_spill]]  ;;  %vm2193_vm7 = vcmask 1046528  }
  0x2d   : > { %5424 = vmatpush3.msra.mxu0 %v666_v4  ;;  %2105 = vst.msk [vmem:[#allocation3 + $0x60] sm:$0xff] %vm776_vm2, %v5804_v7  ;;  %2107 = vst.msk [vmem:[#allocation3 + $0x70] sm:$0xff] %vm776_vm2, %v5804_v7  ;;  %5433 = vmatmul.mubr.msk.f32.vlgmr.msra.gmra.mxu1 %vm776_vm2, %v760_v10  ;;  %v764_v15 = vld [vmem:[%s5984_s27 + $0x28] sm:$0xff]  ;;  %v765_v16 = vld [vmem:[%s5984_s27 + $0x30] sm:$0xff]  ;;  %v1828_v4 = vshrl.u32 %v1827_v3, 7  ;;  %vm2270_vm8 = vcmask 1045504  }
  0x2e   : > { %5426 = vmatmul.mubr.msk.f32.vlgmr.msra.gmra.mxu0 %vm677_vm0, %v665_v6  ;;  %2109 = vst.msk [vmem:[#allocation3 + $0x80] sm:$0xff] %vm776_vm2, %v5804_v7  ;;  %2111 = vst.msk [vmem:[#allocation3 + $0x90] sm:$0xff] %vm776_vm2, %v5804_v7  ;;  %5435 = vmatprep.mubr.msk.f32.mxu1 %vm776_vm2, %v761_v11  ;;  %v766_v17 = vld [vmem:[%s5984_s27 + $0x38] sm:$0xff]  ;;  %v1083_v18 = vld [vmem:[%s8606_s7] sm:$0xff]  ;;  %s8609_s8 = sld [smem:[#allocation25_spill]]  ;;  %s5120_s2 = sshll.u32 %s7139_s23, 6 }
  0x2f   : > { %2794 = vst.msk [vmem:[#allocation4] sm:$0xff] %vm776_vm2, %v5804_v7  ;;  %2795 = vst.msk [vmem:[#allocation4 + $0x8] sm:$0xff] %vm776_vm2, %v5804_v7  ;;  %5448 = vmatprep.mubr.msk.f32.mxu0 %vm776_vm2, %v906_v12  ;;  %5460 = vmatprep.subr.mxu1 %v1083_v18  ;;  %v5129_v37 = vld [vmem:[%s8607_s4] ss:$0 sm:$0xff]  ;;  %v907_v43 = vld [vmem:[%s8604_s9 + $0x8] sm:$0xff]  ;;  %v6277_v5 = vsub.s32 1, %v1828_v4 }
  0x30   : > { %2797 = vst.msk [vmem:[#allocation4 + $0x18] sm:$0xff] %vm776_vm2, %v5804_v7  ;;  %2798 = vst.msk [vmem:[#allocation4 + $0x20] sm:$0xff] %vm776_vm2, %v5804_v7  ;;  %s6113_s20 = scalar_lea.vmem %s8605_s24, %s5266_s21  ;;  %5461 = vmatpush3.msra.mxu1 %v1083_v18  ;;  %v908_v45 = vld [vmem:[%s8604_s9 + $0x10] sm:$0xff]  ;;  %v909_v46 = vld [vmem:[%s8604_s9 + $0x18] sm:$0xff]  ;;  %v6285_v9 = vsub.s32 2, %v1828_v4  ;;  %s5119_s24 = sshll.u32 %s7139_s23, 4 }
  0x31   : > { %2800 = vst.msk [vmem:[#allocation4 + $0x30] sm:$0xff] %vm776_vm2, %v5804_v7  ;;  %2801 = vst.msk [vmem:[#allocation4 + $0x38] sm:$0xff] %vm776_vm2, %v5804_v7  ;;  %5436 = vmatmul.mubr.msk.f32.gmra.mxu1 %vm776_vm2, %v762_v13  ;;  %v1051_v19 = vld [vmem:[%s6113_s20] sm:$0xff]  ;;  %v1052_v20 = vld [vmem:[%s6113_s20 + $0x8] sm:$0xff]  ;;  %s7204_s28 = scalar_lea.vmem [#allocation5], %s5119_s24  ;;  %s7238_s27 = scalar_lea.vmem [#allocation7], %s5120_s2 }
  0x32   : > { %2803 = vst.msk [vmem:[#allocation4 + $0x48] sm:$0xff] %vm776_vm2, %v5804_v7  ;;  %2804 = vst.msk [vmem:[#allocation4 + $0x50] sm:$0xff] %vm776_vm2, %v5804_v7  ;;  %5438 = vmatprep.mubr.msk.f32.mxu1 %vm776_vm2, %v763_v14  ;;  %v1053_v21 = vld [vmem:[%s6113_s20 + $0x10] sm:$0xff]  ;;  %v1054_v22 = vld [vmem:[%s6113_s20 + $0x18] sm:$0xff]  ;;  %s4953_s26 = sshll.u32 %s7204_s28, 4  ;;  %s4969_s21 = sshll.u32 %s7238_s27, 4  ;;  %s8436_s26 = int_to_ptr.vmem [resolvable:$true] %s4953_s26  ;;  %s8438_s21 = int_to_ptr.vmem [resolvable:$true] %s4969_s21 }
  0x33   : > { %2806 = vst.msk [vmem:[#allocation4 + $0x60] sm:$0xff] %vm776_vm2, %v5804_v7  ;;  %2807 = vst.msk [vmem:[#allocation4 + $0x68] sm:$0xff] %vm776_vm2, %v5804_v7  ;;  %v1055_v23 = vld [vmem:[%s6113_s20 + $0x20] sm:$0xff]  ;;  %v1056_v24 = vld [vmem:[%s6113_s20 + $0x28] sm:$0xff]  ;;  %s8444_s2 = scalar_lea.hbm %s8570_s17, %s5268_s0  ;;  %s5712_s4 = scalar_lea.vmem %s8436_s26, 256 }
  0x34   : > { %2809 = vst.msk [vmem:[#allocation4 + $0x78] sm:$0xff] %vm776_vm2, %v5804_v7  ;;  %2810 = vst.msk [vmem:[#allocation4 + $0x80] sm:$0xff] %vm776_vm2, %v5804_v7  ;;  %v1057_v25 = vld [vmem:[%s6113_s20 + $0x30] sm:$0xff]  ;;  %v1058_v26 = vld [vmem:[%s6113_s20 + $0x38] sm:$0xff]  ;;  %p5713_p11 = scmp.ne.s32.totalorder %s8436_s26, %s5712_s4 }
  0x35   : > { %2812 = vst.msk [vmem:[#allocation4 + $0x90] sm:$0xff] %vm776_vm2, %v5804_v7  ;;  %2813 = vst.msk [vmem:[#allocation4 + $0x98] sm:$0xff] %vm776_vm2, %v5804_v7  ;;  %5439 = vmatmul.mubr.msk.f32.gmra.mxu1 %vm776_vm2, %v764_v15  ;;  %v1059_v27 = vld [vmem:[%s6113_s20 + $0x40] sm:$0xff]  ;;  %v1060_v28 = vld [vmem:[%s6113_s20 + $0x48] sm:$0xff] }
  0x36   : > { %2815 = vst.msk [vmem:[#allocation4 + $0xa8] sm:$0xff] %vm776_vm2, %v5804_v7  ;;  %2816 = vst.msk [vmem:[#allocation4 + $0xb0] sm:$0xff] %vm776_vm2, %v5804_v7  ;;  %5441 = vmatprep.mubr.msk.f32.mxu1 %vm776_vm2, %v765_v16  ;;  %v1061_v29 = vld [vmem:[%s6113_s20 + $0x50] sm:$0xff]  ;;  %v1062_v30 = vld [vmem:[%s6113_s20 + $0x58] sm:$0xff]  ;;  %p5714_p12 = pnand %p5713_p11, %p5947_p5 }
  0x37   : > { %2818 = vst.msk [vmem:[#allocation4 + $0xc0] sm:$0xff] %vm776_vm2, %v5804_v7  ;;  %2819 = vst.msk [vmem:[#allocation4 + $0xc8] sm:$0xff] %vm776_vm2, %v5804_v7  ;;  %v1063_v31 = vld [vmem:[%s6113_s20 + $0x60] sm:$0xff]  ;;  %v1064_v32 = vld [vmem:[%s6113_s20 + $0x68] sm:$0xff] }
  0x38   : > { %2821 = vst.msk [vmem:[#allocation4 + $0xd8] sm:$0xff] %vm776_vm2, %v5804_v7  ;;  %2822 = vst.msk [vmem:[#allocation4 + $0xe0] sm:$0xff] %vm776_vm2, %v5804_v7  ;;  %v1065_v33 = vld [vmem:[%s6113_s20 + $0x70] sm:$0xff]  ;;  %v1066_v34 = vld [vmem:[%s6113_s20 + $0x78] sm:$0xff]  ;;  %p5715_p13 = pneg %p5714_p12 }
  0x39   : > { %2824 = vst.msk [vmem:[#allocation4 + $0xf0] sm:$0xff] %vm776_vm2, %v5804_v7  ;;  %2825 = vst.msk [vmem:[#allocation4 + $0xf8] sm:$0xff] %vm776_vm2, %v5804_v7  ;;  %5442 = vmatmul.mubr.msk.f32.gmra.mxu1 %vm776_vm2, %v766_v17  ;;  %v1067_v35 = vld [vmem:[%s6113_s20 + $0x80] sm:$0xff]  ;;  %v1068_v36 = vld [vmem:[%s6113_s20 + $0x88] sm:$0xff] }
  0x3a   : > { %2827 = vst.msk [vmem:[#allocation4 + $0x108] sm:$0xff] %vm776_vm2, %v5804_v7  ;;  %2828 = vst.msk [vmem:[#allocation4 + $0x110] sm:$0xff] %vm776_vm2, %v5804_v7  ;;  %5462 = vmatprep.mubr.msk.f32.mxu1 %vm1091_vm3, %v1051_v19  ;;  %v910_v47 = vld [vmem:[%s8604_s9 + $0x20] sm:$0xff]  ;;  %v911_v48 = vld [vmem:[%s8604_s9 + $0x28] sm:$0xff] }
  0x3b   : > { %2830 = vst.msk [vmem:[#allocation4 + $0x120] sm:$0xff] %vm776_vm2, %v5804_v7  ;;  %2831 = vst.msk [vmem:[#allocation4 + $0x128] sm:$0xff] %vm776_vm2, %v5804_v7  ;;  %v912_v49 = vld [vmem:[%s8604_s9 + $0x30] sm:$0xff]  ;;  %v913_v50 = vld [vmem:[%s8604_s9 + $0x38] sm:$0xff] }
  0x3c   : > { %2833 = vst.msk [vmem:[#allocation4 + $0x138] sm:$0xff] %vm776_vm2, %v5804_v7  ;;  %2834 = vst.msk [vmem:[#allocation4 + $0x140] sm:$0xff] %vm776_vm2, %v5804_v7  ;;  %v1069_v51 = vld [vmem:[%s6113_s20 + $0x90] sm:$0xff]  ;;  %v1070_v52 = vld [vmem:[%s6113_s20 + $0x98] sm:$0xff] }
  0x3d   : > { %2836 = vst.msk [vmem:[#allocation4 + $0x150] sm:$0xff] %vm776_vm2, %v5804_v7  ;;  %2837 = vst.msk [vmem:[#allocation4 + $0x158] sm:$0xff] %vm776_vm2, %v5804_v7  ;;  %5463 = vmatmul.mubr.msk.f32.vlgmr.msra.gmra.mxu1 %vm1091_vm3, %v1052_v20  ;;  %v1071_v53 = vld [vmem:[%s6113_s20 + $0xa0] sm:$0xff]  ;;  %v1072_v54 = vld [vmem:[%s6113_s20 + $0xa8] sm:$0xff] }
  0x3e   : > { %2839 = vst.msk [vmem:[#allocation4 + $0x168] sm:$0xff] %vm776_vm2, %v5804_v7  ;;  %2840 = vst.msk [vmem:[#allocation4 + $0x170] sm:$0xff] %vm776_vm2, %v5804_v7  ;;  %5465 = vmatprep.mubr.msk.f32.mxu1 %vm1091_vm3, %v1053_v21  ;;  %v1073_v55 = vld [vmem:[%s6113_s20 + $0xb0] sm:$0xff]  ;;  %v1074_v56 = vld [vmem:[%s6113_s20 + $0xb8] sm:$0xff] }
  0x3f   : > { %2842 = vst.msk [vmem:[#allocation4 + $0x180] sm:$0xff] %vm776_vm2, %v5804_v7  ;;  %2843 = vst.msk [vmem:[#allocation4 + $0x188] sm:$0xff] %vm776_vm2, %v5804_v7  ;;  %v1075_v57 = vld [vmem:[%s6113_s20 + $0xc0] sm:$0xff]  ;;  %v1076_v58 = vld [vmem:[%s6113_s20 + $0xc8] sm:$0xff] }
  0x40   : > { %2845 = vst.msk [vmem:[#allocation4 + $0x198] sm:$0xff] %vm776_vm2, %v5804_v7  ;;  %2846 = vst.msk [vmem:[#allocation4 + $0x1a0] sm:$0xff] %vm776_vm2, %v5804_v7  ;;  %v1077_v59 = vld [vmem:[%s6113_s20 + $0xd0] sm:$0xff]  ;;  %v1078_v60 = vld [vmem:[%s6113_s20 + $0xd8] sm:$0xff] }
  0x41   : > { %5466 = vmatmul.mubr.msk.f32.gmra.mxu1 %vm1091_vm3, %v1054_v22  ;;  %2098 = vst.msk [vmem:[#allocation3 + $0x28] sm:$0x3] %vm2093_vm5, %v5804_v7  ;;  %2094 = vst.msk [vmem:[#allocation3 + $0x8] sm:$0x3] %vm2093_vm5, %v5804_v7  ;;  %v1079_v61 = vld [vmem:[%s6113_s20 + $0xe0] sm:$0xff]  ;;  %v1080_v62 = vld [vmem:[%s6113_s20 + $0xe8] sm:$0xff] }
  0x42   : > { %5468 = vmatprep.mubr.msk.f32.mxu1 %vm1091_vm3, %v1055_v23  ;;  %2096 = vst.msk [vmem:[#allocation3 + $0x18] sm:$0x3] %vm2093_vm5, %v5804_v7  ;;  %2100 = vst.msk [vmem:[#allocation3 + $0x38] sm:$0x3] %vm2093_vm5, %v5804_v7  ;;  %v1081_v63 = vld [vmem:[%s6113_s20 + $0xf0] sm:$0xff]  ;;  %v1082_v0 = vld [vmem:[%s6113_s20 + $0xf8] sm:$0xff] }
  0x43   : > { %2102 = vst.msk [vmem:[#allocation3 + $0x48] sm:$0x3] %vm2093_vm5, %v5804_v7  ;;  %2104 = vst.msk [vmem:[#allocation3 + $0x58] sm:$0x3] %vm2093_vm5, %v5804_v7  ;;  %v1413_v1 = vld [vmem:[%s8563_s10] sm:$0xff] }
  0x44   : > { %2106 = vst.msk [vmem:[#allocation3 + $0x68] sm:$0x3] %vm2093_vm5, %v5804_v7  ;;  %2108 = vst.msk [vmem:[#allocation3 + $0x78] sm:$0x3] %vm2093_vm5, %v5804_v7  ;;  %v1433_v2 = vld [vmem:[%s8563_s10 + $0xa0] sm:$0xff] }
  0x45   : > { %5469 = vmatmul.mubr.msk.f32.gmra.mxu1 %vm1091_vm3, %v1056_v24  ;;  %2110 = vst.msk [vmem:[#allocation3 + $0x88] sm:$0x3] %vm2093_vm5, %v5804_v7  ;;  %2112 = vst.msk [vmem:[#allocation3 + $0x98] sm:$0x3] %vm2093_vm5, %v5804_v7  ;;  %v1824_v6 = vld [vmem:[%s8564_s11] sm:$0x7] }
  0x46   : > { %5471 = vmatprep.mubr.msk.f32.mxu1 %vm1091_vm3, %v1057_v25  ;;  %2796 = vst.msk [vmem:[#allocation4 + $0x10] sm:$0x3] %vm2093_vm5, %v5804_v7  ;;  %2799 = vst.msk [vmem:[#allocation4 + $0x28] sm:$0x3] %vm2093_vm5, %v5804_v7  ;;  %v1838_v8 = vrot.slane %v1824_v6, %v6277_v5  ;;  %v1818_v10 = vld [vmem:[#allocation2] sm:$0x3f]  ;;  %v1862_v16 = vrot.slane %v1824_v6, %v6285_v9 }
  0x47   : > { %2802 = vst.msk [vmem:[#allocation4 + $0x40] sm:$0x3] %vm2093_vm5, %v5804_v7  ;;  %2805 = vst.msk [vmem:[#allocation4 + $0x58] sm:$0x3] %vm2093_vm5, %v5804_v7 }
  0x48   : > { %2808 = vst.msk [vmem:[#allocation4 + $0x70] sm:$0x3] %vm2093_vm5, %v5804_v7  ;;  %2811 = vst.msk [vmem:[#allocation4 + $0x88] sm:$0x3] %vm2093_vm5, %v5804_v7  ;;  %v1839_v15 = vmul.f32 %v1838_v8, %v1818_v10  ;;  %v1863_v22 = vmul.f32 %v1862_v16, %v1818_v10 }
  0x49   : > { %5472 = vmatmul.mubr.msk.f32.gmra.mxu1 %vm1091_vm3, %v1058_v26  ;;  %2814 = vst.msk [vmem:[#allocation4 + $0xa0] sm:$0x3] %vm2093_vm5, %v5804_v7  ;;  %2817 = vst.msk [vmem:[#allocation4 + $0xb8] sm:$0x3] %vm2093_vm5, %v5804_v7 }
  0x4a   : > { %5474 = vmatprep.mubr.msk.f32.mxu1 %vm1091_vm3, %v1059_v27  ;;  %2820 = vst.msk [vmem:[#allocation4 + $0xd0] sm:$0x3] %vm2093_vm5, %v5804_v7  ;;  %2823 = vst.msk [vmem:[#allocation4 + $0xe8] sm:$0x3] %vm2093_vm5, %v5804_v7  ;;  %v1847_v21 = vrot.slane %v1839_v15, 1 }
  0x4b   : > { %2826 = vst.msk [vmem:[#allocation4 + $0x100] sm:$0x3] %vm2093_vm5, %v5804_v7  ;;  %2829 = vst.msk [vmem:[#allocation4 + $0x118] sm:$0x3] %vm2093_vm5, %v5804_v7 }
  0x4c   : > { %2832 = vst.msk [vmem:[#allocation4 + $0x130] sm:$0x3] %vm2093_vm5, %v5804_v7  ;;  %2835 = vst.msk [vmem:[#allocation4 + $0x148] sm:$0x3] %vm2093_vm5, %v5804_v7 }
  0x4d   : > { %5475 = vmatmul.mubr.msk.f32.gmra.mxu1 %vm1091_vm3, %v1060_v28  ;;  %2838 = vst.msk [vmem:[#allocation4 + $0x160] sm:$0x3] %vm2093_vm5, %v5804_v7  ;;  %2841 = vst.msk [vmem:[#allocation4 + $0x178] sm:$0x3] %vm2093_vm5, %v5804_v7 }
  0x4e   : > { %5477 = vmatprep.mubr.msk.f32.mxu1 %vm1091_vm3, %v1061_v29  ;;  %2844 = vst.msk [vmem:[#allocation4 + $0x190] sm:$0x3] %vm2093_vm5, %v5804_v7  ;;  %2847 = vst.msk [vmem:[#allocation4 + $0x1a8] sm:$0x3] %vm2093_vm5, %v5804_v7  ;;  %v6282_v7 = vsub.s32 0, %v1828_v4 }
  0x50   : > { %v1830_v14 = vrot.slane %v1824_v6, %v6282_v7 }
  0x51   : > { %5478 = vmatmul.mubr.msk.f32.gmra.mxu1 %vm1091_vm3, %v1062_v30  ;;  %v1825_v30 = vld [vmem:[%s8564_s11 + $0x4] sm:$0x7] }
  0x52   : > { %5480 = vmatprep.mubr.msk.f32.mxu1 %vm1091_vm3, %v1063_v31  ;;  %v1831_v20 = vmul.f32 %v1830_v14, %v1818_v10 }
  0x54   : > { %v1855_v31 = vadd.f32 %v1847_v21, %v1831_v20 }
  0x55   : > { %5481 = vmatmul.mubr.msk.f32.gmra.mxu1 %vm1091_vm3, %v1064_v32  ;;  %v1871_v32 = vrot.slane %v1863_v22, 2 }
  0x56   : > { %5483 = vmatprep.mubr.msk.f32.mxu1 %vm1091_vm3, %v1065_v33 }
  0x59   : > { %5484 = vmatmul.mubr.msk.f32.gmra.mxu1 %vm1091_vm3, %v1066_v34 }
  0x5a   : > { %5486 = vmatprep.mubr.msk.f32.mxu1 %vm1091_vm3, %v1067_v35 }
  0x5d   : > { %5487 = vmatmul.mubr.msk.f32.gmra.mxu1 %vm1091_vm3, %v1068_v36 }
  0x5e   : > { %5489 = vmatprep.mubr.msk.f32.mxu1 %vm1091_vm3, %v1069_v51 }
  0x61   : > { %5490 = vmatmul.mubr.msk.f32.gmra.mxu1 %vm1091_vm3, %v1070_v52  ;;  %v1922_v52 = vrot.slane %v1825_v30, %v6285_v9 }
  0x62   : > { %5492 = vmatprep.mubr.msk.f32.mxu1 %vm1091_vm3, %v1071_v53 }
  0x65   : > { %5493 = vmatmul.mubr.msk.f32.gmra.mxu1 %vm1091_vm3, %v1072_v54 }
  0x66   : > { %5495 = vmatprep.mubr.msk.f32.mxu1 %vm1091_vm3, %v1073_v55 }
  0x69   : > { %5496 = vmatmul.mubr.msk.f32.gmra.mxu1 %vm1091_vm3, %v1074_v56 }
  0x6a   : > { %5498 = vmatprep.mubr.msk.f32.mxu1 %vm1091_vm3, %v1075_v57 }
  0x6d   : > { %5499 = vmatmul.mubr.msk.f32.gmra.mxu1 %vm1091_vm3, %v1076_v58 }
  0x6e   : > { %5501 = vmatprep.mubr.msk.f32.mxu1 %vm1091_vm3, %v1077_v59 }
  0x71   : > { %5502 = vmatmul.mubr.msk.f32.gmra.mxu1 %vm1091_vm3, %v1078_v60 }
  0x72   : > { %5504 = vmatprep.mubr.msk.f32.mxu1 %vm1091_vm3, %v1079_v61 }
  0x75   : > { %5505 = vmatmul.mubr.msk.f32.gmra.mxu1 %vm1091_vm3, %v1080_v62 }
  0x76   : > { %5507 = vmatprep.mubr.msk.f32.mxu1 %vm1091_vm3, %v1081_v63 }
  0x79   : > { %5508 = vmatmul.mubr.msk.f32.gmra.mxu1 %vm1091_vm3, %v1082_v0  ;;  %v1823_v0 = vld [vmem:[#allocation2 + $0x28] sm:$0x3f] }
  0x7a   : > { %5556 = vmatprep.mubr.msk.f32.mxu1 %vm1445_vm6, %v1433_v2 }
  0xee   : > { %v5427_v38 = vpop.f32.mrf.mxu0 }
  0xef   : > { %v756_v39 = vadd.f32 %v5427_v38, %v5129_v37 }
  0xf0   : > { %v750_v40 = vpop.f32.mrf.mxu0 }
  0xf1   : > { %v1809_v41 = vcombine.high %v756_v39, %v756_v39  ;;  %1816 = vst.msk [vmem:[#allocation2 + $0x19] sm:$0xf] %vm1813_vm4, %v756_v39  ;;  %v751_v42 = vadd.f32 %v5129_v37, %v750_v40  ;;  %5444 = vmatprep.subr.mxu0 %v756_v39  ;;  %v6302_v37 = vpop.f32.mrf.mxu1  ;;  %v1886_v40 = vrot.slane %v1825_v30, %v6282_v7 }
  0xf2   : > { %5445 = vmatpush3.msra.mxu0 %v756_v39 }
  0xf3   : > { %1817 = vst.msk [vmem:[#allocation2 + $0x21] sm:$0xf] %vm1813_vm4, %v1809_v41  ;;  %v1808_v44 = vcombine.high %v751_v42, %v751_v42  ;;  %1814 = vst.msk [vmem:[#allocation2 + $0x9] sm:$0xf] %vm1813_vm4, %v751_v42  ;;  %5446 = vmatprep.subr.mxu0 %v751_v42  ;;  %v1898_v41 = vrot.slane %v1825_v30, %v6277_v5  ;;  %v6311_v51 = vpop.f32.mrf.mxu1 }
  0xf4   : > { %5447 = vmatpush3.msra.mxu0 %v751_v42 }
  0xf5   : > { %1815 = vst.msk [vmem:[#allocation2 + $0x11] sm:$0xf] %vm1813_vm4, %v1808_v44  ;;  %5449 = vmatmul.mubr.msk.f32.vlgmr.msra.gmra.mxu0 %vm776_vm2, %v907_v43  ;;  %v1879_v43 = vadd.f32 %v1871_v32, %v1855_v31  ;;  %v6321_v2 = vpop.f32.mrf.mxu1 }
  0xf6   : > { %5451 = vmatprep.mubr.msk.f32.mxu0 %vm776_vm2, %v908_v45  ;;  %v1826_v45 = vld [vmem:[%s8564_s11 + $0x8] sm:$0x7] }
  0xf7   : > { %v1946_v58 = vrot.slane %v1826_v45, %v6282_v7  ;;  %v1958_v4 = vrot.slane %v1826_v45, %v6277_v5  ;;  %v1982_v6 = vrot.slane %v1826_v45, %v6285_v9 }
  0xf8   : > { %v6289_v13 = vld [vmem:[#allocation2 + $0x18] sm:$0x3f] }
  0xf9   : > { %5452 = vmatmul.mubr.msk.f32.gmra.mxu0 %vm776_vm2, %v909_v46  ;;  %v1842_v19 = vmul.f32 %v1838_v8, %v6289_v13  ;;  %v1834_v33 = vmul.f32 %v1830_v14, %v6289_v13  ;;  %v1866_v34 = vmul.f32 %v1862_v16, %v6289_v13  ;;  %v1889_v56 = vmul.f32 %v1886_v40, %v6289_v13 }
  0xfa   : > { %5454 = vmatprep.mubr.msk.f32.mxu0 %vm776_vm2, %v910_v47  ;;  %v1819_v11 = vld [vmem:[#allocation2 + $0x8] sm:$0x3f]  ;;  %v1901_v57 = vmul.f32 %v1898_v41, %v6289_v13  ;;  %v6330_v20 = vmul.f32 %v1982_v6, %v1823_v0  ;;  %v1960_v31 = vmul.f32 %v1958_v4, %v6289_v13  ;;  %v1948_v45 = vmul.f32 %v1946_v58, %v6289_v13 }
  0xfb   : > { %v1840_v17 = vmul.f32 %v1838_v8, %v1819_v11  ;;  %v1850_v25 = vrot.slane %v1842_v19, 1  ;;  %v1832_v26 = vmul.f32 %v1830_v14, %v1819_v11  ;;  %v1864_v27 = vmul.f32 %v1862_v16, %v1819_v11 }
  0xfc   : > { %v6287_v12 = vld [vmem:[#allocation2 + $0x10] sm:$0x3f]  ;;  %v1874_v44 = vrot.slane %v1866_v34, 2  ;;  %v1887_v47 = vmul.f32 %v1886_v40, %v1819_v11  ;;  %v1923_v3 = vmul.f32 %v1922_v52, %v1819_v11  ;;  %v1909_v15 = vrot.slane %v1901_v57, 1 }
  0xfd   : > { %5455 = vmatmul.mubr.msk.f32.gmra.mxu0 %vm776_vm2, %v911_v48  ;;  %v1841_v18 = vmul.f32 %v1838_v8, %v6287_v12  ;;  %v1848_v23 = vrot.slane %v1840_v17, 1  ;;  %v1833_v28 = vmul.f32 %v1830_v14, %v6287_v12  ;;  %v1865_v29 = vmul.f32 %v1862_v16, %v6287_v12 }
  0xfe   : > { %5457 = vmatprep.mubr.msk.f32.mxu0 %vm776_vm2, %v912_v49  ;;  %v1858_v38 = vadd.f32 %v1850_v25, %v1834_v33  ;;  %v1872_v39 = vrot.slane %v1864_v27, 2  ;;  %v1899_v48 = vmul.f32 %v1898_v41, %v1819_v11  ;;  %v6309_v49 = vld [vmem:[#allocation2 + $0x20] sm:$0x3f]  ;;  %v1888_v54 = vmul.f32 %v1886_v40, %v6287_v12 }
  0xff   : > { %v1849_v24 = vrot.slane %v1841_v18, 1  ;;  %v1856_v35 = vadd.f32 %v1848_v23, %v1832_v26  ;;  %v1873_v42 = vrot.slane %v1865_v29, 2  ;;  %v1900_v55 = vmul.f32 %v1898_v41, %v6287_v12  ;;  %v2142_v11 = vld [vmem:[%s8566_s13] sm:$0x7] }
 0x100   : > { %v1882_v53 = vadd.f32 %v1874_v44, %v1858_v38  ;;  %v1890_v59 = vmul.f32 %v1886_v40, %v6309_v49  ;;  %v1902_v60 = vmul.f32 %v1898_v41, %v6309_v49  ;;  %v1891_v61 = vadd.f32 %v1887_v47, %v1879_v43  ;;  %v6346_v38 = vld [vmem:[%s8608_s6] ss:$0 sm:$0xff] }
 0x101   : > { %5458 = vmatmul.mubr.msk.f32.gmra.mxu0 %vm776_vm2, %v913_v50  ;;  %v1857_v36 = vadd.f32 %v1849_v24, %v1833_v28  ;;  %v1880_v46 = vadd.f32 %v1872_v39, %v1856_v35  ;;  %v1907_v63 = vrot.slane %v1899_v48, 1  ;;  %v1908_v10 = vrot.slane %v1900_v55, 1  ;;  %v6335_v24 = vpop.f32.mrf.mxu1  ;;  %v2122_v35 = vld [vmem:[#allocation3] sm:$0xff] }
 0x102   : > { %5526 = vmatprep.mubr.msk.f32.mxu0 %vm1445_vm6, %v1413_v1  ;;  %v1894_v8 = vadd.f32 %v1890_v59, %v1882_v53  ;;  %v1924_v14 = vmul.f32 %v1922_v52, %v6287_v12  ;;  %v1925_v16 = vmul.f32 %v1922_v52, %v6289_v13  ;;  %v1910_v17 = vrot.slane %v1902_v60, 1 }
 0x103   : > { %v1881_v50 = vadd.f32 %v1873_v42, %v1857_v36  ;;  %v1892_v62 = vadd.f32 %v1888_v54, %v1880_v46  ;;  %v1926_v18 = vmul.f32 %v1922_v52, %v6309_v49  ;;  %v6328_v19 = vmul.f32 %v1958_v4, %v1823_v0  ;;  %v2123_v36 = vld [vmem:[#allocation3 + $0x8] sm:$0x3]  ;;  %v5440_v43 = vpop.f32.mrf.mxu1 }
 0x104   : > { %v1915_v21 = vadd.f32 %v1907_v63, %v1891_v61  ;;  %v1918_v25 = vadd.f32 %v1910_v17, %v1894_v8  ;;  %v1950_v26 = vmul.f32 %v1946_v58, %v1823_v0  ;;  %v1931_v27 = vrot.slane %v1923_v3, 2 }
 0x105   : > { %v1893_v1 = vadd.f32 %v1889_v56, %v1881_v50  ;;  %v1916_v22 = vadd.f32 %v1908_v10, %v1892_v62  ;;  %v1932_v28 = vrot.slane %v1924_v14, 2  ;;  %v1933_v29 = vrot.slane %v1925_v16, 2 }
 0x106   : > { %v6338_v30 = vrot.slane %v2142_v11, %v6277_v5  ;;  %v1934_v32 = vrot.slane %v1926_v18, 2  ;;  %v1970_v33 = vrot.slane %v6328_v19, 1  ;;  %v1994_v34 = vrot.slane %v6330_v20, 2 }
 0x107   : > { %v1917_v23 = vadd.f32 %v1909_v15, %v1893_v1  ;;  %v1939_v39 = vadd.f32 %v1931_v27, %v1915_v21  ;;  %v1940_v40 = vadd.f32 %v1932_v28, %v1916_v22  ;;  %v1959_v41 = vmul.f32 %v1958_v4, %v6287_v12 }
 0x108   : > { %v1947_v44 = vmul.f32 %v1946_v58, %v6287_v12  ;;  %v1942_v46 = vadd.f32 %v1934_v32, %v1918_v25  ;;  %v1961_v47 = vmul.f32 %v1958_v4, %v6309_v49  ;;  %v1949_v48 = vmul.f32 %v1946_v58, %v6309_v49  ;;  %v887_v58 = vpop.f32.mrf.mxu1  ;;  %v2144_v32 = vld [vmem:[%s8566_s13 + $0x8] sm:$0x7] }
 0x109   : > { %v1941_v42 = vadd.f32 %v1933_v29, %v1917_v23  ;;  %v2161_v50 = vmul.f32 %v6338_v30, %v2122_v35  ;;  %v2162_v52 = vmul.f32 %v6338_v30, %v2123_v36  ;;  %v6356_v53 = vrot.slane %v2142_v11, %v6285_v9 }
 0x10a   : > { %v873_v54 = vadd.f32 %v6302_v37, %v6346_v38  ;;  %v1968_v55 = vrot.slane %v1960_v31, 1  ;;  %v1983_v56 = vmul.f32 %v1982_v6, %v6287_v12  ;;  %v1984_v57 = vmul.f32 %v1982_v6, %v6289_v13 }
 0x10b   : > { %v1951_v59 = vadd.f32 %v1947_v44, %v1939_v39  ;;  %v1952_v60 = vadd.f32 %v1948_v45, %v1940_v40  ;;  %v1967_v61 = vrot.slane %v1959_v41, 1  ;;  %v1953_v62 = vadd.f32 %v1949_v48, %v1941_v42  ;;  %v2143_v42 = vld [vmem:[%s8566_s13 + $0x4] sm:$0x7] }
 0x10c   : > { %v1954_v63 = vadd.f32 %v1950_v26, %v1942_v46  ;;  %v1969_v0 = vrot.slane %v1961_v47, 1  ;;  %v1985_v1 = vmul.f32 %v1982_v6, %v6309_v49  ;;  %v6364_v3 = vrot.slane %v2142_v11, %v6282_v7  ;;  %v5443_v11 = vpop.f32.mrf.mxu1 }
 0x10d   : > { %v2194_v8 = vrot.slane %v2161_v50, 1  ;;  %v2195_v37 = vrot.slane %v2162_v52, 1  ;;  %v2238_v10 = vmul.f32 %v6356_v53, %v2122_v35  ;;  %v2239_v12 = vmul.f32 %v6356_v53, %v2123_v36 }
 0x10e   : > { %v868_v13 = vadd.f32 %v6346_v38, %v6311_v51  ;;  %v883_v14 = vadd.f32 %v6321_v2, %v6346_v38  ;;  %v1976_v6 = vadd.f32 %v1968_v55, %v1952_v60  ;;  %v1991_v16 = vrot.slane %v1983_v56, 2  ;;  %v897_v39 = vpop.f32.mrf.mxu1 }
 0x10f   : > { %v1992_v17 = vrot.slane %v1984_v57, 2  ;;  %v1977_v18 = vadd.f32 %v1969_v0, %v1953_v62  ;;  %v1975_v21 = vadd.f32 %v1967_v61, %v1951_v59  ;;  %v1978_v22 = vadd.f32 %v1970_v33, %v1954_v63 }
 0x110   : > { %v2149_v51 = vmul.f32 %v6364_v3, %v2122_v35  ;;  %v1993_v2 = vrot.slane %v1985_v1, 2  ;;  %v2196_v25 = vsel %vm2193_vm7, %v2194_v8, %v2195_v37  ;;  %v2271_v26 = vrot.slane %v2238_v10, 2 }
 0x111   : > { %v2272_v27 = vrot.slane %v2239_v12, 2  ;;  %v878_v28 = vadd.f32 %v6346_v38, %v6335_v24  ;;  %v893_v29 = vadd.f32 %v5440_v43, %v6346_v38  ;;  %v6390_v35 = vadd.f32 %v1992_v17, %v1976_v6 }
 0x112   : > { %v6392_v36 = vadd.f32 %v1993_v2, %v1977_v18  ;;  %v6398_v40 = vadd.f32 %v1991_v16, %v1975_v21  ;;  %v6402_v41 = vadd.f32 %v1994_v34, %v1978_v22  ;;  %v2226_v43 = vadd.f32 %v2196_v25, %v2149_v51 }
 0x113   : > { %v2273_v45 = vsel %vm2270_vm8, %v2271_v26, %v2272_v27  ;;  %v6409_v46 = vrot.slane %v2144_v32, %v6282_v7  ;;  %v6412_v47 = vrot.slane %v2144_v32, %v6277_v5  ;;  %v6415_v48 = vrot.slane %v2144_v32, %v6285_v9 }
 0x114   : > { %v888_v20 = vadd.f32 %v6346_v38, %v887_v58  ;;  %v903_v34 = vadd.f32 %v5443_v11, %v6346_v38  ;;  %v898_v52 = vadd.f32 %v6346_v38, %v897_v39  ;;  %v2009_v55 = vcombine.low %v6398_v40, %v6390_v35  ;;  %v2655_v40 = vld [vmem:[%s8567_s14] sm:$0xff] }
 0x115   : > { %v2010_v56 = vcombine.low %v6392_v36, %v6402_v41  ;;  %v6431_v60 = vrot.slane %v2143_v42, %v6282_v7  ;;  %v2303_v62 = vadd.f32 %v2273_v45, %v2226_v43  ;;  %v6437_v38 = vrot.slane %v2143_v42, %v6277_v5 }
 0x116   : > { %v6440_v58 = vrot.slane %v2143_v42, %v6285_v9 }
 0x1b5   : > { %v5450_v4 = vpop.f32.mrf.mxu0 }
 0x1b6   : > { %v6372_v15 = vadd.f32 %v5450_v4, %v873_v54 }
 0x1b7   : > { %v1004_v49 = vpop.f32.mrf.mxu0 }
 0x1b8   : > { %2115 = vst.msk [vmem:[#allocation3 + $0x21] sm:$0xff] %vm776_vm2, %v6372_v15  ;;  %v6376_v19 = vadd.f32 %v1004_v49, %v868_v13 }
 0x1b9   : > { %v5453_v23 = vpop.f32.mrf.mxu0 }
 0x1ba   : > { %2114 = vst.msk [vmem:[#allocation3 + $0x11] sm:$0xff] %vm776_vm2, %v6376_v19  ;;  %v6385_v31 = vadd.f32 %v5453_v23, %v883_v14 }
 0x1bb   : > { %v1014_v33 = vpop.f32.mrf.mxu0 }
 0x1bc   : > { %2117 = vst.msk [vmem:[#allocation3 + $0x41] sm:$0xff] %vm776_vm2, %v6385_v31  ;;  %v6396_v24 = vadd.f32 %v1014_v33, %v878_v28 }
 0x1bd   : > { %v5456_v44 = vpop.f32.mrf.mxu0 }
 0x1be   : > { %2116 = vst.msk [vmem:[#allocation3 + $0x31] sm:$0xff] %vm776_vm2, %v6396_v24  ;;  %v1048_v50 = vadd.f32 %v5456_v44, %v893_v29 }
 0x1bf   : > { %v1024_v54 = vpop.f32.mrf.mxu0  ;;  %v6426_v57 = vld [vmem:[#allocation3 + $0x20] sm:$0xff]  ;;  %v6428_v59 = vld [vmem:[#allocation3 + $0x28] sm:$0x3] }
 0x1c0   : > { %2119 = vst.msk [vmem:[#allocation3 + $0x61] sm:$0xff] %vm776_vm2, %v1048_v50  ;;  %v6434_v61 = vadd.f32 %v1024_v54, %v888_v20  ;;  %v6444_v4 = vmul.f32 %v6409_v46, %v6426_v57  ;;  %v2507_v8 = vmul.f32 %v6412_v47, %v6426_v57  ;;  %v2508_v37 = vmul.f32 %v6412_v47, %v6428_v59 }
 0x1c1   : > { %v5459_v63 = vpop.f32.mrf.mxu0  ;;  %v2124_v0 = vld [vmem:[#allocation3 + $0x10] sm:$0xff]  ;;  %v2125_v1 = vld [vmem:[#allocation3 + $0x18] sm:$0x3]  ;;  %v2583_v10 = vmul.f32 %v6415_v48, %v6426_v57  ;;  %v2584_v49 = vmul.f32 %v6415_v48, %v6428_v59  ;;  %v6469_v29 = vmul.f32 %v6431_v60, %v6426_v57  ;;  %v2337_v32 = vmul.f32 %v6437_v38, %v6426_v57 }
 0x1c2   : > { %2118 = vst.msk [vmem:[#allocation3 + $0x51] sm:$0xff] %vm776_vm2, %v6434_v61  ;;  %v1050_v12 = vadd.f32 %v5459_v63, %v903_v34  ;;  %v6455_v13 = vmul.f32 %v6338_v30, %v2125_v1  ;;  %v2315_v14 = vmul.f32 %v6431_v60, %v2124_v0  ;;  %v2335_v16 = vmul.f32 %v6437_v38, %v2124_v0 }
 0x1c3   : > { %v1034_v6 = vpop.f32.mrf.mxu0  ;;  %v2336_v17 = vmul.f32 %v6437_v38, %v2125_v1  ;;  %v2411_v18 = vmul.f32 %v6440_v58, %v2124_v0  ;;  %v2412_v11 = vmul.f32 %v6440_v58, %v2125_v1  ;;  %v2241_v22 = vmul.f32 %v6356_v53, %v2125_v1 }
 0x1c4   : > { %2121 = vst.msk [vmem:[#allocation3 + $0x81] sm:$0xff] %vm776_vm2, %v1050_v12  ;;  %v1049_v21 = vadd.f32 %v1034_v6, %v898_v52  ;;  %5510 = vmatprep.subr.mxu0 %v1050_v12  ;;  %5649 = vmatprep.subr.mxu1 %v1050_v12  ;;  %v2323_v51 = vadd.f32 %v2315_v14, %v2303_v62  ;;  %v2367_v23 = vrot.slane %v2335_v16, 1  ;;  %v2539_v27 = vrot.slane %v2507_v8, 1 }
 0x1c5   : > { %5511 = vmatpush3.msra.mxu0 %v1050_v12  ;;  %5657 = vmatpush3.msra.mxu1 %v1050_v12  ;;  %v2368_v2 = vrot.slane %v2336_v17, 1  ;;  %v2443_v25 = vrot.slane %v2411_v18, 2  ;;  %v2444_v26 = vrot.slane %v2412_v11, 2  ;;  %v2540_v28 = vrot.slane %v2508_v37, 1  ;;  %v6478_v54 = vld [vmem:[#allocation3 + $0x30] sm:$0xff] }
 0x1c6   : > { %2120 = vst.msk [vmem:[#allocation3 + $0x71] sm:$0xff] %vm776_vm2, %v1049_v21  ;;  %5512 = vmatprep.subr.mxu0 %v1049_v21  ;;  %5650 = vmatprep.subr.mxu1 %v1049_v21  ;;  %v2615_v42 = vrot.slane %v2583_v10, 2  ;;  %v2616_v43 = vrot.slane %v2584_v49, 2  ;;  %v2198_v44 = vrot.slane %v6455_v13, 1  ;;  %v2150_v34 = vmul.f32 %v6364_v3, %v2124_v0  ;;  %v6496_v6 = vld [vmem:[#allocation3 + $0x38] sm:$0x3] }
 0x1c7   : > { %5513 = vmatpush3.msra.mxu0 %v1049_v21  ;;  %5658 = vmatpush3.msra.mxu1 %v1049_v21  ;;  %v2369_v33 = vsel %vm2193_vm7, %v2367_v23, %v2368_v2  ;;  %v2445_v39 = vsel %vm2270_vm8, %v2443_v25, %v2444_v26  ;;  %v2541_v20 = vsel %vm2193_vm7, %v2539_v27, %v2540_v28  ;;  %v2275_v52 = vrot.slane %v2241_v22, 2 }
 0x1c8   : > { %5514 = vmatprep.subr.mxu0 %v1048_v50  ;;  %5651 = vmatprep.subr.mxu1 %v1048_v50  ;;  %v2399_v45 = vadd.f32 %v2369_v33, %v2323_v51  ;;  %v2163_v62 = vmul.f32 %v6338_v30, %v2124_v0  ;;  %v2240_v63 = vmul.f32 %v6356_v53, %v2124_v0  ;;  %v2370_v37 = vrot.slane %v2337_v32, 1  ;;  %v1434_v32 = vld [vmem:[%s8563_s10 + $0xa8] sm:$0xff] }
 0x1c9   : > { %5515 = vmatpush3.msra.mxu0 %v1048_v50  ;;  %5659 = vmatpush3.msra.mxu1 %v1048_v50  ;;  %v2338_v1 = vmul.f32 %v6437_v38, %v6428_v59  ;;  %v2413_v10 = vmul.f32 %v6440_v58, %v6426_v57  ;;  %v2414_v50 = vmul.f32 %v6440_v58, %v6428_v59 }
 0x1ca   : > { %5516 = vmatprep.subr.mxu0 %v6434_v61  ;;  %5652 = vmatprep.subr.mxu1 %v6434_v61  ;;  %v2475_v8 = vadd.f32 %v2445_v39, %v2399_v45  ;;  %v2617_v0 = vsel %vm2270_vm8, %v2615_v42, %v2616_v43  ;;  %v2197_v12 = vrot.slane %v2163_v62, 1  ;;  %v2274_v13 = vrot.slane %v2240_v63, 2 }
 0x1cb   : > { %5517 = vmatpush3.msra.mxu0 %v6434_v61  ;;  %5660 = vmatpush3.msra.mxu1 %v6434_v61  ;;  %v2371_v14 = vrot.slane %v2338_v1, 1  ;;  %v2446_v16 = vrot.slane %v2413_v10, 2  ;;  %v2447_v17 = vrot.slane %v2414_v50, 2  ;;  %v2509_v18 = vmul.f32 %v6412_v47, %v6478_v54  ;;  %v4575_v50 = vld [vmem:[%s8569_s16 + $0x8] sm:$0xff] }
 0x1cc   : > { %5518 = vmatprep.subr.mxu0 %v6385_v31  ;;  %5653 = vmatprep.subr.mxu1 %v6385_v31  ;;  %v2495_v49 = vadd.f32 %v6444_v4, %v2475_v8  ;;  %v2199_v61 = vsel %vm2193_vm7, %v2197_v12, %v2198_v44  ;;  %v2276_v11 = vsel %vm2270_vm8, %v2274_v13, %v2275_v52  ;;  %v1435_v44 = vld [vmem:[%s8563_s10 + $0xb0] sm:$0xff]  ;;  %v2004_v52 = vld [vmem:[%s8565_s12 + $0x8] sm:$0xff] }
 0x1cd   : > { %5519 = vmatpush3.msra.mxu0 %v6385_v31  ;;  %5661 = vmatpush3.msra.mxu1 %v6385_v31  ;;  %v6506_v21 = vmul.f32 %v6409_v46, %v6478_v54  ;;  %v2227_v22 = vadd.f32 %v2199_v61, %v2150_v34  ;;  %v2372_v51 = vsel %vm2193_vm7, %v2370_v37, %v2371_v14  ;;  %v2542_v23 = vrot.slane %v2509_v18, 1  ;;  %v6587_v61 = vld [vmem:[#allocation3 + $0x48] sm:$0x3] }
 0x1ce   : > { %5520 = vmatprep.subr.mxu0 %v6396_v24  ;;  %5654 = vmatprep.subr.mxu1 %v6396_v24  ;;  %v2571_v4 = vadd.f32 %v2541_v20, %v2495_v49  ;;  %v2510_v31 = vmul.f32 %v6412_v47, %v6496_v6  ;;  %v2585_v2 = vmul.f32 %v6415_v48, %v6478_v54 }
 0x1cf   : > { %5521 = vmatpush3.msra.mxu0 %v6396_v24  ;;  %5662 = vmatpush3.msra.mxu1 %v6396_v24  ;;  %v2586_v25 = vmul.f32 %v6415_v48, %v6496_v6  ;;  %v2304_v27 = vadd.f32 %v2276_v11, %v2227_v22  ;;  %v2448_v28 = vsel %vm2270_vm8, %v2446_v16, %v2447_v17  ;;  %v1414_v24 = vld [vmem:[%s8563_s10 + $0x8] sm:$0xff]  ;;  %v1417_v16 = vld [vmem:[%s8563_s10 + $0x20] sm:$0xff] }
 0x1d0   : > { %5522 = vmatprep.subr.mxu0 %v6372_v15  ;;  %5655 = vmatprep.subr.mxu1 %v6372_v15  ;;  %v6521_v26 = vadd.f32 %v2617_v0, %v2571_v4  ;;  %v2543_v33 = vrot.slane %v2510_v31, 1  ;;  %v2618_v39 = vrot.slane %v2585_v2, 2  ;;  %v2165_v43 = vmul.f32 %v6338_v30, %v6426_v57  ;;  %v6573_v0 = vld [vmem:[#allocation3 + $0x40] sm:$0xff]  ;;  %v1437_v17 = vld [vmem:[%s8563_s10 + $0xc0] sm:$0xff] }
 0x1d1   : > { %5523 = vmatpush3.msra.mxu0 %v6372_v15  ;;  %5663 = vmatpush3.msra.mxu1 %v6372_v15  ;;  %v2619_v42 = vrot.slane %v2586_v25, 2  ;;  %v1415_v15 = vld [vmem:[%s8563_s10 + $0x10] sm:$0xff]  ;;  %v2324_v45 = vadd.f32 %v6469_v29, %v2304_v27  ;;  %v2166_v20 = vmul.f32 %v6338_v30, %v6428_v59  ;;  %v2242_v34 = vmul.f32 %v6356_v53, %v6426_v57 }
 0x1d2   : > { %5524 = vmatprep.subr.mxu0 %v6376_v19  ;;  %5656 = vmatprep.subr.mxu1 %v6376_v19  ;;  %v2544_v62 = vsel %vm2193_vm7, %v2542_v23, %v2543_v33  ;;  %v2151_v63 = vmul.f32 %v6364_v3, %v6426_v57  ;;  %v2200_v29 = vrot.slane %v2165_v43, 1  ;;  %v2243_v1 = vmul.f32 %v6356_v53, %v6428_v59  ;;  %v1416_v57 = vld [vmem:[%s8563_s10 + $0x18] sm:$0xff]  ;;  %v1418_v33 = vld [vmem:[%s8563_s10 + $0x28] sm:$0xff] }
 0x1d3   : > { %5525 = vmatpush3.msra.mxu0 %v6376_v19  ;;  %5664 = vmatpush3.msra.mxu1 %v6376_v19  ;;  %v2400_v8 = vadd.f32 %v2372_v51, %v2324_v45  ;;  %v6560_v19 = vsel %vm2270_vm8, %v2618_v39, %v2619_v42  ;;  %v2201_v37 = vrot.slane %v2166_v20, 1  ;;  %v2277_v10 = vrot.slane %v2242_v34, 2  ;;  %v1436_v59 = vld [vmem:[%s8563_s10 + $0xb8] sm:$0xff]  ;;  %v2003_v51 = vld [vmem:[%s8565_s12] sm:$0xff]  ;;  %v1438_v39 = vld [vmem:[%s8563_s10 + $0xc8] sm:$0xff] }
 0x1d4   : > { %5527 = vmatmul.mubr.msk.f32.vlgmr.msra.gmra.mxu0 %vm1445_vm6, %v1414_v24  ;;  %5557 = vmatmul.mubr.msk.f32.vlgmr.msra.gmra.mxu1 %vm1445_vm6, %v1434_v32  ;;  %v2278_v12 = vrot.slane %v2243_v1, 2  ;;  %v2339_v13 = vmul.f32 %v6437_v38, %v6478_v54  ;;  %v2340_v14 = vmul.f32 %v6437_v38, %v6496_v6  ;;  %v2415_v49 = vmul.f32 %v6440_v58, %v6478_v54 }
 0x1d5   : > { %5529 = vmatprep.mubr.msk.f32.mxu0 %vm1445_vm6, %v1415_v15  ;;  %5559 = vmatprep.mubr.msk.f32.mxu1 %vm1445_vm6, %v1435_v44  ;;  %v2476_v18 = vadd.f32 %v2448_v28, %v2400_v8  ;;  %v2202_v11 = vsel %vm2193_vm7, %v2200_v29, %v2201_v37  ;;  %v2317_v4 = vmul.f32 %v6431_v60, %v6478_v54  ;;  %v1419_v15 = vld [vmem:[%s8563_s10 + $0x30] sm:$0xff] }
 0x1d6   : > { %5574 = vmatprep.subr.mxu1 %v2004_v52  ;;  %v2416_v22 = vmul.f32 %v6440_v58, %v6496_v6  ;;  %v2228_v31 = vadd.f32 %v2202_v11, %v2151_v63  ;;  %v2279_v23 = vsel %vm2270_vm8, %v2277_v10, %v2278_v12  ;;  %v2373_v2 = vrot.slane %v2339_v13, 1  ;;  %5597 = vmatprep.subr.mxu0 %v4575_v50  ;;  %v1439_v44 = vld [vmem:[%s8563_s10 + $0xd0] sm:$0xff]  ;;  %v6627_v63 = vld [vmem:[%s8567_s14 + $0x8] sm:$0xff] }
 0x1d7   : > { %5575 = vmatpush3.msra.mxu1 %v2004_v52  ;;  %v2374_v25 = vrot.slane %v2340_v14, 1  ;;  %v2496_v27 = vadd.f32 %v6506_v21, %v2476_v18  ;;  %v2449_v28 = vrot.slane %v2415_v49, 2  ;;  %v2511_v32 = vmul.f32 %v6412_v47, %v6573_v0  ;;  %5598 = vmatpush3.msra.mxu0 %v4575_v50 }
 0x1d8   : > { %5530 = vmatmul.mubr.msk.f32.gmra.mxu0 %vm1445_vm6, %v1416_v57  ;;  %5560 = vmatmul.mubr.msk.f32.gmra.mxu1 %vm1445_vm6, %v1436_v59  ;;  %v2450_v24 = vrot.slane %v2416_v22, 2  ;;  %v2305_v42 = vadd.f32 %v2279_v23, %v2228_v31  ;;  %v2489_v21 = vmul.f32 %v6409_v46, %v6573_v0  ;;  %v2512_v43 = vmul.f32 %v6412_v47, %v6587_v61  ;;  %v1420_v57 = vld [vmem:[%s8563_s10 + $0x38] sm:$0xff]  ;;  %v6667_v23 = vld [vmem:[#allocation3 + $0x50] sm:$0xff] }
 0x1d9   : > { %5532 = vmatprep.mubr.msk.f32.mxu0 %vm1445_vm6, %v1417_v16  ;;  %5562 = vmatprep.mubr.msk.f32.mxu1 %vm1445_vm6, %v1437_v17  ;;  %v2572_v45 = vadd.f32 %v2544_v62, %v2496_v27  ;;  %v2375_v20 = vsel %vm2193_vm7, %v2373_v2, %v2374_v25  ;;  %v2545_v34 = vrot.slane %v2511_v32, 1  ;;  %v2587_v52 = vmul.f32 %v6415_v48, %v6573_v0  ;;  %v1440_v59 = vld [vmem:[%s8563_s10 + $0xd8] sm:$0xff]  ;;  %v1421_v16 = vld [vmem:[%s8563_s10 + $0x40] sm:$0xff] }
 0x1da   : > { %5576 = vmatprep.subr.mxu1 %v2003_v51  ;;  %v2325_v29 = vadd.f32 %v2317_v4, %v2305_v42  ;;  %v2451_v1 = vsel %vm2270_vm8, %v2449_v28, %v2450_v24  ;;  %v2546_v8 = vrot.slane %v2512_v43, 1  ;;  %v2588_v62 = vmul.f32 %v6415_v48, %v6587_v61  ;;  %v1441_v17 = vld [vmem:[%s8563_s10 + $0xe0] sm:$0xff]  ;;  %v1422_v28 = vld [vmem:[%s8563_s10 + $0x48] sm:$0xff] }
 0x1db   : > { %5577 = vmatpush3.msra.mxu1 %v2003_v51  ;;  %v2152_v37 = vmul.f32 %v6364_v3, %v6478_v54  ;;  %v2167_v10 = vmul.f32 %v6338_v30, %v6478_v54  ;;  %v2168_v50 = vmul.f32 %v6338_v30, %v6496_v6  ;;  %v6649_v12 = vadd.f32 %v6560_v19, %v2572_v45  ;;  %v1442_v24 = vld [vmem:[%s8563_s10 + $0xe8] sm:$0xff] }
 0x1dc   : > { %5533 = vmatmul.mubr.msk.f32.gmra.mxu0 %vm1445_vm6, %v1418_v33  ;;  %5563 = vmatmul.mubr.msk.f32.gmra.mxu1 %vm1445_vm6, %v1438_v39  ;;  %v2401_v13 = vadd.f32 %v2375_v20, %v2325_v29  ;;  %v2621_v14 = vrot.slane %v2587_v52, 2  ;;  %v2244_v49 = vmul.f32 %v6356_v53, %v6478_v54  ;;  %v2547_v18 = vsel %vm2193_vm7, %v2545_v34, %v2546_v8  ;;  %v6682_v33 = vld [vmem:[#allocation3 + $0x58] sm:$0x3] }
 0x1dd   : > { %5535 = vmatprep.mubr.msk.f32.mxu0 %vm1445_vm6, %v1419_v15  ;;  %5565 = vmatprep.mubr.msk.f32.mxu1 %vm1445_vm6, %v1439_v44  ;;  %v2203_v11 = vrot.slane %v2167_v10, 1  ;;  %v2204_v19 = vrot.slane %v2168_v50, 1  ;;  %v2245_v4 = vmul.f32 %v6356_v53, %v6496_v6  ;;  %v2622_v51 = vrot.slane %v2588_v62, 2  ;;  %v1423_v15 = vld [vmem:[%s8563_s10 + $0x50] sm:$0xff]  ;;  %v1424_v50 = vld [vmem:[%s8563_s10 + $0x58] sm:$0xff] }
 0x1de   : > { %5581 = vmatprep.subr.mxu1 %v6627_v63  ;;  %v2477_v22 = vadd.f32 %v2451_v1, %v2401_v13  ;;  %v2280_v54 = vrot.slane %v2244_v49, 2  ;;  %v2341_v31 = vmul.f32 %v6437_v38, %v6573_v0  ;;  %v2342_v27 = vmul.f32 %v6437_v38, %v6587_v61  ;;  %v1443_v44 = vld [vmem:[%s8563_s10 + $0xf0] sm:$0xff] }
 0x1df   : > { %v2205_v2 = vsel %vm2193_vm7, %v2203_v11, %v2204_v19  ;;  %v2281_v25 = vrot.slane %v2245_v4, 2  ;;  %v2417_v6 = vmul.f32 %v6440_v58, %v6573_v0  ;;  %v2418_v43 = vmul.f32 %v6440_v58, %v6587_v61 }
 0x1e0   : > { %5536 = vmatmul.mubr.msk.f32.gmra.mxu0 %vm1445_vm6, %v1420_v57  ;;  %5566 = vmatmul.mubr.msk.f32.gmra.mxu1 %vm1445_vm6, %v1440_v59  ;;  %v2497_v32 = vadd.f32 %v2489_v21, %v2477_v22  ;;  %v2229_v39 = vadd.f32 %v2205_v2, %v2152_v37  ;;  %v2376_v42 = vrot.slane %v2341_v31, 1  ;;  %v2318_v21 = vmul.f32 %v6431_v60, %v6573_v0  ;;  %v1444_v57 = vld [vmem:[%s8563_s10 + $0xf8] sm:$0xff] }
 0x1e1   : > { %5538 = vmatprep.mubr.msk.f32.mxu0 %vm1445_vm6, %v1421_v16  ;;  %5568 = vmatprep.mubr.msk.f32.mxu1 %vm1445_vm6, %v1441_v17  ;;  %v2282_v45 = vsel %vm2270_vm8, %v2280_v54, %v2281_v25  ;;  %v2377_v20 = vrot.slane %v2342_v27, 1  ;;  %v2452_v34 = vrot.slane %v2417_v6, 2  ;;  %v2453_v1 = vrot.slane %v2418_v43, 2  ;;  %v1425_v16 = vld [vmem:[%s8563_s10 + $0x60] sm:$0xff]  ;;  %v1426_v6 = vld [vmem:[%s8563_s10 + $0x68] sm:$0xff] }
 0x1e2   : > { %v2573_v52 = vadd.f32 %v2547_v18, %v2497_v32  ;;  %v2306_v29 = vadd.f32 %v2282_v45, %v2229_v39  ;;  %v2513_v8 = vmul.f32 %v6412_v47, %v6667_v23  ;;  %v2623_v62 = vsel %vm2270_vm8, %v2621_v14, %v2622_v51 }
 0x1e3   : > { %v2514_v37 = vmul.f32 %v6412_v47, %v6682_v33  ;;  %v2589_v10 = vmul.f32 %v6415_v48, %v6667_v23  ;;  %v2378_v13 = vsel %vm2193_vm7, %v2376_v42, %v2377_v20  ;;  %v2490_v14 = vmul.f32 %v6409_v46, %v6667_v23  ;;  %v6766_v20 = vld [vmem:[#allocation3 + $0x68] sm:$0x3] }
 0x1e4   : > { %5539 = vmatmul.mubr.msk.f32.gmra.mxu0 %vm1445_vm6, %v1422_v28  ;;  %5569 = vmatmul.mubr.msk.f32.gmra.mxu1 %vm1445_vm6, %v1442_v24  ;;  %v2326_v59 = vadd.f32 %v2318_v21, %v2306_v29  ;;  %v2548_v49 = vrot.slane %v2513_v8, 1  ;;  %v6718_v17 = vadd.f32 %v2623_v62, %v2573_v52  ;;  %v2454_v18 = vsel %vm2270_vm8, %v2452_v34, %v2453_v1  ;;  %v1428_v8 = vld [vmem:[%s8563_s10 + $0x78] sm:$0xff] }
 0x1e5   : > { %5541 = vmatprep.mubr.msk.f32.mxu0 %vm1445_vm6, %v1423_v15  ;;  %5571 = vmatprep.mubr.msk.f32.mxu1 %vm1445_vm6, %v1443_v44  ;;  %v2549_v11 = vrot.slane %v2514_v37, 1  ;;  %v2590_v19 = vmul.f32 %v6415_v48, %v6682_v33  ;;  %v2169_v22 = vmul.f32 %v6338_v30, %v6573_v0  ;;  %v2170_v51 = vmul.f32 %v6338_v30, %v6587_v61  ;;  %v6754_v15 = vld [vmem:[#allocation3 + $0x60] sm:$0xff]  ;;  %v1429_v37 = vld [vmem:[%s8563_s10 + $0x80] sm:$0xff] }
 0x1e6   : > { %v2402_v4 = vadd.f32 %v2378_v13, %v2326_v59  ;;  %v2246_v54 = vmul.f32 %v6356_v53, %v6573_v0  ;;  %v2624_v2 = vrot.slane %v2589_v10, 2  ;;  %v2153_v25 = vmul.f32 %v6364_v3, %v6573_v0 }
 0x1e7   : > { %v2550_v31 = vsel %vm2193_vm7, %v2548_v49, %v2549_v11  ;;  %v2247_v27 = vmul.f32 %v6356_v53, %v6587_v61  ;;  %v2206_v24 = vrot.slane %v2169_v22, 1  ;;  %v2207_v32 = vrot.slane %v2170_v51, 1  ;;  %v1430_v11 = vld [vmem:[%s8563_s10 + $0x88] sm:$0xff] }
 0x1e8   : > { %5542 = vmatmul.mubr.msk.f32.gmra.mxu0 %vm1445_vm6, %v1424_v50  ;;  %5572 = vmatmul.mubr.msk.f32.gmra.mxu1 %vm1445_vm6, %v1444_v57  ;;  %v2478_v28 = vadd.f32 %v2454_v18, %v2402_v4  ;;  %v2283_v39 = vrot.slane %v2246_v54, 2  ;;  %v2625_v42 = vrot.slane %v2590_v19, 2  ;;  %v2343_v61 = vmul.f32 %v6437_v38, %v6667_v23 }
 0x1e9   : > { %5578 = vmatprep.mubr.msk.f32.mxu1 %vm776_vm2, %v2009_v55  ;;  %5544 = vmatprep.mubr.msk.f32.mxu0 %vm1445_vm6, %v1425_v16  ;;  %v2284_v0 = vrot.slane %v2247_v27, 2  ;;  %v2344_v35 = vmul.f32 %v6437_v38, %v6682_v33  ;;  %v1427_v55 = vld [vmem:[%s8563_s10 + $0x70] sm:$0xff]  ;;  %v2208_v44 = vsel %vm2193_vm7, %v2206_v24, %v2207_v32  ;;  %v2419_v45 = vmul.f32 %v6440_v58, %v6667_v23 }
 0x1ea   : > { %v2498_v43 = vadd.f32 %v2490_v14, %v2478_v28  ;;  %v2420_v21 = vmul.f32 %v6440_v58, %v6682_v33  ;;  %v2230_v34 = vadd.f32 %v2208_v44, %v2153_v25  ;;  %v2319_v52 = vmul.f32 %v6431_v60, %v6667_v23 }
 0x1eb   : > { %v2379_v29 = vrot.slane %v2343_v61, 1  ;;  %v2380_v1 = vrot.slane %v2344_v35, 1  ;;  %v2285_v41 = vsel %vm2270_vm8, %v2283_v39, %v2284_v0  ;;  %v2491_v57 = vmul.f32 %v6409_v46, %v6754_v15 }
 0x1ec   : > { %5545 = vmatmul.mubr.msk.f32.gmra.mxu0 %vm1445_vm6, %v1426_v6  ;;  %5579 = vmatmul.mubr.msk.f32.vlgmr.msra.gmra.mxu1 %vm776_vm2, %v2010_v56  ;;  %v2574_v36 = vadd.f32 %v2550_v31, %v2498_v43  ;;  %v2455_v56 = vrot.slane %v2419_v45, 2  ;;  %v2456_v62 = vrot.slane %v2420_v21, 2  ;;  %v2307_v10 = vadd.f32 %v2285_v41, %v2230_v34  ;;  %v6832_v43 = vld [vmem:[#allocation3 + $0x78] sm:$0x3] }
 0x1ed   : > { %5582 = vmatpush3.msra.mxu1 %v6627_v63  ;;  %5585 = vmatprep.mubr.msk.f32.mxu1 %vm776_vm2, %v6521_v26  ;;  %v2626_v63 = vsel %vm2270_vm8, %v2624_v2, %v2625_v42  ;;  %v2515_v26 = vmul.f32 %v6412_v47, %v6754_v15  ;;  %v2381_v50 = vsel %vm2193_vm7, %v2379_v29, %v2380_v1 }
 0x1ee   : > { %5583 = vmatprep.subr.mxu1 %v2655_v40  ;;  %5547 = vmatprep.mubr.msk.f32.mxu0 %vm1445_vm6, %v1427_v55  ;;  %v2516_v59 = vmul.f32 %v6412_v47, %v6766_v20  ;;  %v2591_v13 = vmul.f32 %v6415_v48, %v6754_v15  ;;  %v2650_v14 = vadd.f32 %v2626_v63, %v2574_v36 }
 0x1ef   : > { %5584 = vmatpush3.msra.mxu1 %v2655_v40  ;;  %v2327_v49 = vadd.f32 %v2319_v52, %v2307_v10  ;;  %v2551_v16 = vrot.slane %v2515_v26, 1  ;;  %v2592_v18 = vmul.f32 %v6415_v48, %v6766_v20  ;;  %v2457_v19 = vsel %vm2270_vm8, %v2455_v56, %v2456_v62 }
 0x1f0   : > { %5548 = vmatmul.mubr.msk.f32.gmra.mxu0 %vm1445_vm6, %v1428_v8  ;;  %5586 = vmatmul.mubr.msk.f32.vlgmr.msra.gmra.mxu1 %vm776_vm2, %v6649_v12  ;;  %v2552_v4 = vrot.slane %v2516_v59, 1  ;;  %v2171_v12 = vmul.f32 %v6338_v30, %v6667_v23  ;;  %v2172_v22 = vmul.f32 %v6338_v30, %v6682_v33  ;;  %v2154_v54 = vmul.f32 %v6364_v3, %v6667_v23 }
 0x1f1   : > { %5588 = vmatprep.mubr.msk.f32.mxu1 %vm776_vm2, %v6718_v17  ;;  %5550 = vmatprep.mubr.msk.f32.mxu0 %vm1445_vm6, %v1429_v37  ;;  %v2403_v51 = vadd.f32 %v2381_v50, %v2327_v49  ;;  %v1431_v17 = vld [vmem:[%s8563_s10 + $0x90] sm:$0xff]  ;;  %v2248_v31 = vmul.f32 %v6356_v53, %v6667_v23  ;;  %v2249_v2 = vmul.f32 %v6356_v53, %v6682_v33  ;;  %v2627_v25 = vrot.slane %v2591_v13, 2  ;;  %v1432_v23 = vld [vmem:[%s8563_s10 + $0x98] sm:$0xff]  ;;  %v6823_v33 = vld [vmem:[#allocation3 + $0x70] sm:$0xff] }
 0x1f2   : > { %v2628_v27 = vrot.slane %v2592_v18, 2  ;;  %v2209_v6 = vrot.slane %v2171_v12, 1  ;;  %v2210_v28 = vrot.slane %v2172_v22, 1  ;;  %v2553_v32 = vsel %vm2193_vm7, %v2551_v16, %v2552_v4 }
 0x1f3   : > { %v2479_v24 = vadd.f32 %v2457_v19, %v2403_v51  ;;  %v2286_v39 = vrot.slane %v2248_v31, 2  ;;  %v2287_v42 = vrot.slane %v2249_v2, 2  ;;  %v2345_v61 = vmul.f32 %v6437_v38, %v6754_v15 }
 0x1f4   : > { %5551 = vmatmul.mubr.msk.f32.gmra.mxu0 %vm1445_vm6, %v1430_v11  ;;  %5589 = vmatmul.mubr.msk.f32.gmra.mxu1 %vm776_vm2, %v2650_v14  ;;  %v2211_v0 = vsel %vm2193_vm7, %v2209_v6, %v2210_v28  ;;  %v2346_v35 = vmul.f32 %v6437_v38, %v6766_v20  ;;  %v2421_v40 = vmul.f32 %v6440_v58, %v6754_v15 }
 0x1f5   : > { %5553 = vmatprep.mubr.msk.f32.mxu0 %vm1445_vm6, %v1431_v17  ;;  %v2499_v55 = vadd.f32 %v2491_v57, %v2479_v24  ;;  %v2231_v44 = vadd.f32 %v2211_v0, %v2154_v54  ;;  %v2320_v45 = vmul.f32 %v6431_v60, %v6754_v15  ;;  %v2422_v21 = vmul.f32 %v6440_v58, %v6766_v20 }
 0x1f6   : > { %v2288_v34 = vsel %vm2270_vm8, %v2286_v39, %v2287_v42  ;;  %v2382_v52 = vrot.slane %v2345_v61, 1  ;;  %v2383_v29 = vrot.slane %v2346_v35, 1  ;;  %v2458_v1 = vrot.slane %v2421_v40, 2 }
 0x1f7   : > { %v2575_v8 = vadd.f32 %v2553_v32, %v2499_v55  ;;  %v2308_v36 = vadd.f32 %v2288_v34, %v2231_v44  ;;  %v2459_v41 = vrot.slane %v2422_v21, 2  ;;  %v2517_v56 = vmul.f32 %v6412_v47, %v6823_v33 }
 0x1f8   : > { %5554 = vmatmul.mubr.msk.f32.gmra.mxu0 %vm1445_vm6, %v1432_v23  ;;  %v2629_v62 = vsel %vm2270_vm8, %v2627_v25, %v2628_v27  ;;  %v2518_v37 = vmul.f32 %v6412_v47, %v6832_v43  ;;  %v2593_v63 = vmul.f32 %v6415_v48, %v6823_v33  ;;  %v2594_v10 = vmul.f32 %v6415_v48, %v6832_v43  ;;  %v2138_v27 = vld [vmem:[#allocation3 + $0x80] sm:$0xff] }
 0x1f9   : > { %v2651_v26 = vadd.f32 %v2629_v62, %v2575_v8  ;;  %v2328_v50 = vadd.f32 %v2320_v45, %v2308_v36  ;;  %v2492_v57 = vmul.f32 %v6409_v46, %v6823_v33  ;;  %v2554_v59 = vrot.slane %v2517_v56, 1 }
 0x1fa   : > { %v2384_v13 = vsel %vm2193_vm7, %v2382_v52, %v2383_v29  ;;  %v2460_v14 = vsel %vm2270_vm8, %v2458_v1, %v2459_v41  ;;  %v2555_v49 = vrot.slane %v2518_v37, 1  ;;  %v2630_v16 = vrot.slane %v2593_v63, 2 }
 0x1fb   : > { %5591 = vmatprep.mubr.msk.f32.mxu1 %vm776_vm2, %v2651_v26  ;;  %v2404_v18 = vadd.f32 %v2384_v13, %v2328_v50  ;;  %v2173_v11 = vmul.f32 %v6338_v30, %v6754_v15  ;;  %v2174_v19 = vmul.f32 %v6338_v30, %v6766_v20  ;;  %v2250_v4 = vmul.f32 %v6356_v53, %v6754_v15 }
 0x1fc   : > { %v2556_v12 = vsel %vm2193_vm7, %v2554_v59, %v2555_v49  ;;  %v2631_v22 = vrot.slane %v2594_v10, 2  ;;  %v2155_v51 = vmul.f32 %v6364_v3, %v6754_v15  ;;  %v2251_v17 = vmul.f32 %v6356_v53, %v6766_v20  ;;  %v2139_v15 = vld [vmem:[#allocation3 + $0x88] sm:$0x3]  ;;  %v2140_v49 = vld [vmem:[#allocation3 + $0x90] sm:$0xff] }
 0x1fd   : > { %v2480_v54 = vadd.f32 %v2460_v14, %v2404_v18  ;;  %v2212_v31 = vrot.slane %v2173_v11, 1  ;;  %v2213_v2 = vrot.slane %v2174_v19, 1  ;;  %v2289_v25 = vrot.slane %v2250_v4, 2 }
 0x1fe   : > { %v2290_v6 = vrot.slane %v2251_v17, 2  ;;  %v2347_v28 = vmul.f32 %v6437_v38, %v6823_v33  ;;  %v2348_v24 = vmul.f32 %v6437_v38, %v6832_v43  ;;  %v2423_v32 = vmul.f32 %v6440_v58, %v6823_v33 }
 0x1ff   : > { %v2500_v39 = vadd.f32 %v2492_v57, %v2480_v54  ;;  %v2214_v42 = vsel %vm2193_vm7, %v2212_v31, %v2213_v2  ;;  %v2321_v20 = vmul.f32 %v6431_v60, %v6823_v33  ;;  %v2424_v23 = vmul.f32 %v6440_v58, %v6832_v43 }
 0x200   : > { %v2232_v0 = vadd.f32 %v2214_v42, %v2155_v51  ;;  %v2291_v61 = vsel %vm2270_vm8, %v2289_v25, %v2290_v6  ;;  %v2385_v35 = vrot.slane %v2347_v28, 1  ;;  %v2386_v40 = vrot.slane %v2348_v24, 1 }
 0x201   : > { %v2576_v55 = vadd.f32 %v2556_v12, %v2500_v39  ;;  %v2461_v44 = vrot.slane %v2423_v32, 2  ;;  %v2462_v45 = vrot.slane %v2424_v23, 2  ;;  %v2519_v21 = vmul.f32 %v6412_v47, %v2138_v27 }
 0x202   : > { %v2632_v34 = vsel %vm2270_vm8, %v2630_v16, %v2631_v22  ;;  %v2309_v52 = vadd.f32 %v2291_v61, %v2232_v0  ;;  %v2520_v29 = vmul.f32 %v6412_v47, %v2139_v15  ;;  %v2595_v1 = vmul.f32 %v6415_v48, %v2138_v27  ;;  %v2141_v16 = vld [vmem:[#allocation3 + $0x98] sm:$0x3] }
 0x203   : > { %v2652_v8 = vadd.f32 %v2632_v34, %v2576_v55  ;;  %v2387_v36 = vsel %vm2193_vm7, %v2385_v35, %v2386_v40  ;;  %v2463_v56 = vsel %vm2270_vm8, %v2461_v44, %v2462_v45  ;;  %v2493_v62 = vmul.f32 %v6409_v46, %v2138_v27 }
 0x204   : > { %v2329_v41 = vadd.f32 %v2321_v20, %v2309_v52  ;;  %v2557_v37 = vrot.slane %v2519_v21, 1  ;;  %v2596_v63 = vmul.f32 %v6415_v48, %v2139_v15  ;;  %v2175_v10 = vmul.f32 %v6338_v30, %v6823_v33  ;;  %v5464_v52 = vpop.f32.mrf.mxu1 }
 0x205   : > { %5592 = vmatmul.mubr.msk.f32.gmra.mxu1 %vm776_vm2, %v2652_v8  ;;  %v2176_v26 = vmul.f32 %v6338_v30, %v6832_v43  ;;  %v2252_v50 = vmul.f32 %v6356_v53, %v6823_v33  ;;  %v2558_v59 = vrot.slane %v2520_v29, 1  ;;  %v2633_v13 = vrot.slane %v2595_v1, 2 }
 0x206   : > { %v2405_v57 = vadd.f32 %v2387_v36, %v2329_v41  ;;  %v2253_v14 = vmul.f32 %v6356_v53, %v6832_v43  ;;  %v2156_v18 = vmul.f32 %v6364_v3, %v6823_v33  ;;  %v2215_v11 = vrot.slane %v2175_v10, 1  ;;  %v1254_v8 = vpop.f32.mrf.mxu1 }
 0x207   : > { %v2216_v19 = vrot.slane %v2176_v26, 1  ;;  %v2292_v4 = vrot.slane %v2252_v50, 2  ;;  %v2349_v30 = vmul.f32 %v6437_v38, %v2138_v27  ;;  %v2350_v51 = vmul.f32 %v6437_v38, %v2139_v15 }
 0x208   : > { %v2481_v12 = vadd.f32 %v2463_v56, %v2405_v57  ;;  %v2293_v22 = vrot.slane %v2253_v14, 2  ;;  %v2634_v17 = vrot.slane %v2596_v63, 2  ;;  %v2425_v31 = vmul.f32 %v6440_v58, %v2138_v27  ;;  %v5467_v41 = vpop.f32.mrf.mxu1 }
 0x209   : > { %v2217_v54 = vsel %vm2193_vm7, %v2215_v11, %v2216_v19  ;;  %v2426_v53 = vmul.f32 %v6440_v58, %v2139_v15  ;;  %v2521_v3 = vmul.f32 %v6412_v47, %v2140_v49  ;;  %v2522_v33 = vmul.f32 %v6412_v47, %v2141_v16 }
 0x20a   : > { %v2501_v43 = vadd.f32 %v2493_v62, %v2481_v12  ;;  %v2233_v2 = vadd.f32 %v2217_v54, %v2156_v18  ;;  %v2559_v25 = vsel %vm2193_vm7, %v2557_v37, %v2558_v59  ;;  %v2294_v6 = vsel %vm2270_vm8, %v2292_v4, %v2293_v22  ;;  %v1264_v56 = vpop.f32.mrf.mxu1  ;;  %v4574_v37 = vld [vmem:[%s8569_s16] sm:$0xff] }
 0x20b   : > { %v2388_v28 = vrot.slane %v2349_v30, 1  ;;  %v2389_v24 = vrot.slane %v2350_v51, 1  ;;  %v2322_v39 = vmul.f32 %v6431_v60, %v2138_v27  ;;  %v2597_v42 = vmul.f32 %v6415_v48, %v2140_v49  ;;  %5599 = vmatprep.subr.mxu0 %v4574_v37 }
 0x20c   : > { %v2577_v38 = vadd.f32 %v2559_v25, %v2501_v43  ;;  %v2310_v32 = vadd.f32 %v2294_v6, %v2233_v2  ;;  %v2635_v58 = vsel %vm2270_vm8, %v2633_v13, %v2634_v17  ;;  %v2464_v15 = vrot.slane %v2425_v31, 2  ;;  %v5470_v62 = vpop.f32.mrf.mxu1  ;;  %5600 = vmatpush3.msra.mxu0 %v4574_v37  ;;  %v2937_v25 = vld [vmem:[%s8568_s15 + $0x8] sm:$0x7] }
 0x20d   : > { %v2465_v20 = vrot.slane %v2426_v53, 2  ;;  %v2598_v23 = vmul.f32 %v6415_v48, %v2141_v16  ;;  %v2390_v61 = vsel %vm2193_vm7, %v2388_v28, %v2389_v24  ;;  %v2560_v35 = vrot.slane %v2521_v3, 1  ;;  %v2935_v3 = vld [vmem:[%s8568_s15] sm:$0x7] }
 0x20e   : > { %v2653_v0 = vadd.f32 %v2635_v58, %v2577_v38  ;;  %v2330_v47 = vadd.f32 %v2322_v39, %v2310_v32  ;;  %v2561_v40 = vrot.slane %v2522_v33, 1  ;;  %v2494_v44 = vmul.f32 %v6409_v46, %v2140_v49  ;;  %v1274_v46 = vpop.f32.mrf.mxu1  ;;  %v2936_v33 = vld [vmem:[%s8568_s15 + $0x4] sm:$0x7]  ;;  %v6966_v24 = vld [vmem:[%s8609_s8] ss:$0 sm:$0xff]  ;;  %v2881_v38 = vld [vmem:[#allocation4] sm:$0xff] }
 0x20f   : > { %v2466_v60 = vsel %vm2270_vm8, %v2464_v15, %v2465_v20  ;;  %v2636_v27 = vrot.slane %v2597_v42, 2  ;;  %v2637_v45 = vrot.slane %v2598_v23, 2  ;;  %v6959_v6 = vrot.slane %v2935_v3, %v6277_v5  ;;  %v2882_v32 = vld [vmem:[#allocation4 + $0x8] sm:$0xff]  ;;  %v2883_v20 = vld [vmem:[#allocation4 + $0x10] sm:$0x3] }
 0x210   : > { %5594 = vmatprep.mubr.msk.f32.mxu1 %vm776_vm2, %v2653_v0  ;;  %v2406_v55 = vadd.f32 %v2390_v61, %v2330_v47  ;;  %v2562_v34 = vsel %vm2193_vm7, %v2560_v35, %v2561_v40  ;;  %v5473_v63 = vpop.f32.mrf.mxu1  ;;  %v6969_v39 = vrot.slane %v2935_v3, %v6282_v7  ;;  %v6972_v42 = vrot.slane %v2935_v3, %v6285_v9 }
 0x211   : > { %v2638_v29 = vsel %vm2270_vm8, %v2636_v27, %v2637_v45  ;;  %v6975_v58 = vrot.slane %v2936_v33, %v6282_v7  ;;  %v6978_v15 = vrot.slane %v2936_v33, %v6277_v5  ;;  %v6981_v23 = vrot.slane %v2936_v33, %v6285_v9 }
 0x212   : > { %v2482_v21 = vadd.f32 %v2466_v60, %v2406_v55  ;;  %v1284_v10 = vpop.f32.mrf.mxu1  ;;  %v6984_v0 = vrot.slane %v2937_v25, %v6282_v7  ;;  %v6987_v47 = vrot.slane %v2937_v25, %v6277_v5  ;;  %v6990_v61 = vrot.slane %v2937_v25, %v6285_v9 }
 0x213   : > { %v1260_v35 = vadd.f32 %v5464_v52, %v6966_v24  ;;  %v1255_v40 = vadd.f32 %v6966_v24, %v1254_v8  ;;  %v2979_v60 = vmul.f32 %v6959_v6, %v2882_v32  ;;  %v1270_v27 = vadd.f32 %v5467_v41, %v6966_v24 }
 0x214   : > { %v2502_v48 = vadd.f32 %v2494_v44, %v2482_v21  ;;  %v5476_v26 = vpop.f32.mrf.mxu1  ;;  %v2978_v44 = vmul.f32 %v6959_v6, %v2881_v38  ;;  %v1265_v7 = vadd.f32 %v6966_v24, %v1264_v56  ;;  %v2980_v45 = vmul.f32 %v6959_v6, %v2883_v20 }
 0x215   : > { %v7003_v9 = vadd.f32 %v5470_v62, %v6966_v24  ;;  %v7006_v21 = vadd.f32 %v6966_v24, %v1274_v46  ;;  %v7012_v52 = vadd.f32 %v6966_v24, %v1284_v10  ;;  %v3075_v62 = vrot.slane %v2979_v60, 1 }
 0x216   : > { %v2578_v1 = vadd.f32 %v2562_v34, %v2502_v48  ;;  %v1294_v50 = vpop.f32.mrf.mxu1  ;;  %v7009_v34 = vadd.f32 %v5473_v63, %v6966_v24  ;;  %v7015_v48 = vadd.f32 %v5476_v26, %v6966_v24  ;;  %v3074_v56 = vrot.slane %v2978_v44, 1 }
 0x217   : > { %v3222_v46 = vmul.f32 %v6972_v42, %v2881_v38  ;;  %v3223_v37 = vmul.f32 %v6972_v42, %v2882_v32  ;;  %v3224_v26 = vmul.f32 %v6972_v42, %v2883_v20  ;;  %v2942_v44 = vmul.f32 %v6969_v39, %v2881_v38 }
 0x218   : > { %v2654_v36 = vadd.f32 %v2638_v29, %v2578_v1  ;;  %v6919_v57 = vpop.f32.mrf.mxu1  ;;  %v7018_v29 = vadd.f32 %v6966_v24, %v1294_v50 }
 0x219   : > { %v7027_v50 = vadd.f32 %v6919_v57, %v6966_v24 }
 0x21a   : > { %5595 = vmatmul.mubr.msk.f32.gmra.mxu1 %vm776_vm2, %v2654_v36  ;;  %v6921_v59 = vpop.f32.mrf.mxu1 }
 0x21c   : > { %v6923_v13 = vpop.f32.mrf.mxu1 }
 0x21e   : > { %v6925_v14 = vpop.f32.mrf.mxu1 }
 0x21f   : > { %v7049_v38 = vadd.f32 %v6966_v24, %v6925_v14 }
 0x220   : > { %v6927_v49 = vpop.f32.mrf.mxu1 }
 0x222   : > { %v6929_v16 = vpop.f32.mrf.mxu1 }
 0x224   : > { %v6931_v18 = vpop.f32.mrf.mxu1 }
 0x226   : > { %v6933_v11 = vpop.f32.mrf.mxu1 }
 0x228   : > { %v6935_v19 = vpop.f32.mrf.mxu1 }
 0x22a   : > { %v6937_v4 = vpop.f32.mrf.mxu1 }
 0x22c   : > { %v5494_v12 = vpop.f32.mrf.mxu1 }
 0x22d   : > { %v1360_v5 = vadd.f32 %v5494_v12, %v6966_v24  ;;  %v3077_v12 = vrot.slane %v2980_v45, 1  ;;  %v3318_v45 = vrot.slane %v3222_v46, 2 }
 0x22e   : > { %v1354_v22 = vpop.f32.mrf.mxu1 }
 0x22f   : > { %v1355_v1 = vadd.f32 %v6966_v24, %v1354_v22  ;;  %v7031_v22 = vadd.f32 %v6966_v24, %v6921_v59 }
 0x230   : > { %v5497_v30 = vpop.f32.mrf.mxu1 }
 0x231   : > { %v1370_v8 = vadd.f32 %v5497_v30, %v6966_v24  ;;  %v7035_v30 = vadd.f32 %v6923_v13, %v6966_v24  ;;  %v3076_v13 = vsel %vm2193_vm7, %v3074_v56, %v3075_v62  ;;  %v7061_v56 = vadd.f32 %v6931_v18, %v6966_v24 }
 0x232   : > { %v1364_v51 = vpop.f32.mrf.mxu1  ;;  %v3186_v46 = vadd.f32 %v3076_v13, %v2942_v44  ;;  %v7073_v18 = vadd.f32 %v6935_v19, %v6966_v24  ;;  %v7084_v19 = vadd.f32 %v6966_v24, %v6937_v4 }
 0x233   : > { %v1365_v3 = vadd.f32 %v6966_v24, %v1364_v51  ;;  %v3319_v51 = vrot.slane %v3223_v37, 2 }
 0x234   : > { %v5500_v17 = vpop.f32.mrf.mxu1 }
 0x236   : > { %v6939_v54 = vpop.f32.mrf.mxu1 }
 0x238   : > { %v6941_v31 = vpop.f32.mrf.mxu1 }
 0x23a   : > { %v6943_v53 = vpop.f32.mrf.mxu1 }
 0x23c   : > { %v6945_v43 = vpop.f32.mrf.mxu1 }
 0x23e   : > { %v6947_v2 = vpop.f32.mrf.mxu1 }
 0x240   : > { %v6961_v28 = vpop.f32.mrf.mxu1 }
 0x242   : > { %v6994_v55 = vpop.f32.mrf.mxu1 }
 0x294   : > { %v5528_v36 = vpop.f32.mrf.mxu0  ;;  %v5558_v41 = vpop.f32.mrf.mxu1 }
 0x295   : > { %v1768_v63 = vadd.f32 %v5528_v36, %v1260_v35  ;;  %v1788_v10 = vadd.f32 %v5558_v41, %v1360_v5  ;;  %v1380_v35 = vadd.f32 %v5500_v17, %v6966_v24  ;;  %v2943_v5 = vmul.f32 %v6969_v39, %v2882_v32 }
 0x296   : > { %v1608_v33 = vpop.f32.mrf.mxu0  ;;  %v1708_v25 = vpop.f32.mrf.mxu1  ;;  %v3078_v41 = vsel %vm2193_vm7, %v3075_v62, %v3077_v12  ;;  %v7053_v32 = vadd.f32 %v6927_v49, %v6966_v24  ;;  %v1375_v62 = vadd.f32 %v6966_v24, %v6939_v54  ;;  %v1390_v12 = vadd.f32 %v6941_v31, %v6966_v24 }
 0x297   : > { %2850 = vst.msk [vmem:[#allocation4 + $0x21] sm:$0xff] %vm776_vm2, %v1768_v63  ;;  %2870 = vst.msk [vmem:[#allocation4 + $0x111] sm:$0xff] %vm776_vm2, %v1788_v10  ;;  %v1767_v57 = vadd.f32 %v1608_v33, %v1255_v40  ;;  %v1787_v20 = vadd.f32 %v1708_v25, %v1355_v1  ;;  %v3321_v40 = vrot.slane %v3224_v26, 2  ;;  %v7057_v1 = vadd.f32 %v6966_v24, %v6929_v16 }
 0x298   : > { %v5531_v59 = vpop.f32.mrf.mxu0  ;;  %v5561_v60 = vpop.f32.mrf.mxu1  ;;  %v7069_v16 = vadd.f32 %v6966_v24, %v6933_v11  ;;  %v3320_v10 = vsel %vm2270_vm8, %v3318_v45, %v3319_v51  ;;  %v3187_v54 = vadd.f32 %v3078_v41, %v2943_v5  ;;  %v1400_v33 = vadd.f32 %v6945_v43, %v6966_v24 }
 0x299   : > { %2849 = vst.msk [vmem:[#allocation4 + $0x19] sm:$0xff] %vm776_vm2, %v1767_v57  ;;  %2869 = vst.msk [vmem:[#allocation4 + $0x109] sm:$0xff] %vm776_vm2, %v1787_v20  ;;  %v1770_v17 = vadd.f32 %v5531_v59, %v1270_v27  ;;  %v1790_v36 = vadd.f32 %v5561_v60, %v1370_v8  ;;  %v3322_v26 = vsel %vm2270_vm8, %v3319_v51, %v3321_v40 }
 0x29a   : > { %v1618_v27 = vpop.f32.mrf.mxu0  ;;  %v1718_v8 = vpop.f32.mrf.mxu1  ;;  %v1395_v31 = vadd.f32 %v6966_v24, %v6947_v2  ;;  %v7101_v43 = vadd.f32 %v6966_v24, %v6994_v55  ;;  %v7113_v13 = vadd.f32 %v3322_v26, %v3187_v54 }
 0x29b   : > { %2852 = vst.msk [vmem:[#allocation4 + $0x39] sm:$0xff] %vm776_vm2, %v1770_v17  ;;  %2872 = vst.msk [vmem:[#allocation4 + $0x129] sm:$0xff] %vm776_vm2, %v1790_v36  ;;  %v1769_v14 = vadd.f32 %v1618_v27, %v1265_v7  ;;  %v1789_v49 = vadd.f32 %v1718_v8, %v1365_v3  ;;  %v1385_v3 = vadd.f32 %v6966_v24, %v6943_v53 }
 0x29c   : > { %v5534_v37 = vpop.f32.mrf.mxu0  ;;  %v5564_v63 = vpop.f32.mrf.mxu1 }
 0x29d   : > { %2851 = vst.msk [vmem:[#allocation4 + $0x31] sm:$0xff] %vm776_vm2, %v1769_v14  ;;  %2871 = vst.msk [vmem:[#allocation4 + $0x121] sm:$0xff] %vm776_vm2, %v1789_v49  ;;  %v1772_v7 = vadd.f32 %v5534_v37, %v7003_v9  ;;  %v1792_v11 = vadd.f32 %v5564_v63, %v1380_v35  ;;  %v7094_v9 = vadd.f32 %v6961_v28, %v6966_v24 }
 0x29e   : > { %v1628_v25 = vpop.f32.mrf.mxu0  ;;  %v1728_v57 = vpop.f32.mrf.mxu1  ;;  %v2886_v20 = vld [vmem:[#allocation4 + $0x28] sm:$0x3]  ;;  %v3430_v35 = vadd.f32 %v3320_v10, %v3186_v46 }
 0x29f   : > { %2854 = vst.msk [vmem:[#allocation4 + $0x51] sm:$0xff] %vm776_vm2, %v1772_v7  ;;  %2874 = vst.msk [vmem:[#allocation4 + $0x141] sm:$0xff] %vm776_vm2, %v1792_v11  ;;  %v1771_v4 = vadd.f32 %v1628_v25, %v7006_v21  ;;  %v1791_v53 = vadd.f32 %v1728_v57, %v1375_v62  ;;  %v7108_v28 = vmul.f32 %v6978_v15, %v2886_v20 }
 0x2a0   : > { %v5537_v2 = vpop.f32.mrf.mxu0  ;;  %v5567_v44 = vpop.f32.mrf.mxu1  ;;  %v7103_v59 = vld [vmem:[#allocation4 + $0x18] sm:$0xff]  ;;  %v7105_v60 = vld [vmem:[#allocation4 + $0x20] sm:$0xff]  ;;  %v7111_v5 = vmul.f32 %v6981_v23, %v2886_v20  ;;  %v7133_v40 = vmul.f32 %v6959_v6, %v2886_v20  ;;  %v7148_v7 = vmul.f32 %v6972_v42, %v2886_v20 }
 0x2a1   : > { %2853 = vst.msk [vmem:[#allocation4 + $0x49] sm:$0xff] %vm776_vm2, %v1771_v4  ;;  %2873 = vst.msk [vmem:[#allocation4 + $0x139] sm:$0xff] %vm776_vm2, %v1791_v53  ;;  %v1774_v24 = vadd.f32 %v5537_v2, %v7009_v34  ;;  %v1794_v55 = vadd.f32 %v5567_v44, %v1390_v12  ;;  %v3466_v21 = vmul.f32 %v6975_v58, %v7103_v59 }
 0x2a2   : > { %v3534_v45 = vmul.f32 %v6978_v15, %v7103_v59  ;;  %v1638_v51 = vpop.f32.mrf.mxu0  ;;  %v1738_v17 = vpop.f32.mrf.mxu1  ;;  %v7124_v36 = vmul.f32 %v6978_v15, %v7105_v60  ;;  %v3778_v41 = vmul.f32 %v6981_v23, %v7103_v59  ;;  %v7130_v34 = vmul.f32 %v6981_v23, %v7105_v60  ;;  %v7153_v26 = vld [vmem:[#allocation4 + $0x40] sm:$0x3] }
 0x2a3   : > { %2856 = vst.msk [vmem:[#allocation4 + $0x69] sm:$0xff] %vm776_vm2, %v1774_v24  ;;  %2876 = vst.msk [vmem:[#allocation4 + $0x159] sm:$0xff] %vm776_vm2, %v1794_v55  ;;  %v1773_v27 = vadd.f32 %v1638_v51, %v7012_v52  ;;  %v1793_v8 = vadd.f32 %v1738_v17, %v1385_v3  ;;  %v3498_v62 = vadd.f32 %v3466_v21, %v3430_v35  ;;  %v3633_v3 = vrot.slane %v7108_v28, 1 }
 0x2a4   : > { %v3630_v14 = vrot.slane %v3534_v45, 1  ;;  %v5540_v49 = vpop.f32.mrf.mxu0  ;;  %v5570_v46 = vpop.f32.mrf.mxu1  ;;  %v7141_v37 = vld [vmem:[#allocation4 + $0x30] sm:$0xff]  ;;  %v7143_v63 = vld [vmem:[#allocation4 + $0x38] sm:$0xff]  ;;  %v3631_v10 = vrot.slane %v7124_v36, 1  ;;  %v3874_v54 = vrot.slane %v3778_v41, 2  ;;  %v3875_v12 = vrot.slane %v7130_v34, 2 }
 0x2a5   : > { %2855 = vst.msk [vmem:[#allocation4 + $0x61] sm:$0xff] %vm776_vm2, %v1773_v27  ;;  %2875 = vst.msk [vmem:[#allocation4 + $0x151] sm:$0xff] %vm776_vm2, %v1793_v8  ;;  %v1776_v52 = vadd.f32 %v5540_v49, %v7015_v48  ;;  %v1796_v11 = vadd.f32 %v5570_v46, %v1400_v33  ;;  %v4090_v25 = vmul.f32 %v6987_v47, %v7141_v37  ;;  %v3877_v35 = vrot.slane %v7111_v5, 2 }
 0x2a6   : > { %v1648_v57 = vpop.f32.mrf.mxu0  ;;  %v1748_v4 = vpop.f32.mrf.mxu1  ;;  %v3632_v20 = vsel %vm2193_vm7, %v3630_v14, %v3631_v10  ;;  %v3876_v53 = vsel %vm2270_vm8, %v3874_v54, %v3875_v12  ;;  %v4022_v2 = vmul.f32 %v6984_v0, %v7141_v37  ;;  %v4091_v28 = vmul.f32 %v6987_v47, %v7143_v63 }
 0x2a7   : > { %2858 = vst.msk [vmem:[#allocation4 + $0x81] sm:$0xff] %vm776_vm2, %v1776_v52  ;;  %2878 = vst.msk [vmem:[#allocation4 + $0x171] sm:$0xff] %vm776_vm2, %v1796_v11  ;;  %v1775_v48 = vadd.f32 %v1648_v57, %v7018_v29  ;;  %v1795_v33 = vadd.f32 %v1748_v4, %v1395_v31  ;;  %v3742_v44 = vadd.f32 %v3632_v20, %v3498_v62  ;;  %v4186_v21 = vrot.slane %v4090_v25, 1 }
 0x2a8   : > { %v5543_v24 = vpop.f32.mrf.mxu0  ;;  %v5573_v55 = vpop.f32.mrf.mxu1  ;;  %v4092_v5 = vmul.f32 %v6987_v47, %v7153_v26  ;;  %v4334_v45 = vmul.f32 %v6990_v61, %v7141_v37  ;;  %v7175_v51 = vmul.f32 %v6990_v61, %v7143_v63  ;;  %v4187_v36 = vrot.slane %v4091_v28, 1 }
 0x2a9   : > { %2857 = vst.msk [vmem:[#allocation4 + $0x79] sm:$0xff] %vm776_vm2, %v1775_v48  ;;  %2877 = vst.msk [vmem:[#allocation4 + $0x169] sm:$0xff] %vm776_vm2, %v1795_v33  ;;  %v1778_v29 = vadd.f32 %v5543_v24, %v7027_v50  ;;  %v1798_v31 = vadd.f32 %v5573_v55, %v7094_v9  ;;  %v3986_v17 = vadd.f32 %v3876_v53, %v3742_v44 }
 0x2aa   : > { %v1658_v41 = vpop.f32.mrf.mxu0  ;;  %v1758_v34 = vpop.f32.mrf.mxu1  ;;  %v4189_v27 = vrot.slane %v4092_v5, 1  ;;  %v7183_v8 = vmul.f32 %v6990_v61, %v7153_v26  ;;  %v4430_v62 = vrot.slane %v4334_v45, 2  ;;  %v4431_v14 = vrot.slane %v7175_v51, 2 }
 0x2ab   : > { %2860 = vst.msk [vmem:[#allocation4 + $0x99] sm:$0xff] %vm776_vm2, %v1778_v29  ;;  %2880 = vst.msk [vmem:[#allocation4 + $0x189] sm:$0xff] %vm776_vm2, %v1798_v31  ;;  %v1777_v50 = vadd.f32 %v1658_v41, %v7031_v22  ;;  %v1797_v9 = vadd.f32 %v1758_v34, %v7101_v43  ;;  %v3634_v49 = vsel %vm2193_vm7, %v3631_v10, %v3633_v3  ;;  %v7246_v34 = vld [vmem:[#allocation4 + $0x48] sm:$0xff] }
 0x2ac   : > { %v4054_v46 = vadd.f32 %v4022_v2, %v3986_v17  ;;  %v5546_v54 = vpop.f32.mrf.mxu0  ;;  %v5580_v52 = vpop.f32.mrf.mxu1  ;;  %v3878_v11 = vsel %vm2270_vm8, %v3875_v12, %v3877_v35  ;;  %v4188_v25 = vsel %vm2193_vm7, %v4186_v21, %v4187_v36  ;;  %v7195_v57 = vsel %vm2193_vm7, %v4187_v36, %v4189_v27 }
 0x2ad   : > { %v3467_v4 = vmul.f32 %v6975_v58, %v7105_v60  ;;  %2859 = vst.msk [vmem:[#allocation4 + $0x91] sm:$0xff] %vm776_vm2, %v1777_v50  ;;  %2879 = vst.msk [vmem:[#allocation4 + $0x181] sm:$0xff] %vm776_vm2, %v1797_v9  ;;  %v1780_v22 = vadd.f32 %v5546_v54, %v7035_v30  ;;  %v4432_v10 = vsel %vm2270_vm8, %v4430_v62, %v4431_v14  ;;  %v4433_v12 = vrot.slane %v7183_v8, 2  ;;  %v7261_v50 = vld [vmem:[#allocation4 + $0x50] sm:$0xff] }
 0x2ae   : > { %2091 = vst.msk [vmem:[%s7204_s28 + $0x8] sm:$0xff] %vm776_vm2, %v5580_v52  ;;  %v4298_v43 = vadd.f32 %v4188_v25, %v4054_v46  ;;  %v1668_v3 = vpop.f32.mrf.mxu0  ;;  %v2081_v20 = vpop.f32.mrf.mxu1  ;;  %v4023_v30 = vmul.f32 %v6984_v0, %v7143_v63  ;;  %v2981_v35 = vmul.f32 %v6959_v6, %v7103_v59  ;;  %v7219_v2 = vmul.f32 %v6959_v6, %v7105_v60 }
 0x2af   : > { %v3499_v53 = vadd.f32 %v3467_v4, %v7113_v13  ;;  %2862 = vst.msk [vmem:[#allocation4 + $0xb1] sm:$0xff] %vm776_vm2, %v1780_v22  ;;  %v1779_v48 = vadd.f32 %v1668_v3, %v7049_v38  ;;  %2090 = vst.msk [vmem:[%s7204_s28] sm:$0xff] %vm776_vm2, %v2081_v20  ;;  %v3225_v13 = vmul.f32 %v6972_v42, %v7103_v59  ;;  %s5805_s28 = smov [#allocation5]  }
 0x2b0   : > { %v4542_v33 = vadd.f32 %v4432_v10, %v4298_v43  ;;  %v7229_v44 = vmul.f32 %v6972_v42, %v7105_v60  ;;  %v5549_v28 = vpop.f32.mrf.mxu0  ;;  %v5587_v24 = vpop.f32.mrf.mxu1  ;;  %v2944_v5 = vmul.f32 %v6969_v39, %v7103_v59  ;;  %v3079_v21 = vrot.slane %v2981_v35, 1 }
 0x2b1   : > { %v3743_v55 = vadd.f32 %v3634_v49, %v3499_v53  ;;  %v3080_v45 = vrot.slane %v7219_v2, 1  ;;  %2861 = vst.msk [vmem:[#allocation4 + $0xa9] sm:$0xff] %vm776_vm2, %v1779_v48  ;;  %v1782_v38 = vadd.f32 %v5549_v28, %v7053_v32  ;;  %2787 = vst.msk [vmem:[%s7238_s27 + $0x8] sm:$0xff] %vm776_vm2, %v5587_v24  ;;  %v3323_v29 = vrot.slane %v3225_v13, 2 }
 0x2b2   : > { %5601 = vmatprep.mubr.msk.f32.mxu0 %vm776_vm2, %v4542_v33  ;;  %v3324_v31 = vrot.slane %v7229_v44, 2  ;;  %v3537_v59 = vmul.f32 %v6978_v15, %v7141_v37  ;;  %v1678_v36 = vpop.f32.mrf.mxu0  ;;  %v2747_v41 = vpop.f32.mrf.mxu1  ;;  %v7253_v27 = vmul.f32 %v6978_v15, %v7143_v63  ;;  %v3781_v8 = vmul.f32 %v6981_v23, %v7141_v37 }
 0x2b3   : > { %v3987_v17 = vadd.f32 %v3878_v11, %v3743_v55  ;;  %v3081_v32 = vsel %vm2193_vm7, %v3079_v21, %v3080_v45  ;;  %2864 = vst.msk [vmem:[#allocation4 + $0xc9] sm:$0xff] %vm776_vm2, %v1782_v38  ;;  %v1781_v62 = vadd.f32 %v1678_v36, %v7057_v1  ;;  %2786 = vst.msk [vmem:[%s7238_s27] sm:$0xff] %vm776_vm2, %v2747_v41  ;;  %v3082_v38 = vrot.slane %v7133_v40, 1 }
 0x2b4   : > { %v3188_v9 = vadd.f32 %v3081_v32, %v2944_v5  ;;  %v3468_v49 = vmul.f32 %v6975_v58, %v7141_v37  ;;  %v3635_v46 = vrot.slane %v3537_v59, 1  ;;  %v5552_v52 = vpop.f32.mrf.mxu0  ;;  %v5590_v11 = vpop.f32.mrf.mxu1  ;;  %v3325_v25 = vsel %vm2270_vm8, %v3323_v29, %v3324_v31 }
 0x2b5   : > { %v4055_v54 = vadd.f32 %v4023_v30, %v3987_v17  ;;  %v3636_v4 = vrot.slane %v7253_v27, 1  ;;  %v3782_v1 = vmul.f32 %v6981_v23, %v7143_v63  ;;  %2863 = vst.msk [vmem:[#allocation4 + $0xc1] sm:$0xff] %vm776_vm2, %v1781_v62  ;;  %v1784_v22 = vadd.f32 %v5552_v52, %v7061_v56  ;;  %2789 = vst.msk [vmem:[%s7238_s27 + $0x18] sm:$0xff] %vm776_vm2, %v5590_v11  ;;  %v7298_v17 = vld [vmem:[#allocation4 + $0x58] sm:$0x3] }
 0x2b6   : > { %v3432_v43 = vadd.f32 %v3325_v25, %v3188_v9  ;;  %v3879_v10 = vrot.slane %v3781_v8, 2  ;;  %v4093_v3 = vmul.f32 %v6987_v47, %v7246_v34  ;;  %v4434_v20 = vsel %vm2270_vm8, %v4431_v14, %v4433_v12  ;;  %v1688_v30 = vpop.f32.mrf.mxu0  ;;  %v2757_v35 = vpop.f32.mrf.mxu1 }
 0x2b7   : > { %v4299_v53 = vadd.f32 %v7195_v57, %v4055_v54  ;;  %v3880_v48 = vrot.slane %v3782_v1, 2  ;;  %v4094_v33 = vmul.f32 %v6987_v47, %v7261_v50  ;;  %2866 = vst.msk [vmem:[#allocation4 + $0xe1] sm:$0xff] %vm776_vm2, %v1784_v22  ;;  %v1783_v56 = vadd.f32 %v1688_v30, %v7069_v16  ;;  %2788 = vst.msk [vmem:[%s7238_s27 + $0x10] sm:$0xff] %vm776_vm2, %v2757_v35 }
 0x2b8   : > { %v3500_v13 = vadd.f32 %v3468_v49, %v3432_v43  ;;  %v3637_v28 = vsel %vm2193_vm7, %v3635_v46, %v3636_v4  ;;  %v4337_v51 = vmul.f32 %v6990_v61, %v7246_v34  ;;  %v4191_v57 = vrot.slane %v4093_v3, 1  ;;  %v5555_v55 = vpop.f32.mrf.mxu0 }
 0x2b9   : > { %v4543_v14 = vadd.f32 %v4434_v20, %v4299_v53  ;;  %v4192_v12 = vrot.slane %v4094_v33, 1  ;;  %v4338_v24 = vmul.f32 %v6990_v61, %v7261_v50  ;;  %2865 = vst.msk [vmem:[#allocation4 + $0xd9] sm:$0xff] %vm776_vm2, %v1783_v56  ;;  %v3881_v16 = vsel %vm2270_vm8, %v3879_v10, %v3880_v48 }
 0x2ba   : > { %v3744_v5 = vadd.f32 %v3637_v28, %v3500_v13  ;;  %v4024_v21 = vmul.f32 %v6984_v0, %v7246_v34  ;;  %v4435_v29 = vrot.slane %v4337_v51, 2  ;;  %v2945_v36 = vmul.f32 %v6969_v39, %v7105_v60  ;;  %v1698_v62 = vpop.f32.mrf.mxu0 }
 0x2bb   : > { %5602 = vmatmul.mubr.msk.f32.vlgmr.msra.gmra.mxu0 %vm776_vm2, %v4543_v14  ;;  %v4436_v59 = vrot.slane %v4338_v24, 2  ;;  %v3326_v41 = vrot.slane %v7148_v7, 2  ;;  %v3083_v27 = vsel %vm2193_vm7, %v3080_v45, %v3082_v38  ;;  %v3539_v8 = vmul.f32 %v6978_v15, %v7153_v26  ;;  %v7348_v24 = vld [vmem:[#allocation4 + $0x60] sm:$0xff] }
 0x2bc   : > { %v3988_v32 = vadd.f32 %v3881_v16, %v3744_v5  ;;  %v3783_v40 = vmul.f32 %v6981_v23, %v7153_v26  ;;  %v4193_v9 = vsel %vm2193_vm7, %v4191_v57, %v4192_v12  ;;  %v3189_v49 = vadd.f32 %v3083_v27, %v2945_v36 }
 0x2bd   : > { %v3327_v60 = vsel %vm2270_vm8, %v3324_v31, %v3326_v41  ;;  %v3469_v7 = vmul.f32 %v6975_v58, %v7143_v63  ;;  %v3638_v46 = vrot.slane %v3539_v8, 1  ;;  %v4095_v54 = vmul.f32 %v6987_v47, %v7298_v17 }
 0x2be   : > { %v4056_v2 = vadd.f32 %v4024_v21, %v3988_v32  ;;  %v3882_v45 = vrot.slane %v3783_v40, 2  ;;  %v3433_v52 = vadd.f32 %v3327_v60, %v3189_v49  ;;  %v4339_v11 = vmul.f32 %v6990_v61, %v7298_v17 }
 0x2bf   : > { %v1786_v25 = vadd.f32 %v5555_v55, %v7073_v18  ;;  %v1785_v1 = vadd.f32 %v1698_v62, %v7084_v19  ;;  %v4437_v31 = vsel %vm2270_vm8, %v4435_v29, %v4436_v59  ;;  %v3639_v22 = vsel %vm2193_vm7, %v3636_v4, %v3638_v46 }
 0x2c0   : > { %v4300_v44 = vadd.f32 %v4193_v9, %v4056_v2  ;;  %v4025_v43 = vmul.f32 %v6984_v0, %v7261_v50  ;;  %v3501_v10 = vadd.f32 %v3469_v7, %v3433_v52  ;;  %v3883_v3 = vsel %vm2270_vm8, %v3880_v48, %v3882_v45 }
 0x2c1   : > { %v4194_v20 = vrot.slane %v4095_v54, 1  ;;  %2868 = vst.msk [vmem:[#allocation4 + $0xf9] sm:$0xff] %vm776_vm2, %v1786_v25  ;;  %2867 = vst.msk [vmem:[#allocation4 + $0xf1] sm:$0xff] %vm776_vm2, %v1785_v1  ;;  %v2984_v18 = vmul.f32 %v6959_v6, %v7141_v37  ;;  %v4438_v53 = vrot.slane %v4339_v11, 2  ;;  %v7333_v30 = vmul.f32 %v6959_v6, %v7143_v63 }
 0x2c2   : > { %v4544_v19 = vadd.f32 %v4437_v31, %v4300_v44  ;;  %v3228_v4 = vmul.f32 %v6972_v42, %v7141_v37  ;;  %v3745_v35 = vadd.f32 %v3639_v22, %v3501_v10  ;;  %v2946_v48 = vmul.f32 %v6969_v39, %v7141_v37  ;;  %v7350_v37 = vld [vmem:[#allocation4 + $0x68] sm:$0xff] }
 0x2c3   : > { %v3084_v33 = vrot.slane %v2984_v18, 1  ;;  %v7341_v56 = vmul.f32 %v6972_v42, %v7143_v63  ;;  %v4195_v13 = vsel %vm2193_vm7, %v4192_v12, %v4194_v20  ;;  %v3085_v28 = vrot.slane %v7333_v30, 1  ;;  %v7388_v18 = vld [vmem:[#allocation4 + $0x70] sm:$0x3] }
 0x2c4   : > { %5604 = vmatprep.mubr.msk.f32.mxu0 %vm776_vm2, %v4544_v19  ;;  %v3328_v51 = vrot.slane %v3228_v4, 2  ;;  %v3540_v14 = vmul.f32 %v6978_v15, %v7246_v34  ;;  %v3989_v57 = vadd.f32 %v3883_v3, %v3745_v35  ;;  %v3541_v5 = vmul.f32 %v6978_v15, %v7261_v50 }
 0x2c5   : > { %v3329_v55 = vrot.slane %v7341_v56, 2  ;;  %v3784_v12 = vmul.f32 %v6981_v23, %v7246_v34  ;;  %v4439_v16 = vsel %vm2270_vm8, %v4436_v59, %v4438_v53  ;;  %v3086_v21 = vsel %vm2193_vm7, %v3084_v33, %v3085_v28  ;;  %v5593_v41 = vpop.f32.mrf.mxu1 }
 0x2c6   : > { %v3640_v38 = vrot.slane %v3540_v14, 1  ;;  %v3785_v29 = vmul.f32 %v6981_v23, %v7261_v50  ;;  %v4057_v36 = vadd.f32 %v4025_v43, %v3989_v57  ;;  %v3190_v32 = vadd.f32 %v3086_v21, %v2946_v48  ;;  %2791 = vst.msk [vmem:[%s7238_s27 + $0x28] sm:$0xff] %vm776_vm2, %v5593_v41 }
 0x2c7   : > { %v3330_v27 = vsel %vm2270_vm8, %v3328_v51, %v3329_v55  ;;  %v3641_v8 = vrot.slane %v3541_v5, 1  ;;  %v3884_v40 = vrot.slane %v3784_v12, 2  ;;  %v4096_v59 = vmul.f32 %v6987_v47, %v7348_v24  ;;  %v2767_v60 = vpop.f32.mrf.mxu1 }
 0x2c8   : > { %v3885_v62 = vrot.slane %v3785_v29, 2  ;;  %v4097_v9 = vmul.f32 %v6987_v47, %v7350_v37  ;;  %v4301_v49 = vadd.f32 %v4195_v13, %v4057_v36  ;;  %v3434_v7 = vadd.f32 %v3330_v27, %v3190_v32  ;;  %2790 = vst.msk [vmem:[%s7238_s27 + $0x20] sm:$0xff] %vm776_vm2, %v2767_v60 }
 0x2c9   : > { %v3470_v2 = vmul.f32 %v6975_v58, %v7246_v34  ;;  %v4340_v46 = vmul.f32 %v6990_v61, %v7348_v24  ;;  %v4026_v45 = vmul.f32 %v6984_v0, %v7348_v24  ;;  %v4196_v54 = vrot.slane %v4096_v59, 1 }
 0x2ca   : > { %v4197_v52 = vrot.slane %v4097_v9, 1  ;;  %v7378_v11 = vmul.f32 %v6990_v61, %v7350_v37  ;;  %v4545_v25 = vadd.f32 %v4439_v16, %v4301_v49  ;;  %v3642_v44 = vsel %vm2193_vm7, %v3640_v38, %v3641_v8 }
 0x2cb   : > { %v3502_v1 = vadd.f32 %v3470_v2, %v3434_v7  ;;  %v4440_v31 = vrot.slane %v4340_v46, 2  ;;  %v3886_v22 = vsel %vm2270_vm8, %v3884_v40, %v3885_v62  ;;  %v2986_v10 = vmul.f32 %v6959_v6, %v7153_v26 }
 0x2cc   : > { %v4441_v43 = vrot.slane %v7378_v11, 2  ;;  %v3230_v3 = vmul.f32 %v6972_v42, %v7153_v26  ;;  %5605 = vmatmul.mubr.msk.f32.gmra.mxu0 %vm776_vm2, %v4545_v25  ;;  %v2947_v19 = vmul.f32 %v6969_v39, %v7143_v63  ;;  %v3542_v53 = vmul.f32 %v6978_v15, %v7298_v17 }
 0x2cd   : > { %v3746_v20 = vadd.f32 %v3642_v44, %v3502_v1  ;;  %v3786_v30 = vmul.f32 %v6981_v23, %v7298_v17  ;;  %v4198_v4 = vsel %vm2193_vm7, %v4196_v54, %v4197_v52  ;;  %v3087_v48 = vrot.slane %v2986_v10, 1  ;;  %v7435_v1 = vld [vmem:[#allocation4 + $0x80] sm:$0xff] }
 0x2ce   : > { %v4442_v35 = vsel %vm2270_vm8, %v4440_v31, %v4441_v43  ;;  %v3471_v26 = vmul.f32 %v6975_v58, %v7261_v50  ;;  %v3331_v56 = vrot.slane %v3230_v3, 2  ;;  %v3643_v13 = vrot.slane %v3542_v53, 1 }
 0x2cf   : > { %v3990_v33 = vadd.f32 %v3886_v22, %v3746_v20  ;;  %v4027_v63 = vmul.f32 %v6984_v0, %v7350_v37  ;;  %v3088_v51 = vsel %vm2193_vm7, %v3085_v28, %v3087_v48  ;;  %v3887_v14 = vrot.slane %v3786_v30, 2 }
 0x2d0   : > { %v4098_v57 = vmul.f32 %v6987_v47, %v7388_v18  ;;  %v4342_v5 = vmul.f32 %v6990_v61, %v7388_v18  ;;  %v3191_v16 = vadd.f32 %v3088_v51, %v2947_v19  ;;  %v3332_v21 = vsel %vm2270_vm8, %v3329_v55, %v3331_v56 }
 0x2d1   : > { %v4058_v12 = vadd.f32 %v4026_v45, %v3990_v33  ;;  %v2948_v38 = vmul.f32 %v6969_v39, %v7246_v34  ;;  %v3644_v29 = vsel %vm2193_vm7, %v3641_v8, %v3643_v13  ;;  %v3888_v36 = vsel %vm2270_vm8, %v3885_v62, %v3887_v14  ;;  %v7427_v45 = vld [vmem:[#allocation4 + $0x78] sm:$0xff] }
 0x2d2   : > { %v2987_v28 = vmul.f32 %v6959_v6, %v7246_v34  ;;  %v7416_v41 = vmul.f32 %v6959_v6, %v7261_v50  ;;  %v3435_v27 = vadd.f32 %v3332_v21, %v3191_v16  ;;  %v3231_v40 = vmul.f32 %v6972_v42, %v7246_v34 }
 0x2d3   : > { %v4302_v32 = vadd.f32 %v4198_v4, %v4058_v12  ;;  %v7422_v55 = vmul.f32 %v6972_v42, %v7261_v50  ;;  %v4199_v59 = vrot.slane %v4098_v57, 1  ;;  %v4443_v8 = vrot.slane %v4342_v5, 2 }
 0x2d4   : > { %v3089_v9 = vrot.slane %v2987_v28, 1  ;;  %v3090_v62 = vrot.slane %v7416_v41, 1  ;;  %v3503_v60 = vadd.f32 %v3471_v26, %v3435_v27  ;;  %v3333_v7 = vrot.slane %v3231_v40, 2  ;;  %v7464_v41 = vld [vmem:[#allocation4 + $0x88] sm:$0x3] }
 0x2d5   : > { %v4546_v49 = vadd.f32 %v4442_v35, %v4302_v32  ;;  %v3334_v2 = vrot.slane %v7422_v55, 2  ;;  %v4200_v46 = vsel %vm2193_vm7, %v4197_v52, %v4199_v59  ;;  %v3543_v54 = vmul.f32 %v6978_v15, %v7348_v24 }
 0x2d6   : > { %v3091_v34 = vsel %vm2193_vm7, %v3089_v9, %v3090_v62  ;;  %v3544_v11 = vmul.f32 %v6978_v15, %v7350_v37  ;;  %v3747_v25 = vadd.f32 %v3644_v29, %v3503_v60  ;;  %v3472_v31 = vmul.f32 %v6975_v58, %v7348_v24 }
 0x2d7   : > { %5607 = vmatprep.mubr.msk.f32.mxu0 %vm776_vm2, %v4546_v49  ;;  %v3192_v44 = vadd.f32 %v3091_v34, %v2948_v38  ;;  %v3787_v52 = vmul.f32 %v6981_v23, %v7348_v24  ;;  %v3335_v22 = vsel %vm2270_vm8, %v3333_v7, %v3334_v2  ;;  %v3645_v10 = vrot.slane %v3543_v54, 1 }
 0x2d8   : > { %v3646_v3 = vrot.slane %v3544_v11, 1  ;;  %v3788_v20 = vmul.f32 %v6981_v23, %v7350_v37  ;;  %v3991_v19 = vadd.f32 %v3888_v36, %v3747_v25  ;;  %v4099_v4 = vmul.f32 %v6987_v47, %v7427_v45 }
 0x2d9   : > { %v3436_v53 = vadd.f32 %v3335_v22, %v3192_v44  ;;  %v3889_v30 = vrot.slane %v3787_v52, 2  ;;  %v4444_v35 = vsel %vm2270_vm8, %v4441_v43, %v4443_v8  ;;  %v4100_v26 = vmul.f32 %v6987_v47, %v7435_v1 }
 0x2da   : > { %v3890_v48 = vrot.slane %v3788_v20, 2  ;;  %v4343_v33 = vmul.f32 %v6990_v61, %v7427_v45  ;;  %v4059_v56 = vadd.f32 %v4027_v63, %v3991_v19  ;;  %v4201_v51 = vrot.slane %v4099_v4, 1  ;;  %v5596_v57 = vpop.f32.mrf.mxu1 }
 0x2db   : > { %v3504_v13 = vadd.f32 %v3472_v31, %v3436_v53  ;;  %v7453_v14 = vmul.f32 %v6990_v61, %v7435_v1  ;;  %v3647_v5 = vsel %vm2193_vm7, %v3645_v10, %v3646_v3  ;;  %v4028_v12 = vmul.f32 %v6984_v0, %v7427_v45  ;;  %2793 = vst.msk [vmem:[%s7238_s27 + $0x38] sm:$0xff] %vm776_vm2, %v5596_v57 }
 0x2dc   : > { %v3891_v43 = vsel %vm2270_vm8, %v3889_v30, %v3890_v48  ;;  %v4202_v16 = vrot.slane %v4100_v26, 1  ;;  %v4303_v21 = vadd.f32 %v4200_v46, %v4059_v56  ;;  %v4445_v38 = vrot.slane %v4343_v33, 2  ;;  %v2777_v36 = vpop.f32.mrf.mxu1 }
 0x2dd   : > { %v3748_v63 = vadd.f32 %v3647_v5, %v3504_v13  ;;  %v2989_v29 = vmul.f32 %v6959_v6, %v7298_v17  ;;  %v4446_v28 = vrot.slane %v7453_v14, 2  ;;  %v2949_v32 = vmul.f32 %v6969_v39, %v7261_v50  ;;  %2792 = vst.msk [vmem:[%s7238_s27 + $0x30] sm:$0xff] %vm776_vm2, %v2777_v36  ;;  %s5716_s27 = sshll.u32 %s5805_s28, 4  ;;  %s5717_s27 = int_to_ptr.vmem [resolvable:$false] %s5716_s27 }
 0x2de   : > { %v3233_v27 = vmul.f32 %v6972_v42, %v7298_v17  ;;  %v3545_v40 = vmul.f32 %v6978_v15, %v7388_v18  ;;  %v4547_v55 = vadd.f32 %v4444_v35, %v4303_v21  ;;  %v4203_v8 = vsel %vm2193_vm7, %v4201_v51, %v4202_v16  ;;  %s5718_s5 = scalar_lea.vmem %s5717_s27, 512  ;;  %p5719_p0 = scmp.lt.s32.totalorder %s8436_s26, %s5717_s27 }
 0x2df   : > { %v3992_v59 = vadd.f32 %v3891_v43, %v3748_v63  ;;  %v3092_v9 = vrot.slane %v2989_v29, 1  ;;  %v3473_v60 = vmul.f32 %v6975_v58, %v7350_v37  ;;  %v3789_v50 = vmul.f32 %v6981_v23, %v7388_v18  ;;  %v7515_v63 = vld [vmem:[#allocation4 + $0x98] sm:$0xff]  ;;  %p5720_p1 = scmp.lt.s32.totalorder %s5718_s5, %s5712_s4 }
 0x2e0   : > { %v3336_v49 = vrot.slane %v3233_v27, 2  ;;  %v3648_v7 = vrot.slane %v3545_v40, 1  ;;  %5608 = vmatmul.mubr.msk.f32.gmra.mxu0 %vm776_vm2, %v4547_v55  ;;  %v4101_v34 = vmul.f32 %v6987_v47, %v7464_v41  ;;  %v4345_v54 = vmul.f32 %v6990_v61, %v7464_v41 }
 0x2e1   : > { %v4060_v17 = vadd.f32 %v4028_v12, %v3992_v59  ;;  %v3093_v46 = vsel %vm2193_vm7, %v3090_v62, %v3092_v9  ;;  %v4447_v11 = vsel %vm2270_vm8, %v4445_v38, %v4446_v28  ;;  %v4029_v31 = vmul.f32 %v6984_v0, %v7435_v1  ;;  %p5721_p2 = por %p5720_p1, %p5719_p0 }
 0x2e2   : > { %v3193_v25 = vadd.f32 %v3093_v46, %v2949_v32  ;;  %v3337_v44 = vsel %vm2270_vm8, %v3334_v2, %v3336_v49  ;;  %v3649_v22 = vsel %vm2193_vm7, %v3646_v3, %v3648_v7  ;;  %v3892_v10 = vrot.slane %v3789_v50, 2 }
 0x2e3   : > { %v4304_v52 = vadd.f32 %v4203_v8, %v4060_v17  ;;  %v4204_v20 = vrot.slane %v4101_v34, 1  ;;  %v4448_v19 = vrot.slane %v4345_v54, 2  ;;  %v2990_v53 = vmul.f32 %v6959_v6, %v7348_v24  ;;  %p5722_p3 = pnand %p5721_p2, %p5715_p13 }
 0x2e4   : > { %v3437_v62 = vadd.f32 %v3337_v44, %v3193_v25  ;;  %v7494_v30 = vmul.f32 %v6959_v6, %v7350_v37  ;;  %v3893_v2 = vsel %vm2270_vm8, %v3890_v48, %v3892_v10  ;;  %v2950_v35 = vmul.f32 %v6969_v39, %v7348_v24  ;;  %v7535_v10 = vld [vmem:[#allocation4 + $0xa0] sm:$0x3] }
 0x2e5   : > { %v4548_v4 = vadd.f32 %v4447_v11, %v4304_v52  ;;  %v3234_v3 = vmul.f32 %v6972_v42, %v7348_v24  ;;  %v3094_v33 = vrot.slane %v2990_v53, 1  ;;  %v3235_v13 = vmul.f32 %v6972_v42, %v7350_v37  ;;  %v7510_v24 = vld [vmem:[#allocation4 + $0x90] sm:$0xff] }
 0x2e6   : > { %v3505_v26 = vadd.f32 %v3473_v60, %v3437_v62  ;;  %v3095_v56 = vrot.slane %v7494_v30, 1  ;;  %v4205_v51 = vsel %vm2193_vm7, %v4202_v16, %v4204_v20  ;;  %v3546_v48 = vmul.f32 %v6978_v15, %v7427_v45 }
 0x2e7   : > { %5610 = vmatprep.mubr.msk.f32.mxu0 %vm776_vm2, %v4548_v4  ;;  %v3338_v14 = vrot.slane %v3234_v3, 2  ;;  %v3547_v57 = vmul.f32 %v6978_v15, %v7435_v1  ;;  %v3339_v12 = vrot.slane %v3235_v13, 2  ;;  %v3790_v21 = vmul.f32 %v6981_v23, %v7427_v45 }
 0x2e8   : > { %v3749_v5 = vadd.f32 %v3649_v22, %v3505_v26  ;;  %v3096_v43 = vsel %vm2193_vm7, %v3094_v33, %v3095_v56  ;;  %v3650_v16 = vrot.slane %v3546_v48, 1  ;;  %v3791_v36 = vmul.f32 %v6981_v23, %v7435_v1 }
 0x2e9   : > { %v3194_v38 = vadd.f32 %v3096_v43, %v2950_v35  ;;  %v3651_v29 = vrot.slane %v3547_v57, 1  ;;  %v4449_v27 = vsel %vm2270_vm8, %v4446_v28, %v4448_v19  ;;  %v3340_v40 = vsel %vm2270_vm8, %v3338_v14, %v3339_v12 }
 0x2ea   : > { %v3993_v32 = vadd.f32 %v3893_v2, %v3749_v5  ;;  %v3894_v55 = vrot.slane %v3790_v21, 2  ;;  %v3474_v8 = vmul.f32 %v6975_v58, %v7427_v45  ;;  %v3895_v9 = vrot.slane %v3791_v36, 2 }
 0x2eb   : > { %v3438_v59 = vadd.f32 %v3340_v40, %v3194_v38  ;;  %v4102_v49 = vmul.f32 %v6987_v47, %v7510_v24  ;;  %v4103_v7 = vmul.f32 %v6987_v47, %v7515_v63  ;;  %v4346_v50 = vmul.f32 %v6990_v61, %v7510_v24 }
 0x2ec   : > { %v4061_v60 = vadd.f32 %v4029_v31, %v3993_v32  ;;  %v4347_v28 = vmul.f32 %v6990_v61, %v7515_v63  ;;  %v3652_v46 = vsel %vm2193_vm7, %v3650_v16, %v3651_v29  ;;  %v4030_v34 = vmul.f32 %v6984_v0, %v7510_v24 }
 0x2ed   : > { %v3506_v17 = vadd.f32 %v3474_v8, %v3438_v59  ;;  %v4206_v54 = vrot.slane %v4102_v49, 1  ;;  %v3896_v25 = vsel %vm2270_vm8, %v3894_v55, %v3895_v9  ;;  %v4207_v44 = vrot.slane %v4103_v7, 1 }
 0x2ee   : > { %v4305_v11 = vadd.f32 %v4205_v51, %v4061_v60  ;;  %v4450_v31 = vrot.slane %v4346_v50, 2  ;;  %v4451_v22 = vrot.slane %v4347_v28, 2  ;;  %v2992_v20 = vmul.f32 %v6959_v6, %v7388_v18  ;;  %v7576_v28 = vld [vmem:[#allocation4 + $0xa8] sm:$0xff] }
 0x2ef   : > { %v3750_v52 = vadd.f32 %v3652_v46, %v3506_v17  ;;  %v3236_v62 = vmul.f32 %v6972_v42, %v7388_v18  ;;  %v2951_v53 = vmul.f32 %v6969_v39, %v7350_v37  ;;  %v3475_v30 = vmul.f32 %v6975_v58, %v7435_v1 }
 0x2f0   : > { %v4549_v19 = vadd.f32 %v4449_v27, %v4305_v11  ;;  %v3548_v4 = vmul.f32 %v6978_v15, %v7464_v41  ;;  %v4208_v35 = vsel %vm2193_vm7, %v4206_v54, %v4207_v44  ;;  %v3097_v3 = vrot.slane %v2992_v20, 1 }
 0x2f1   : > { %v3994_v2 = vadd.f32 %v3896_v25, %v3750_v52  ;;  %v3792_v26 = vmul.f32 %v6981_v23, %v7464_v41  ;;  %v3341_v18 = vrot.slane %v3236_v62, 2  ;;  %v4104_v37 = vmul.f32 %v6987_v47, %v7535_v10  ;;  %v7583_v25 = vld [vmem:[#allocation4 + $0xb0] sm:$0xff] }
 0x2f2   : > { %5611 = vmatmul.mubr.msk.f32.gmra.mxu0 %vm776_vm2, %v4549_v19  ;;  %v3653_v33 = vrot.slane %v3548_v4, 1  ;;  %v4348_v13 = vmul.f32 %v6990_v61, %v7535_v10  ;;  %v4452_v14 = vsel %vm2270_vm8, %v4450_v31, %v4451_v22  ;;  %v3098_v48 = vsel %vm2193_vm7, %v3095_v56, %v3097_v3 }
 0x2f3   : > { %v4062_v51 = vadd.f32 %v4030_v34, %v3994_v2  ;;  %v4031_v57 = vmul.f32 %v6984_v0, %v7515_v63  ;;  %v3195_v5 = vadd.f32 %v3098_v48, %v2951_v53  ;;  %v3342_v43 = vsel %vm2270_vm8, %v3339_v12, %v3341_v18 }
 0x2f4   : > { %v3654_v21 = vsel %vm2193_vm7, %v3651_v29, %v3653_v33  ;;  %v3897_v38 = vrot.slane %v3792_v26, 2  ;;  %v4209_v36 = vrot.slane %v4104_v37, 1  ;;  %v4453_v32 = vrot.slane %v4348_v13, 2 }
 0x2f5   : > { %v4306_v16 = vadd.f32 %v4208_v35, %v4062_v51  ;;  %v2993_v27 = vmul.f32 %v6959_v6, %v7427_v45  ;;  %v3439_v40 = vadd.f32 %v3342_v43, %v3195_v5  ;;  %v2952_v56 = vmul.f32 %v6969_v39, %v7427_v45 }
 0x2f6   : > { %v3898_v55 = vsel %vm2270_vm8, %v3895_v9, %v3897_v38  ;;  %v2994_v59 = vmul.f32 %v6959_v6, %v7435_v1  ;;  %v3237_v29 = vmul.f32 %v6972_v42, %v7427_v45  ;;  %v3238_v49 = vmul.f32 %v6972_v42, %v7435_v1 }
 0x2f7   : > { %v4550_v8 = vadd.f32 %v4452_v14, %v4306_v16  ;;  %v3099_v12 = vrot.slane %v2993_v27, 1  ;;  %v3507_v60 = vadd.f32 %v3475_v30, %v3439_v40  ;;  %v4210_v7 = vsel %vm2193_vm7, %v4207_v44, %v4209_v36 }
 0x2f8   : > { %v3100_v50 = vrot.slane %v2994_v59, 1  ;;  %v3549_v9 = vmul.f32 %v6978_v15, %v7510_v24  ;;  %v3343_v17 = vrot.slane %v3237_v29, 2  ;;  %v3344_v46 = vrot.slane %v3238_v49, 2 }
 0x2f9   : > { %5613 = vmatprep.mubr.msk.f32.mxu0 %vm776_vm2, %v4550_v8  ;;  %v3550_v34 = vmul.f32 %v6978_v15, %v7515_v63  ;;  %v3793_v45 = vmul.f32 %v6981_v23, %v7510_v24  ;;  %v3751_v54 = vadd.f32 %v3654_v21, %v3507_v60  ;;  %v4454_v11 = vsel %vm2270_vm8, %v4451_v22, %v4453_v32  ;;  %v7610_v32 = vld [vmem:[#allocation4 + $0xb8] sm:$0x3] }
 0x2fa   : > { %v3101_v44 = vsel %vm2193_vm7, %v3099_v12, %v3100_v50  ;;  %v3794_v31 = vmul.f32 %v6981_v23, %v7515_v63  ;;  %v3476_v20 = vmul.f32 %v6975_v58, %v7510_v24  ;;  %v3655_v62 = vrot.slane %v3549_v9, 1 }
 0x2fb   : > { %v3196_v52 = vadd.f32 %v3101_v44, %v2952_v56  ;;  %v3656_v19 = vrot.slane %v3550_v34, 1  ;;  %v3995_v53 = vadd.f32 %v3898_v55, %v3751_v54  ;;  %v3345_v30 = vsel %vm2270_vm8, %v3343_v17, %v3344_v46 }
 0x2fc   : > { %v3899_v4 = vrot.slane %v3793_v45, 2  ;;  %v4105_v22 = vmul.f32 %v6987_v47, %v7576_v28  ;;  %v3900_v35 = vrot.slane %v3794_v31, 2  ;;  %v4106_v3 = vmul.f32 %v6987_v47, %v7583_v25 }
 0x2fd   : > { %v3440_v2 = vadd.f32 %v3345_v30, %v3196_v52  ;;  %v4349_v26 = vmul.f32 %v6990_v61, %v7576_v28  ;;  %v4063_v18 = vadd.f32 %v4031_v57, %v3995_v53  ;;  %v4032_v33 = vmul.f32 %v6984_v0, %v7576_v28 }
 0x2fe   : > { %v4211_v37 = vrot.slane %v4105_v22, 1  ;;  %v7601_v13 = vmul.f32 %v6990_v61, %v7583_v25  ;;  %v3657_v14 = vsel %vm2193_vm7, %v3655_v62, %v3656_v19  ;;  %v4212_v48 = vrot.slane %v4106_v3, 1 }
 0x2ff   : > { %v3508_v51 = vadd.f32 %v3476_v20, %v3440_v2  ;;  %v4455_v5 = vrot.slane %v4349_v26, 2  ;;  %v4307_v43 = vadd.f32 %v4210_v7, %v4063_v18  ;;  %v2995_v38 = vmul.f32 %v6959_v6, %v7464_v41 }
 0x300   : > { %v4456_v21 = vrot.slane %v7601_v13, 2  ;;  %v3239_v57 = vmul.f32 %v6972_v42, %v7464_v41  ;;  %v3901_v36 = vsel %vm2270_vm8, %v3899_v4, %v3900_v35  ;;  %v2953_v27 = vmul.f32 %v6969_v39, %v7435_v1 }
 0x301   : > { %v3752_v16 = vadd.f32 %v3657_v14, %v3508_v51  ;;  %v3551_v40 = vmul.f32 %v6978_v15, %v7535_v10  ;;  %v4551_v55 = vadd.f32 %v4454_v11, %v4307_v43  ;;  %v4213_v56 = vsel %vm2193_vm7, %v4211_v37, %v4212_v48  ;;  %v7657_v43 = vld [vmem:[#allocation4 + $0xc8] sm:$0xff] }
 0x302   : > { %v3102_v59 = vrot.slane %v2995_v38, 1  ;;  %v3477_v8 = vmul.f32 %v6975_v58, %v7515_v63  ;;  %v4457_v41 = vsel %vm2270_vm8, %v4455_v5, %v4456_v21  ;;  %v3346_v29 = vrot.slane %v3239_v57, 2 }
 0x303   : > { %v3996_v12 = vadd.f32 %v3901_v36, %v3752_v16  ;;  %v3795_v49 = vmul.f32 %v6981_v23, %v7535_v10  ;;  %5614 = vmatmul.mubr.msk.f32.gmra.mxu0 %vm776_vm2, %v4551_v55  ;;  %v3658_v60 = vrot.slane %v3551_v40, 1  ;;  %v4107_v7 = vmul.f32 %v6987_v47, %v7610_v32 }
 0x304   : > { %v3103_v1 = vsel %vm2193_vm7, %v3100_v50, %v3102_v59  ;;  %v4351_v9 = vmul.f32 %v6990_v61, %v7610_v32  ;;  %v3347_v45 = vsel %vm2270_vm8, %v3344_v46, %v3346_v29  ;;  %v4033_v54 = vmul.f32 %v6984_v0, %v7583_v25 }
 0x305   : > { %v4064_v17 = vadd.f32 %v4032_v33, %v3996_v12  ;;  %v3197_v34 = vadd.f32 %v3103_v1, %v2953_v27  ;;  %v3659_v11 = vsel %vm2193_vm7, %v3656_v19, %v3658_v60  ;;  %v3902_v44 = vrot.slane %v3795_v49, 2 }
 0x306   : > { %v4214_v31 = vrot.slane %v4107_v7, 1  ;;  %v2996_v50 = vmul.f32 %v6959_v6, %v7510_v24  ;;  %v4458_v62 = vrot.slane %v4351_v9, 2  ;;  %v7636_v53 = vmul.f32 %v6959_v6, %v7515_v63 }
 0x307   : > { %v4308_v52 = vadd.f32 %v4213_v56, %v4064_v17  ;;  %v3441_v20 = vadd.f32 %v3347_v45, %v3197_v34  ;;  %v3903_v30 = vsel %vm2270_vm8, %v3900_v35, %v3902_v44  ;;  %v2954_v46 = vmul.f32 %v6969_v39, %v7510_v24 }
 0x308   : > { %v3104_v4 = vrot.slane %v2996_v50, 1  ;;  %v3240_v19 = vmul.f32 %v6972_v42, %v7510_v24  ;;  %v3105_v3 = vrot.slane %v7636_v53, 1  ;;  %v3241_v26 = vmul.f32 %v6972_v42, %v7515_v63  ;;  %v7652_v24 = vld [vmem:[#allocation4 + $0xc0] sm:$0xff] }
 0x309   : > { %v4552_v22 = vadd.f32 %v4457_v41, %v4308_v52  ;;  %v3509_v2 = vadd.f32 %v3477_v8, %v3441_v20  ;;  %v4215_v18 = vsel %vm2193_vm7, %v4212_v48, %v4214_v31  ;;  %v3552_v35 = vmul.f32 %v6978_v15, %v7576_v28  ;;  %v7677_v31 = vld [vmem:[#allocation4 + $0xd0] sm:$0x3] }
 0x30a   : > { %v3348_v33 = vrot.slane %v3240_v19, 2  ;;  %v3553_v37 = vmul.f32 %v6978_v15, %v7583_v25  ;;  %v3106_v51 = vsel %vm2193_vm7, %v3104_v4, %v3105_v3  ;;  %v3349_v14 = vrot.slane %v3241_v26, 2 }
 0x30b   : > { %5616 = vmatprep.mubr.msk.f32.mxu0 %vm776_vm2, %v4552_v22  ;;  %v3753_v13 = vadd.f32 %v3659_v11, %v3509_v2  ;;  %v3796_v5 = vmul.f32 %v6981_v23, %v7576_v28  ;;  %v3198_v48 = vadd.f32 %v3106_v51, %v2954_v46  ;;  %v3660_v38 = vrot.slane %v3552_v35, 1 }
 0x30c   : > { %v3661_v57 = vrot.slane %v3553_v37, 1  ;;  %v3797_v16 = vmul.f32 %v6981_v23, %v7583_v25  ;;  %v4459_v27 = vsel %vm2270_vm8, %v4456_v21, %v4458_v62  ;;  %v3350_v40 = vsel %vm2270_vm8, %v3348_v33, %v3349_v14 }
 0x30d   : > { %v3997_v36 = vadd.f32 %v3903_v30, %v3753_v13  ;;  %v3904_v55 = vrot.slane %v3796_v5, 2  ;;  %v3442_v56 = vadd.f32 %v3350_v40, %v3198_v48  ;;  %v3478_v59 = vmul.f32 %v6975_v58, %v7576_v28 }
 0x30e   : > { %v3905_v8 = vrot.slane %v3797_v16, 2  ;;  %v4108_v12 = vmul.f32 %v6987_v47, %v7652_v24  ;;  %v4109_v29 = vmul.f32 %v6987_v47, %v7657_v43  ;;  %v4352_v49 = vmul.f32 %v6990_v61, %v7652_v24 }
 0x30f   : > { %v4065_v41 = vadd.f32 %v4033_v54, %v3997_v36  ;;  %v4353_v21 = vmul.f32 %v6990_v61, %v7657_v43  ;;  %v3510_v1 = vadd.f32 %v3478_v59, %v3442_v56  ;;  %v3662_v60 = vsel %vm2193_vm7, %v3660_v38, %v3661_v57 }
 0x310   : > { %v4034_v7 = vmul.f32 %v6984_v0, %v7652_v24  ;;  %v4216_v9 = vrot.slane %v4108_v12, 1  ;;  %v3906_v34 = vsel %vm2270_vm8, %v3904_v55, %v3905_v8  ;;  %v4217_v45 = vrot.slane %v4109_v29, 1 }
 0x311   : > { %v4309_v17 = vadd.f32 %v4215_v18, %v4065_v41  ;;  %v4460_v54 = vrot.slane %v4352_v49, 2  ;;  %v3754_v11 = vadd.f32 %v3662_v60, %v3510_v1  ;;  %v4461_v44 = vrot.slane %v4353_v21, 2  ;;  %v7718_v21 = vld [vmem:[#allocation4 + $0xd8] sm:$0xff] }
 0x312   : > { %v2998_v50 = vmul.f32 %v6959_v6, %v7535_v10  ;;  %v3242_v52 = vmul.f32 %v6972_v42, %v7535_v10  ;;  %v2955_v62 = vmul.f32 %v6969_v39, %v7515_v63  ;;  %v3479_v53 = vmul.f32 %v6975_v58, %v7583_v25 }
 0x313   : > { %v4553_v20 = vadd.f32 %v4459_v27, %v4309_v17  ;;  %v3554_v30 = vmul.f32 %v6978_v15, %v7610_v32  ;;  %v3998_v46 = vadd.f32 %v3906_v34, %v3754_v11  ;;  %v4218_v4 = vsel %vm2193_vm7, %v4216_v9, %v4217_v45  ;;  %v7725_v34 = vld [vmem:[#allocation4 + $0xe0] sm:$0xff] }
 0x314   : > { %v3107_v19 = vrot.slane %v2998_v50, 1  ;;  %v3798_v22 = vmul.f32 %v6981_v23, %v7610_v32  ;;  %v3351_v10 = vrot.slane %v3242_v52, 2  ;;  %v4110_v63 = vmul.f32 %v6987_v47, %v7677_v31 }
 0x315   : > { %5617 = vmatmul.mubr.msk.f32.gmra.mxu0 %vm776_vm2, %v4553_v20  ;;  %v3663_v2 = vrot.slane %v3554_v30, 1  ;;  %v4354_v26 = vmul.f32 %v6990_v61, %v7677_v31  ;;  %v4066_v18 = vadd.f32 %v4034_v7, %v3998_v46  ;;  %v4462_v33 = vsel %vm2270_vm8, %v4460_v54, %v4461_v44 }
 0x316   : > { %v3108_v35 = vsel %vm2193_vm7, %v3105_v3, %v3107_v19  ;;  %v4035_v37 = vmul.f32 %v6984_v0, %v7657_v43  ;;  %v3352_v51 = vsel %vm2270_vm8, %v3349_v14, %v3351_v10  ;;  %v3907_v48 = vrot.slane %v3798_v22, 2 }
 0x317   : > { %v3199_v13 = vadd.f32 %v3108_v35, %v2955_v62  ;;  %v3664_v5 = vsel %vm2193_vm7, %v3661_v57, %v3663_v2  ;;  %v4310_v38 = vadd.f32 %v4218_v4, %v4066_v18  ;;  %v4219_v16 = vrot.slane %v4110_v63, 1 }
 0x318   : > { %v4463_v36 = vrot.slane %v4354_v26, 2  ;;  %v2999_v27 = vmul.f32 %v6959_v6, %v7576_v28  ;;  %v3908_v55 = vsel %vm2270_vm8, %v3905_v8, %v3907_v48  ;;  %v2956_v3 = vmul.f32 %v6969_v39, %v7576_v28 }
 0x319   : > { %v3443_v40 = vadd.f32 %v3352_v51, %v3199_v13  ;;  %v3000_v56 = vmul.f32 %v6959_v6, %v7583_v25  ;;  %v4554_v59 = vadd.f32 %v4462_v33, %v4310_v38  ;;  %v3243_v57 = vmul.f32 %v6972_v42, %v7576_v28 }
 0x31a   : > { %v3109_v14 = vrot.slane %v2999_v27, 1  ;;  %v3244_v12 = vmul.f32 %v6972_v42, %v7583_v25  ;;  %v4220_v29 = vsel %vm2193_vm7, %v4217_v45, %v4219_v16  ;;  %v3555_v8 = vmul.f32 %v6978_v15, %v7652_v24 }
 0x31b   : > { %v3511_v41 = vadd.f32 %v3479_v53, %v3443_v40  ;;  %v3110_v49 = vrot.slane %v3000_v56, 1  ;;  %5619 = vmatprep.mubr.msk.f32.mxu0 %vm776_vm2, %v4554_v59  ;;  %v3353_v1 = vrot.slane %v3243_v57, 2  ;;  %v3556_v7 = vmul.f32 %v6978_v15, %v7657_v43 }
 0x31c   : > { %v3354_v60 = vrot.slane %v3244_v12, 2  ;;  %v3799_v28 = vmul.f32 %v6981_v23, %v7652_v24  ;;  %v4464_v17 = vsel %vm2270_vm8, %v4461_v44, %v4463_v36  ;;  %v3800_v54 = vmul.f32 %v6981_v23, %v7657_v43  ;;  %v7752_v36 = vld [vmem:[#allocation4 + $0xe8] sm:$0x3] }
 0x31d   : > { %v3755_v9 = vadd.f32 %v3664_v5, %v3511_v41  ;;  %v3111_v45 = vsel %vm2193_vm7, %v3109_v14, %v3110_v49  ;;  %v3480_v50 = vmul.f32 %v6975_v58, %v7652_v24  ;;  %v3665_v52 = vrot.slane %v3555_v8, 1 }
 0x31e   : > { %v3200_v11 = vadd.f32 %v3111_v45, %v2956_v3  ;;  %v3666_v20 = vrot.slane %v3556_v7, 1  ;;  %v3355_v53 = vsel %vm2270_vm8, %v3353_v1, %v3354_v60  ;;  %v3909_v30 = vrot.slane %v3799_v28, 2 }
 0x31f   : > { %v3999_v62 = vadd.f32 %v3908_v55, %v3755_v9  ;;  %v4111_v44 = vmul.f32 %v6987_v47, %v7718_v21  ;;  %v3910_v4 = vrot.slane %v3800_v54, 2  ;;  %v4112_v19 = vmul.f32 %v6987_v47, %v7725_v34 }
 0x320   : > { %v3444_v46 = vadd.f32 %v3355_v53, %v3200_v11  ;;  %v4355_v22 = vmul.f32 %v6990_v61, %v7718_v21  ;;  %v4036_v2 = vmul.f32 %v6984_v0, %v7718_v21  ;;  %v7743_v26 = vmul.f32 %v6990_v61, %v7725_v34 }
 0x321   : > { %v4067_v10 = vadd.f32 %v4035_v37, %v3999_v62  ;;  %v4221_v63 = vrot.slane %v4111_v44, 1  ;;  %v3667_v33 = vsel %vm2193_vm7, %v3665_v52, %v3666_v20  ;;  %v4222_v35 = vrot.slane %v4112_v19, 1 }
 0x322   : > { %v3512_v18 = vadd.f32 %v3480_v50, %v3444_v46  ;;  %v4465_v13 = vrot.slane %v4355_v22, 2  ;;  %v4466_v5 = vrot.slane %v7743_v26, 2  ;;  %v3001_v48 = vmul.f32 %v6959_v6, %v7610_v32 }
 0x323   : > { %v4311_v51 = vadd.f32 %v4220_v29, %v4067_v10  ;;  %v3245_v37 = vmul.f32 %v6972_v42, %v7610_v32  ;;  %v3911_v16 = vsel %vm2270_vm8, %v3909_v30, %v3910_v4  ;;  %v2957_v27 = vmul.f32 %v6969_v39, %v7583_v25 }
 0x324   : > { %v3756_v38 = vadd.f32 %v3667_v33, %v3512_v18  ;;  %v3557_v40 = vmul.f32 %v6978_v15, %v7677_v31  ;;  %v4223_v3 = vsel %vm2193_vm7, %v4221_v63, %v4222_v35  ;;  %v3112_v56 = vrot.slane %v3001_v48, 1 }
 0x325   : > { %v4555_v55 = vadd.f32 %v4464_v17, %v4311_v51  ;;  %v3481_v59 = vmul.f32 %v6975_v58, %v7657_v43  ;;  %v4467_v32 = vsel %vm2270_vm8, %v4465_v13, %v4466_v5  ;;  %v3356_v57 = vrot.slane %v3245_v37, 2  ;;  %v7799_v51 = vld [vmem:[#allocation4 + $0xf8] sm:$0xff] }
 0x326   : > { %v4000_v14 = vadd.f32 %v3911_v16, %v3756_v38  ;;  %v3801_v12 = vmul.f32 %v6981_v23, %v7677_v31  ;;  %v3113_v25 = vsel %vm2193_vm7, %v3110_v49, %v3112_v56  ;;  %v3668_v41 = vrot.slane %v3557_v40, 1 }
 0x327   : > { %5620 = vmatmul.mubr.msk.f32.gmra.mxu0 %vm776_vm2, %v4555_v55  ;;  %v4113_v29 = vmul.f32 %v6987_v47, %v7752_v36  ;;  %v4357_v8 = vmul.f32 %v6990_v61, %v7752_v36  ;;  %v3201_v7 = vadd.f32 %v3113_v25, %v2957_v27  ;;  %v3357_v28 = vsel %vm2270_vm8, %v3354_v60, %v3356_v57 }
 0x328   : > { %v4068_v1 = vadd.f32 %v4036_v2, %v4000_v14  ;;  %v4037_v9 = vmul.f32 %v6984_v0, %v7725_v34  ;;  %v3669_v17 = vsel %vm2193_vm7, %v3666_v20, %v3668_v41  ;;  %v3912_v45 = vrot.slane %v3801_v12, 2 }
 0x329   : > { %v4224_v54 = vrot.slane %v4113_v29, 1  ;;  %v3002_v49 = vmul.f32 %v6959_v6, %v7652_v24  ;;  %v3445_v50 = vadd.f32 %v3357_v28, %v3201_v7  ;;  %v4468_v52 = vrot.slane %v4357_v8, 2 }
 0x32a   : > { %v4312_v11 = vadd.f32 %v4223_v3, %v4068_v1  ;;  %v7778_v62 = vmul.f32 %v6959_v6, %v7657_v43  ;;  %v3913_v53 = vsel %vm2270_vm8, %v3910_v4, %v3912_v45  ;;  %v2958_v60 = vmul.f32 %v6969_v39, %v7652_v24 }
 0x32b   : > { %v3114_v30 = vrot.slane %v3002_v49, 1  ;;  %v3246_v20 = vmul.f32 %v6972_v42, %v7652_v24  ;;  %v3513_v46 = vadd.f32 %v3481_v59, %v3445_v50  ;;  %v3247_v22 = vmul.f32 %v6972_v42, %v7657_v43  ;;  %v7794_v24 = vld [vmem:[#allocation4 + $0xf0] sm:$0xff] }
 0x32c   : > { %v4556_v44 = vadd.f32 %v4467_v32, %v4312_v11  ;;  %v3115_v19 = vrot.slane %v7778_v62, 1  ;;  %v4225_v10 = vsel %vm2193_vm7, %v4222_v35, %v4224_v54  ;;  %v3558_v4 = vmul.f32 %v6978_v15, %v7718_v21  ;;  %v7819_v54 = vld [vmem:[#allocation4 + $0x100] sm:$0x3] }
 0x32d   : > { %v3358_v2 = vrot.slane %v3246_v20, 2  ;;  %v3559_v63 = vmul.f32 %v6978_v15, %v7725_v34  ;;  %v3757_v26 = vadd.f32 %v3669_v17, %v3513_v46  ;;  %v3359_v33 = vrot.slane %v3247_v22, 2 }
 0x32e   : > { %5622 = vmatprep.mubr.msk.f32.mxu0 %vm776_vm2, %v4556_v44  ;;  %v3116_v18 = vsel %vm2193_vm7, %v3114_v30, %v3115_v19  ;;  %v3802_v13 = vmul.f32 %v6981_v23, %v7718_v21  ;;  %v3670_v48 = vrot.slane %v3558_v4, 1  ;;  %v3803_v38 = vmul.f32 %v6981_v23, %v7725_v34 }
 0x32f   : > { %v3202_v35 = vadd.f32 %v3116_v18, %v2958_v60  ;;  %v3671_v37 = vrot.slane %v3559_v63, 1  ;;  %v4001_v16 = vadd.f32 %v3913_v53, %v3757_v26  ;;  %v4469_v27 = vsel %vm2270_vm8, %v4466_v5, %v4468_v52 }
 0x330   : > { %v3360_v40 = vsel %vm2270_vm8, %v3358_v2, %v3359_v33  ;;  %v3914_v55 = vrot.slane %v3802_v13, 2  ;;  %v3482_v56 = vmul.f32 %v6975_v58, %v7718_v21  ;;  %v3915_v59 = vrot.slane %v3803_v38, 2 }
 0x331   : > { %v3446_v3 = vadd.f32 %v3360_v40, %v3202_v35  ;;  %v4114_v14 = vmul.f32 %v6987_v47, %v7794_v24  ;;  %v4069_v32 = vadd.f32 %v4037_v9, %v4001_v16  ;;  %v4115_v57 = vmul.f32 %v6987_v47, %v7799_v51 }
 0x332   : > { %v4358_v12 = vmul.f32 %v6990_v61, %v7794_v24  ;;  %v4359_v5 = vmul.f32 %v6990_v61, %v7799_v51  ;;  %v3672_v41 = vsel %vm2193_vm7, %v3670_v48, %v3671_v37  ;;  %v4038_v29 = vmul.f32 %v6984_v0, %v7794_v24 }
 0x333   : > { %v3514_v25 = vadd.f32 %v3482_v56, %v3446_v3  ;;  %v4226_v8 = vrot.slane %v4114_v14, 1  ;;  %v4313_v1 = vadd.f32 %v4225_v10, %v4069_v32  ;;  %v3916_v7 = vsel %vm2270_vm8, %v3914_v55, %v3915_v59 }
 0x334   : > { %v4227_v28 = vrot.slane %v4115_v57, 1  ;;  %v4470_v9 = vrot.slane %v4358_v12, 2  ;;  %v4471_v45 = vrot.slane %v4359_v5, 2  ;;  %v3004_v49 = vmul.f32 %v6959_v6, %v7677_v31 }
 0x335   : > { %v3758_v17 = vadd.f32 %v3672_v41, %v3514_v25  ;;  %v3248_v11 = vmul.f32 %v6972_v42, %v7677_v31  ;;  %v4557_v50 = vadd.f32 %v4469_v27, %v4313_v1  ;;  %v2959_v52 = vmul.f32 %v6969_v39, %v7657_v43 }
 0x336   : > { %v3483_v62 = vmul.f32 %v6975_v58, %v7725_v34  ;;  %v3560_v53 = vmul.f32 %v6978_v15, %v7752_v36  ;;  %v4228_v30 = vsel %vm2193_vm7, %v4226_v8, %v4227_v28  ;;  %v3117_v20 = vrot.slane %v3004_v49, 1 }
 0x337   : > { %v4002_v60 = vadd.f32 %v3916_v7, %v3758_v17  ;;  %v3804_v44 = vmul.f32 %v6981_v23, %v7752_v36  ;;  %5623 = vmatmul.mubr.msk.f32.gmra.mxu0 %vm776_vm2, %v4557_v50  ;;  %v3361_v31 = vrot.slane %v3248_v11, 2  ;;  %v4116_v43 = vmul.f32 %v6987_v47, %v7819_v54 }
 0x338   : > { %v3673_v46 = vrot.slane %v3560_v53, 1  ;;  %v4360_v22 = vmul.f32 %v6990_v61, %v7819_v54  ;;  %v4472_v2 = vsel %vm2270_vm8, %v4470_v9, %v4471_v45  ;;  %v3118_v4 = vsel %vm2193_vm7, %v3115_v19, %v3117_v20 }
 0x339   : > { %v4070_v10 = vadd.f32 %v4038_v29, %v4002_v60  ;;  %v4039_v63 = vmul.f32 %v6984_v0, %v7799_v51  ;;  %v3203_v26 = vadd.f32 %v3118_v4, %v2959_v52  ;;  %v3362_v18 = vsel %vm2270_vm8, %v3359_v33, %v3361_v31  ;;  %v7872_v52 = vld [vmem:[#allocation4 + $0x110] sm:$0xff] }
 0x33a   : > { %v3674_v13 = vsel %vm2193_vm7, %v3671_v37, %v3673_v46  ;;  %v3917_v35 = vrot.slane %v3804_v44, 2  ;;  %v4229_v38 = vrot.slane %v4116_v43, 1  ;;  %v4473_v16 = vrot.slane %v4360_v22, 2 }
 0x33b   : > { %v4314_v48 = vadd.f32 %v4228_v30, %v4070_v10  ;;  %v3005_v27 = vmul.f32 %v6959_v6, %v7718_v21  ;;  %v3447_v40 = vadd.f32 %v3362_v18, %v3203_v26  ;;  %v2960_v19 = vmul.f32 %v6969_v39, %v7718_v21 }
 0x33c   : > { %v3918_v55 = vsel %vm2270_vm8, %v3915_v59, %v3917_v35  ;;  %v3006_v3 = vmul.f32 %v6959_v6, %v7725_v34  ;;  %v3249_v37 = vmul.f32 %v6972_v42, %v7718_v21  ;;  %v3250_v14 = vmul.f32 %v6972_v42, %v7725_v34 }
 0x33d   : > { %v4558_v56 = vadd.f32 %v4472_v2, %v4314_v48  ;;  %v3119_v33 = vrot.slane %v3005_v27, 1  ;;  %v3515_v32 = vadd.f32 %v3483_v62, %v3447_v40  ;;  %v4230_v57 = vsel %vm2193_vm7, %v4227_v28, %v4229_v38  ;;  %v7868_v28 = vld [vmem:[#allocation4 + $0x108] sm:$0xff] }
 0x33e   : > { %v3120_v12 = vrot.slane %v3006_v3, 1  ;;  %v3561_v59 = vmul.f32 %v6978_v15, %v7794_v24  ;;  %v3363_v5 = vrot.slane %v3249_v37, 2  ;;  %v3364_v25 = vrot.slane %v3250_v14, 2 }
 0x33f   : > { %5625 = vmatprep.mubr.msk.f32.mxu0 %vm776_vm2, %v4558_v56  ;;  %v3562_v41 = vmul.f32 %v6978_v15, %v7799_v51  ;;  %v3805_v21 = vmul.f32 %v6981_v23, %v7794_v24  ;;  %v3759_v29 = vadd.f32 %v3674_v13, %v3515_v32  ;;  %v4474_v8 = vsel %vm2270_vm8, %v4471_v45, %v4473_v16 }
 0x340   : > { %v3121_v1 = vsel %vm2193_vm7, %v3119_v33, %v3120_v12  ;;  %v3806_v7 = vmul.f32 %v6981_v23, %v7799_v51  ;;  %v3484_v17 = vmul.f32 %v6975_v58, %v7794_v24  ;;  %v3675_v49 = vrot.slane %v3561_v59, 1 }
 0x341   : > { %v3204_v9 = vadd.f32 %v3121_v1, %v2960_v19  ;;  %v3676_v11 = vrot.slane %v3562_v41, 1  ;;  %v4003_v50 = vadd.f32 %v3918_v55, %v3759_v29  ;;  %v3365_v62 = vsel %vm2270_vm8, %v3363_v5, %v3364_v25 }
 0x342   : > { %v3919_v53 = vrot.slane %v3805_v21, 2  ;;  %v4117_v45 = vmul.f32 %v6987_v47, %v7868_v28  ;;  %v3920_v30 = vrot.slane %v3806_v7, 2  ;;  %v4118_v20 = vmul.f32 %v6987_v47, %v7872_v52 }
 0x343   : > { %v3448_v60 = vadd.f32 %v3365_v62, %v3204_v9  ;;  %v4361_v44 = vmul.f32 %v6990_v61, %v7868_v28  ;;  %v4071_v31 = vadd.f32 %v4039_v63, %v4003_v50  ;;  %v4040_v46 = vmul.f32 %v6984_v0, %v7868_v28 }
 0x344   : > { %v4231_v43 = vrot.slane %v4117_v45, 1  ;;  %v7885_v22 = vmul.f32 %v6990_v61, %v7872_v52  ;;  %v3677_v2 = vsel %vm2193_vm7, %v3675_v49, %v3676_v11  ;;  %v4232_v4 = vrot.slane %v4118_v20, 1 }
 0x345   : > { %v3516_v10 = vadd.f32 %v3484_v17, %v3448_v60  ;;  %v4475_v26 = vrot.slane %v4361_v44, 2  ;;  %v4315_v18 = vadd.f32 %v4230_v57, %v4071_v31  ;;  %v3007_v35 = vmul.f32 %v6959_v6, %v7752_v36 }
 0x346   : > { %v4476_v13 = vrot.slane %v7885_v22, 2  ;;  %v3251_v63 = vmul.f32 %v6972_v42, %v7752_v36  ;;  %v3921_v38 = vsel %vm2270_vm8, %v3919_v53, %v3920_v30  ;;  %v2961_v16 = vmul.f32 %v6969_v39, %v7725_v34  ;;  %v7902_v36 = vld [vmem:[#allocation4 + $0x118] sm:$0x3] }
 0x347   : > { %v3760_v48 = vadd.f32 %v3677_v2, %v3516_v10  ;;  %v3563_v27 = vmul.f32 %v6978_v15, %v7819_v54  ;;  %v4559_v40 = vadd.f32 %v4474_v8, %v4315_v18  ;;  %v4233_v55 = vsel %vm2193_vm7, %v4231_v43, %v4232_v4 }
 0x348   : > { %v3122_v19 = vrot.slane %v3007_v35, 1  ;;  %v3485_v3 = vmul.f32 %v6975_v58, %v7799_v51  ;;  %v4477_v33 = vsel %vm2270_vm8, %v4475_v26, %v4476_v13  ;;  %v3366_v37 = vrot.slane %v3251_v63, 2 }
 0x349   : > { %v4004_v56 = vadd.f32 %v3921_v38, %v3760_v48  ;;  %v3807_v14 = vmul.f32 %v6981_v23, %v7819_v54  ;;  %5626 = vmatmul.mubr.msk.f32.gmra.mxu0 %vm776_vm2, %v4559_v40  ;;  %v3678_v32 = vrot.slane %v3563_v27, 1  ;;  %v4119_v57 = vmul.f32 %v6987_v47, %v7902_v36  ;;  %v7942_v38 = vld [vmem:[#allocation4 + $0x120] sm:$0xff]  ;;  %v7945_v40 = vld [vmem:[#allocation4 + $0x128] sm:$0xff] }
 0x34a   : > { %v3123_v34 = vsel %vm2193_vm7, %v3120_v12, %v3122_v19  ;;  %v4363_v59 = vmul.f32 %v6990_v61, %v7902_v36  ;;  %v3367_v21 = vsel %vm2270_vm8, %v3364_v25, %v3366_v37  ;;  %v4041_v29 = vmul.f32 %v6984_v0, %v7872_v52 }
 0x34b   : > { %v4072_v5 = vadd.f32 %v4040_v46, %v4004_v56  ;;  %v3205_v41 = vadd.f32 %v3123_v34, %v2961_v16  ;;  %v3679_v8 = vsel %vm2193_vm7, %v3676_v11, %v3678_v32  ;;  %v3922_v1 = vrot.slane %v3807_v14, 2 }
 0x34c   : > { %v4234_v7 = vrot.slane %v4119_v57, 1  ;;  %v3008_v12 = vmul.f32 %v6959_v6, %v7794_v24  ;;  %v4478_v49 = vrot.slane %v4363_v59, 2  ;;  %v7920_v50 = vmul.f32 %v6959_v6, %v7799_v51 }
 0x34d   : > { %v4316_v9 = vadd.f32 %v4233_v55, %v4072_v5  ;;  %v3449_v17 = vadd.f32 %v3367_v21, %v3205_v41  ;;  %v3923_v62 = vsel %vm2270_vm8, %v3920_v30, %v3922_v1  ;;  %v2962_v25 = vmul.f32 %v6969_v39, %v7794_v24 }
 0x34e   : > { %v3124_v53 = vrot.slane %v3008_v12, 1  ;;  %v3252_v11 = vmul.f32 %v6972_v42, %v7794_v24  ;;  %v3125_v20 = vrot.slane %v7920_v50, 1  ;;  %v3253_v44 = vmul.f32 %v6972_v42, %v7799_v51 }
 0x34f   : > { %v4560_v45 = vadd.f32 %v4477_v33, %v4316_v9  ;;  %v3517_v60 = vadd.f32 %v3485_v3, %v3449_v17  ;;  %v4235_v31 = vsel %vm2193_vm7, %v4232_v4, %v4234_v7  ;;  %v3564_v30 = vmul.f32 %v6978_v15, %v7868_v28 }
 0x350   : > { %v3368_v46 = vrot.slane %v3252_v11, 2  ;;  %v3565_v43 = vmul.f32 %v6978_v15, %v7872_v52  ;;  %v3126_v24 = vsel %vm2193_vm7, %v3124_v53, %v3125_v20  ;;  %v3369_v10 = vrot.slane %v3253_v44, 2  ;;  %v7978_v53 = vld [vmem:[#allocation4 + $0x130] sm:$0x3] }
 0x351   : > { %5628 = vmatprep.mubr.msk.f32.mxu0 %vm776_vm2, %v4560_v45  ;;  %v3761_v22 = vadd.f32 %v3679_v8, %v3517_v60  ;;  %v3808_v2 = vmul.f32 %v6981_v23, %v7868_v28  ;;  %v3206_v26 = vadd.f32 %v3126_v24, %v2962_v25  ;;  %v3680_v18 = vrot.slane %v3564_v30, 1 }
 0x352   : > { %v3681_v35 = vrot.slane %v3565_v43, 1  ;;  %v3809_v4 = vmul.f32 %v6981_v23, %v7872_v52  ;;  %v4479_v48 = vsel %vm2270_vm8, %v4476_v13, %v4478_v49  ;;  %v3370_v16 = vsel %vm2270_vm8, %v3368_v46, %v3369_v10 }
 0x353   : > { %v4005_v63 = vadd.f32 %v3923_v62, %v3761_v22  ;;  %v3924_v27 = vrot.slane %v3808_v2, 2  ;;  %v3450_v55 = vadd.f32 %v3370_v16, %v3206_v26  ;;  %v3486_v19 = vmul.f32 %v6975_v58, %v7868_v28 }
 0x354   : > { %v3925_v3 = vrot.slane %v3809_v4, 2  ;;  %v4120_v56 = vmul.f32 %v6987_v47, %v7942_v38  ;;  %v7953_v37 = vmul.f32 %v6987_v47, %v7945_v40  ;;  %v4364_v13 = vmul.f32 %v6990_v61, %v7942_v38 }
 0x355   : > { %v4073_v33 = vadd.f32 %v4041_v29, %v4005_v63  ;;  %v7959_v14 = vmul.f32 %v6990_v61, %v7945_v40  ;;  %v3518_v34 = vadd.f32 %v3486_v19, %v3450_v55  ;;  %v3682_v32 = vsel %vm2193_vm7, %v3680_v18, %v3681_v35 }
 0x356   : > { %v4042_v57 = vmul.f32 %v6984_v0, %v7942_v38  ;;  %v4236_v59 = vrot.slane %v4120_v56, 1  ;;  %v3926_v41 = vsel %vm2270_vm8, %v3924_v27, %v3925_v3  ;;  %v4237_v21 = vrot.slane %v7953_v37, 1 }
 0x357   : > { %v4317_v5 = vadd.f32 %v4235_v31, %v4073_v33  ;;  %v4480_v29 = vrot.slane %v4364_v13, 2  ;;  %v3762_v8 = vadd.f32 %v3682_v32, %v3518_v34  ;;  %v4481_v1 = vrot.slane %v7959_v14, 2 }
 0x358   : > { %v3010_v7 = vmul.f32 %v6959_v6, %v7819_v54  ;;  %v3254_v12 = vmul.f32 %v6972_v42, %v7819_v54  ;;  %v2963_v17 = vmul.f32 %v6969_v39, %v7799_v51  ;;  %v3487_v49 = vmul.f32 %v6975_v58, %v7872_v52 }
 0x359   : > { %v4561_v9 = vadd.f32 %v4479_v48, %v4317_v5  ;;  %v3566_v50 = vmul.f32 %v6978_v15, %v7902_v36  ;;  %v4006_v62 = vadd.f32 %v3926_v41, %v3762_v8  ;;  %v4238_v25 = vsel %vm2193_vm7, %v4236_v59, %v4237_v21 }
 0x35a   : > { %v3127_v11 = vrot.slane %v3010_v7, 1  ;;  %v3810_v45 = vmul.f32 %v6981_v23, %v7902_v36  ;;  %v3371_v54 = vrot.slane %v3254_v12, 2  ;;  %v4122_v51 = vmul.f32 %v6987_v47, %v7978_v53 }
 0x35b   : > { %5629 = vmatmul.mubr.msk.f32.gmra.mxu0 %vm776_vm2, %v4561_v9  ;;  %v3683_v60 = vrot.slane %v3566_v50, 1  ;;  %v4366_v44 = vmul.f32 %v6990_v61, %v7978_v53  ;;  %v4074_v31 = vadd.f32 %v4042_v57, %v4006_v62  ;;  %v4482_v46 = vsel %vm2270_vm8, %v4480_v29, %v4481_v1  ;;  %v8016_v29 = vld [vmem:[#allocation4 + $0x138] sm:$0xff]  ;;  %v8020_v50 = vld [vmem:[#allocation4 + $0x140] sm:$0xff] }
 0x35c   : > { %v3128_v30 = vsel %vm2193_vm7, %v3125_v20, %v3127_v11  ;;  %v3927_v43 = vrot.slane %v3810_v45, 2  ;;  %v3372_v24 = vsel %vm2270_vm8, %v3369_v10, %v3371_v54  ;;  %v4043_v26 = vmul.f32 %v6984_v0, %v7945_v40 }
 0x35d   : > { %v3207_v22 = vadd.f32 %v3128_v30, %v2963_v17  ;;  %v3684_v2 = vsel %vm2193_vm7, %v3681_v35, %v3683_v60  ;;  %v4318_v18 = vadd.f32 %v4238_v25, %v4074_v31  ;;  %v4239_v4 = vrot.slane %v4122_v51, 1 }
 0x35e   : > { %v4483_v63 = vrot.slane %v4366_v44, 2  ;;  %v3011_v48 = vmul.f32 %v6959_v6, %v7868_v28  ;;  %v3928_v27 = vsel %vm2270_vm8, %v3925_v3, %v3927_v43  ;;  %v2964_v20 = vmul.f32 %v6969_v39, %v7868_v28 }
 0x35f   : > { %v3451_v16 = vadd.f32 %v3372_v24, %v3207_v22  ;;  %v3012_v10 = vmul.f32 %v6959_v6, %v7872_v52  ;;  %v4562_v55 = vadd.f32 %v4482_v46, %v4318_v18  ;;  %v3255_v19 = vmul.f32 %v6972_v42, %v7868_v28 }
 0x360   : > { %v3129_v35 = vrot.slane %v3011_v48, 1  ;;  %v3256_v56 = vmul.f32 %v6972_v42, %v7872_v52  ;;  %v3488_v13 = vmul.f32 %v6975_v58, %v7942_v38  ;;  %v3567_v3 = vmul.f32 %v6978_v15, %v7942_v38 }
 0x361   : > { %v3519_v33 = vadd.f32 %v3487_v49, %v3451_v16  ;;  %v3130_v37 = vrot.slane %v3012_v10, 1  ;;  %5631 = vmatprep.mubr.msk.f32.mxu0 %vm776_vm2, %v4562_v55  ;;  %v3373_v14 = vrot.slane %v3255_v19, 2  ;;  %v3568_v32 = vmul.f32 %v6978_v15, %v7945_v40 }
 0x362   : > { %v3374_v34 = vrot.slane %v3256_v56, 2  ;;  %v3811_v28 = vmul.f32 %v6981_v23, %v7942_v38  ;;  %v3685_v5 = vrot.slane %v3567_v3, 1  ;;  %v3812_v41 = vmul.f32 %v6981_v23, %v7945_v40 }
 0x363   : > { %v3763_v57 = vadd.f32 %v3684_v2, %v3519_v33  ;;  %v3131_v59 = vsel %vm2193_vm7, %v3129_v35, %v3130_v37  ;;  %v3686_v12 = vrot.slane %v3568_v32, 1  ;;  %v4240_v49 = vsel %vm2193_vm7, %v4237_v21, %v4239_v4  ;;  %v8050_v35 = vld [vmem:[#allocation4 + $0x148] sm:$0x3] }
 0x364   : > { %v3208_v8 = vadd.f32 %v3131_v59, %v2964_v20  ;;  %v3375_v7 = vsel %vm2270_vm8, %v3373_v14, %v3374_v34  ;;  %v3929_v9 = vrot.slane %v3811_v28, 2  ;;  %v3930_v62 = vrot.slane %v3812_v41, 2 }
 0x365   : > { %v4007_v17 = vadd.f32 %v3928_v27, %v3763_v57  ;;  %v4123_v25 = vmul.f32 %v6987_v47, %v8016_v29  ;;  %v4484_v11 = vsel %vm2270_vm8, %v4481_v1, %v4483_v63  ;;  %v8027_v54 = vmul.f32 %v6987_v47, %v8020_v50 }
 0x366   : > { %v3452_v45 = vadd.f32 %v3375_v7, %v3208_v8  ;;  %v4367_v60 = vmul.f32 %v6990_v61, %v8016_v29  ;;  %v3687_v44 = vsel %vm2193_vm7, %v3685_v5, %v3686_v12  ;;  %v8034_v31 = vmul.f32 %v6990_v61, %v8020_v50 }
 0x367   : > { %v4075_v51 = vadd.f32 %v4043_v26, %v4007_v17  ;;  %v4241_v21 = vrot.slane %v4123_v25, 1  ;;  %v3931_v30 = vsel %vm2270_vm8, %v3929_v9, %v3930_v62  ;;  %v4044_v1 = vmul.f32 %v6984_v0, %v8016_v29 }
 0x368   : > { %v3520_v46 = vadd.f32 %v3488_v13, %v3452_v45  ;;  %v4242_v43 = vrot.slane %v8027_v54, 1  ;;  %v4485_v24 = vrot.slane %v4367_v60, 2  ;;  %v3013_v2 = vmul.f32 %v6959_v6, %v7902_v36 }
 0x369   : > { %v4319_v22 = vadd.f32 %v4240_v49, %v4075_v51  ;;  %v3257_v26 = vmul.f32 %v6972_v42, %v7902_v36  ;;  %v4486_v4 = vrot.slane %v8034_v31, 2  ;;  %v2965_v63 = vmul.f32 %v6969_v39, %v7872_v52 }
 0x36a   : > { %v3764_v18 = vadd.f32 %v3687_v44, %v3520_v46  ;;  %v3569_v48 = vmul.f32 %v6978_v15, %v7978_v53  ;;  %v4243_v27 = vsel %vm2193_vm7, %v4241_v21, %v4242_v43  ;;  %v3132_v20 = vrot.slane %v3013_v2, 1 }
 0x36b   : > { %v4563_v16 = vadd.f32 %v4484_v11, %v4319_v22  ;;  %v3376_v10 = vrot.slane %v3257_v26, 2  ;;  %v3489_v36 = vmul.f32 %v6975_v58, %v7945_v40  ;;  %v3813_v56 = vmul.f32 %v6981_v23, %v7978_v53 }
 0x36c   : > { %v4008_v55 = vadd.f32 %v3931_v30, %v3764_v18  ;;  %v3688_v19 = vrot.slane %v3569_v48, 1  ;;  %v3133_v52 = vsel %vm2193_vm7, %v3130_v37, %v3132_v20  ;;  %v4125_v13 = vmul.f32 %v6987_v47, %v8050_v35  ;;  %v8102_v48 = vld [vmem:[#allocation4 + $0x150] sm:$0xff]  ;;  %v8105_v20 = vld [vmem:[#allocation4 + $0x158] sm:$0xff] }
 0x36d   : > { %5632 = vmatmul.mubr.msk.f32.gmra.mxu0 %vm776_vm2, %v4563_v16  ;;  %v3377_v33 = vsel %vm2270_vm8, %v3374_v34, %v3376_v10  ;;  %v4369_v3 = vmul.f32 %v6990_v61, %v8050_v35  ;;  %v4487_v32 = vsel %vm2270_vm8, %v4485_v24, %v4486_v4  ;;  %v3209_v28 = vadd.f32 %v3133_v52, %v2965_v63 }
 0x36e   : > { %v4076_v14 = vadd.f32 %v4044_v1, %v4008_v55  ;;  %v3932_v57 = vrot.slane %v3813_v56, 2  ;;  %v3689_v59 = vsel %vm2193_vm7, %v3686_v12, %v3688_v19  ;;  %v4045_v37 = vmul.f32 %v6984_v0, %v8020_v50 }
 0x36f   : > { %v4244_v5 = vrot.slane %v4125_v13, 1  ;;  %v3014_v34 = vmul.f32 %v6959_v6, %v7942_v38  ;;  %v3453_v8 = vadd.f32 %v3377_v33, %v3209_v28  ;;  %v4488_v7 = vrot.slane %v4369_v3, 2 }
 0x370   : > { %v4320_v41 = vadd.f32 %v4243_v27, %v4076_v14  ;;  %v8073_v9 = vmul.f32 %v6959_v6, %v7945_v40  ;;  %v3933_v17 = vsel %vm2270_vm8, %v3930_v62, %v3932_v57  ;;  %v2966_v49 = vmul.f32 %v6969_v39, %v7942_v38 }
 0x371   : > { %v3134_v12 = vrot.slane %v3014_v34, 1  ;;  %v3258_v25 = vmul.f32 %v6972_v42, %v7942_v38  ;;  %v3521_v45 = vadd.f32 %v3489_v36, %v3453_v8  ;;  %v8083_v60 = vmul.f32 %v6972_v42, %v7945_v40 }
 0x372   : > { %v4564_v11 = vadd.f32 %v4487_v32, %v4320_v41  ;;  %v3135_v54 = vrot.slane %v8073_v9, 1  ;;  %v3490_v44 = vmul.f32 %v6975_v58, %v8016_v29  ;;  %v3570_v62 = vmul.f32 %v6978_v15, %v8016_v29 }
 0x373   : > { %v3378_v51 = vrot.slane %v3258_v25, 2  ;;  %v8091_v21 = vmul.f32 %v6978_v15, %v8020_v50  ;;  %v3765_v38 = vadd.f32 %v3689_v59, %v3521_v45  ;;  %v3379_v30 = vrot.slane %v8083_v60, 2 }
 0x374   : > { %5634 = vmatprep.mubr.msk.f32.mxu0 %vm776_vm2, %v4564_v11  ;;  %v3136_v46 = vsel %vm2193_vm7, %v3134_v12, %v3135_v54  ;;  %v3814_v1 = vmul.f32 %v6981_v23, %v8016_v29  ;;  %v3690_v24 = vrot.slane %v3570_v62, 1  ;;  %v3815_v26 = vmul.f32 %v6981_v23, %v8020_v50 }
 0x375   : > { %v3210_v22 = vadd.f32 %v3136_v46, %v2966_v49  ;;  %v3691_v2 = vrot.slane %v8091_v21, 1  ;;  %v4009_v18 = vadd.f32 %v3933_v17, %v3765_v38  ;;  %v4245_v63 = vsel %vm2193_vm7, %v4242_v43, %v4244_v5  ;;  %v8147_v49 = vld [vmem:[#allocation4 + $0x160] sm:$0x3] }
 0x376   : > { %v3380_v16 = vsel %vm2270_vm8, %v3378_v51, %v3379_v30  ;;  %v3934_v27 = vrot.slane %v3814_v1, 2  ;;  %v3935_v36 = vrot.slane %v3815_v26, 2  ;;  %v4126_v19 = vmul.f32 %v6987_v47, %v8102_v48 }
 0x377   : > { %v3454_v10 = vadd.f32 %v3380_v16, %v3210_v22  ;;  %v3692_v55 = vsel %vm2193_vm7, %v3690_v24, %v3691_v2  ;;  %v4077_v56 = vadd.f32 %v4045_v37, %v4009_v18  ;;  %v8112_v52 = vmul.f32 %v6987_v47, %v8105_v20 }
 0x378   : > { %v4370_v43 = vmul.f32 %v6990_v61, %v8102_v48  ;;  %v8118_v33 = vmul.f32 %v6990_v61, %v8105_v20  ;;  %v4489_v13 = vsel %vm2270_vm8, %v4486_v4, %v4488_v7  ;;  %v3936_v14 = vsel %vm2270_vm8, %v3934_v27, %v3935_v36 }
 0x379   : > { %v3522_v3 = vadd.f32 %v3490_v44, %v3454_v10  ;;  %v4046_v32 = vmul.f32 %v6984_v0, %v8102_v48  ;;  %v4321_v28 = vadd.f32 %v4245_v63, %v4077_v56  ;;  %v4246_v57 = vrot.slane %v4126_v19, 1 }
 0x37a   : > { %v4247_v59 = vrot.slane %v8112_v52, 1  ;;  %v2967_v37 = vmul.f32 %v6969_v39, %v7945_v40  ;;  %v4490_v34 = vrot.slane %v4370_v43, 2  ;;  %v3016_v31 = vmul.f32 %v6959_v6, %v7978_v53 }
 0x37b   : > { %v3766_v5 = vadd.f32 %v3692_v55, %v3522_v3  ;;  %v3260_v4 = vmul.f32 %v6972_v42, %v7978_v53  ;;  %v5603_v41 = vpop.f32.mrf.mxu0  ;;  %v4565_v8 = vadd.f32 %v4489_v13, %v4321_v28  ;;  %v4491_v7 = vrot.slane %v8118_v33, 2 }
 0x37c   : > { %v3491_v9 = vmul.f32 %v6975_v58, %v8020_v50  ;;  %v3572_v17 = vmul.f32 %v6978_v15, %v8050_v35  ;;  %4898 = vst.msk [vmem:[%s8125_s18 + $0x8] sm:$0xff] %vm776_vm2, %v5603_v41  ;;  %v3137_v12 = vrot.slane %v3016_v31, 1  ;;  %v3816_v53 = vmul.f32 %v6981_v23, %v8050_v35  ;;  %v8195_v31 = vld [vmem:[#allocation4 + $0x168] sm:$0xff] }
 0x37d   : > { %v4010_v40 = vadd.f32 %v3936_v14, %v3766_v5  ;;  %v3381_v25 = vrot.slane %v3260_v4, 2  ;;  %v4738_v11 = vpop.f32.mrf.mxu0  ;;  %5635 = vmatmul.mubr.msk.f32.gmra.mxu0 %vm776_vm2, %v4565_v8  ;;  %v4248_v45 = vsel %vm2193_vm7, %v4246_v57, %v4247_v59  ;;  %v4128_v51 = vmul.f32 %v6987_v47, %v8147_v49 }
 0x37e   : > { %v3693_v60 = vrot.slane %v3572_v17, 1  ;;  %v4372_v44 = vmul.f32 %v6990_v61, %v8147_v49  ;;  %4897 = vst.msk [vmem:[%s8125_s18] sm:$0xff] %vm776_vm2, %v4738_v11  ;;  %v3138_v21 = vsel %vm2193_vm7, %v3135_v54, %v3137_v12  ;;  %v3937_v46 = vrot.slane %v3816_v53, 2  ;;  %v8201_v12 = vld [vmem:[#allocation4 + $0x170] sm:$0xff] }
 0x37f   : > { %v4078_v62 = vadd.f32 %v4046_v32, %v4010_v40  ;;  %v3382_v38 = vsel %vm2270_vm8, %v3379_v30, %v3381_v25  ;;  %v4492_v1 = vsel %vm2270_vm8, %v4490_v34, %v4491_v7  ;;  %v3211_v22 = vadd.f32 %v3138_v21, %v2967_v37 }
 0x380   : > { %v3694_v24 = vsel %vm2193_vm7, %v3691_v2, %v3693_v60  ;;  %v4047_v26 = vmul.f32 %v6984_v0, %v8105_v20  ;;  %v4249_v63 = vrot.slane %v4128_v51, 1  ;;  %v4493_v16 = vrot.slane %v4372_v44, 2 }
 0x381   : > { %v4322_v18 = vadd.f32 %v4248_v45, %v4078_v62  ;;  %v3017_v27 = vmul.f32 %v6959_v6, %v8016_v29  ;;  %v3455_v10 = vadd.f32 %v3382_v38, %v3211_v22  ;;  %v3938_v54 = vsel %vm2270_vm8, %v3935_v36, %v3937_v46 }
 0x382   : > { %v2968_v30 = vmul.f32 %v6969_v39, %v8016_v29  ;;  %v8174_v55 = vmul.f32 %v6959_v6, %v8020_v50  ;;  %v3261_v56 = vmul.f32 %v6972_v42, %v8016_v29  ;;  %v3262_v43 = vmul.f32 %v6972_v42, %v8020_v50 }
 0x383   : > { %v4566_v2 = vadd.f32 %v4492_v1, %v4322_v18  ;;  %v3139_v19 = vrot.slane %v3017_v27, 1  ;;  %v3523_v33 = vadd.f32 %v3491_v9, %v3455_v10  ;;  %v3492_v36 = vmul.f32 %v6975_v58, %v8102_v48 }
 0x384   : > { %v3140_v13 = vrot.slane %v8174_v55, 1  ;;  %v3573_v3 = vmul.f32 %v6978_v15, %v8102_v48  ;;  %v3383_v14 = vrot.slane %v3261_v56, 2  ;;  %v3384_v32 = vrot.slane %v3262_v43, 2 }
 0x385   : > { %5637 = vmatprep.mubr.msk.f32.mxu0 %vm776_vm2, %v4566_v2  ;;  %v3574_v28 = vmul.f32 %v6978_v15, %v8105_v20  ;;  %v3817_v29 = vmul.f32 %v6981_v23, %v8102_v48  ;;  %v3767_v57 = vadd.f32 %v3694_v24, %v3523_v33  ;;  %v8193_v34 = vmul.f32 %v6981_v23, %v8105_v20 }
 0x386   : > { %v3141_v37 = vsel %vm2193_vm7, %v3139_v19, %v3140_v13  ;;  %v3695_v5 = vrot.slane %v3573_v3, 1  ;;  %v3385_v41 = vsel %vm2270_vm8, %v3383_v14, %v3384_v32  ;;  %v4250_v40 = vsel %vm2193_vm7, %v4247_v59, %v4249_v63  ;;  %v8236_v19 = vld [vmem:[#allocation4 + $0x178] sm:$0x3] }
 0x387   : > { %v3212_v4 = vadd.f32 %v3141_v37, %v2968_v30  ;;  %v3696_v8 = vrot.slane %v3574_v28, 1  ;;  %v3939_v9 = vrot.slane %v3817_v29, 2  ;;  %v4011_v17 = vadd.f32 %v3938_v54, %v3767_v57 }
 0x388   : > { %v3940_v25 = vrot.slane %v8193_v34, 2  ;;  %v4129_v53 = vmul.f32 %v6987_v47, %v8195_v31  ;;  %v4494_v11 = vsel %vm2270_vm8, %v4491_v7, %v4493_v16  ;;  %v8209_v60 = vmul.f32 %v6987_v47, %v8201_v12 }
 0x389   : > { %v3456_v45 = vadd.f32 %v3385_v41, %v3212_v4  ;;  %v4373_v51 = vmul.f32 %v6990_v61, %v8195_v31  ;;  %v4079_v52 = vadd.f32 %v4047_v26, %v4011_v17  ;;  %v3697_v59 = vsel %vm2193_vm7, %v3695_v5, %v3696_v8 }
 0x38a   : > { %v4251_v44 = vrot.slane %v4129_v53, 1  ;;  %v8216_v62 = vmul.f32 %v6990_v61, %v8201_v12  ;;  %v3941_v38 = vsel %vm2270_vm8, %v3939_v9, %v3940_v25  ;;  %v4048_v7 = vmul.f32 %v6984_v0, %v8195_v31 }
 0x38b   : > { %v3524_v21 = vadd.f32 %v3492_v36, %v3456_v45  ;;  %v4252_v46 = vrot.slane %v8209_v60, 1  ;;  %v4323_v1 = vadd.f32 %v4250_v40, %v4079_v52  ;;  %v4495_v22 = vrot.slane %v4373_v51, 2 }
 0x38c   : > { %v3019_v24 = vmul.f32 %v6959_v6, %v8050_v35  ;;  %v3263_v26 = vmul.f32 %v6972_v42, %v8050_v35  ;;  %v4496_v63 = vrot.slane %v8216_v62, 2  ;;  %v2969_v16 = vmul.f32 %v6969_v39, %v8020_v50  ;;  %v5606_v10 = vpop.f32.mrf.mxu0 }
 0x38d   : > { %v3768_v18 = vadd.f32 %v3697_v59, %v3524_v21  ;;  %v3575_v27 = vmul.f32 %v6978_v15, %v8147_v49  ;;  %v4567_v54 = vadd.f32 %v4494_v11, %v4323_v1  ;;  %v4253_v30 = vsel %vm2193_vm7, %v4251_v44, %v4252_v46  ;;  %4900 = vst.msk [vmem:[%s8125_s18 + $0x18] sm:$0xff] %vm776_vm2, %v5606_v10  ;;  %v8278_v1 = vld [vmem:[#allocation4 + $0x180] sm:$0xff] }
 0x38e   : > { %v3142_v55 = vrot.slane %v3019_v24, 1  ;;  %v3386_v2 = vrot.slane %v3263_v26, 2  ;;  %v3493_v50 = vmul.f32 %v6975_v58, %v8105_v20  ;;  %v3819_v43 = vmul.f32 %v6981_v23, %v8147_v49  ;;  %v4748_v33 = vpop.f32.mrf.mxu0 }
 0x38f   : > { %v4012_v35 = vadd.f32 %v3941_v38, %v3768_v18  ;;  %v3698_v56 = vrot.slane %v3575_v27, 1  ;;  %5638 = vmatmul.mubr.msk.f32.gmra.mxu0 %vm776_vm2, %v4567_v54  ;;  %v4131_v14 = vmul.f32 %v6987_v47, %v8236_v19  ;;  %v4375_v28 = vmul.f32 %v6990_v61, %v8236_v19  ;;  %4899 = vst.msk [vmem:[%s8125_s18 + $0x10] sm:$0xff] %vm776_vm2, %v4748_v33  ;;  %v8283_v18 = vld [vmem:[#allocation4 + $0x188] sm:$0xff] }
 0x390   : > { %v3143_v36 = vsel %vm2193_vm7, %v3140_v13, %v3142_v55  ;;  %v3387_v3 = vsel %vm2270_vm8, %v3384_v32, %v3386_v2  ;;  %v4497_v57 = vsel %vm2270_vm8, %v4495_v22, %v4496_v63  ;;  %v3942_v5 = vrot.slane %v3819_v43, 2 }
 0x391   : > { %v4080_v29 = vadd.f32 %v4048_v7, %v4012_v35  ;;  %v3213_v37 = vadd.f32 %v3143_v36, %v2969_v16  ;;  %v3699_v34 = vsel %vm2193_vm7, %v3696_v8, %v3698_v56  ;;  %v4049_v13 = vmul.f32 %v6984_v0, %v8201_v12 }
 0x392   : > { %v4254_v32 = vrot.slane %v4131_v14, 1  ;;  %v3020_v4 = vmul.f32 %v6959_v6, %v8102_v48  ;;  %v4498_v17 = vrot.slane %v4375_v28, 2  ;;  %v8261_v40 = vmul.f32 %v6959_v6, %v8105_v20 }
 0x393   : > { %v4324_v41 = vadd.f32 %v4253_v30, %v4080_v29  ;;  %v3457_v9 = vadd.f32 %v3387_v3, %v3213_v37  ;;  %v3943_v53 = vsel %vm2270_vm8, %v3940_v25, %v3942_v5  ;;  %v2970_v11 = vmul.f32 %v6969_v39, %v8102_v48 }
 0x394   : > { %v3144_v8 = vrot.slane %v3020_v4, 1  ;;  %v3264_v45 = vmul.f32 %v6972_v42, %v8102_v48  ;;  %v3145_v59 = vrot.slane %v8261_v40, 1  ;;  %v3265_v44 = vmul.f32 %v6972_v42, %v8105_v20 }
 0x395   : > { %v4568_v51 = vadd.f32 %v4497_v57, %v4324_v41  ;;  %v3525_v52 = vadd.f32 %v3493_v50, %v3457_v9  ;;  %v3494_v38 = vmul.f32 %v6975_v58, %v8195_v31  ;;  %v3576_v25 = vmul.f32 %v6978_v15, %v8195_v31  ;;  %v8313_v41 = vld [vmem:[#allocation4 + $0x190] sm:$0x3] }
 0x396   : > { %v3388_v21 = vrot.slane %v3264_v45, 2  ;;  %v3577_v7 = vmul.f32 %v6978_v15, %v8201_v12  ;;  %v3146_v22 = vsel %vm2193_vm7, %v3144_v8, %v3145_v59  ;;  %v3389_v24 = vrot.slane %v3265_v44, 2 }
 0x397   : > { %5640 = vmatprep.mubr.msk.f32.mxu0 %vm776_vm2, %v4568_v51  ;;  %v3769_v48 = vadd.f32 %v3699_v34, %v3525_v52  ;;  %v3820_v26 = vmul.f32 %v6981_v23, %v8195_v31  ;;  %v3214_v16 = vadd.f32 %v3146_v22, %v2970_v11  ;;  %v3700_v27 = vrot.slane %v3576_v25, 1 }
 0x398   : > { %v3701_v10 = vrot.slane %v3577_v7, 1  ;;  %v3821_v54 = vmul.f32 %v6981_v23, %v8201_v12  ;;  %v4255_v55 = vsel %vm2193_vm7, %v4252_v46, %v4254_v32  ;;  %v3390_v2 = vsel %vm2270_vm8, %v3388_v21, %v3389_v24 }
 0x399   : > { %v4013_v30 = vadd.f32 %v3943_v53, %v3769_v48  ;;  %v3944_v35 = vrot.slane %v3820_v26, 2  ;;  %v3458_v50 = vadd.f32 %v3390_v2, %v3214_v16  ;;  %v4132_v33 = vmul.f32 %v6987_v47, %v8278_v1 }
 0x39a   : > { %v3702_v56 = vsel %vm2193_vm7, %v3700_v27, %v3701_v10  ;;  %v3945_v43 = vrot.slane %v3821_v54, 2  ;;  %v8296_v3 = vmul.f32 %v6987_v47, %v8283_v18  ;;  %v4376_v60 = vmul.f32 %v6990_v61, %v8278_v1 }
 0x39b   : > { %v4081_v36 = vadd.f32 %v4049_v13, %v4013_v30  ;;  %v8302_v46 = vmul.f32 %v6990_v61, %v8283_v18  ;;  %v4499_v14 = vsel %vm2270_vm8, %v4496_v63, %v4498_v17  ;;  %v3526_v28 = vadd.f32 %v3494_v38, %v3458_v50 }
 0x39c   : > { %v3946_v29 = vsel %vm2270_vm8, %v3944_v35, %v3945_v43  ;;  %v4050_v57 = vmul.f32 %v6984_v0, %v8278_v1  ;;  %v4256_v5 = vrot.slane %v4132_v33, 1  ;;  %v4257_v34 = vrot.slane %v8296_v3, 1 }
 0x39d   : > { %v4325_v37 = vadd.f32 %v4255_v55, %v4081_v36  ;;  %v2971_v13 = vmul.f32 %v6969_v39, %v8105_v20  ;;  %v3770_v32 = vadd.f32 %v3702_v56, %v3526_v28  ;;  %v4500_v4 = vrot.slane %v4376_v60, 2 }
 0x39e   : > { %v3022_v62 = vmul.f32 %v6959_v6, %v8147_v49  ;;  %v3266_v63 = vmul.f32 %v6972_v42, %v8147_v49  ;;  %v4501_v17 = vrot.slane %v8302_v46, 2  ;;  %v3495_v40 = vmul.f32 %v6975_v58, %v8201_v12 }
 0x39f   : > { %v4569_v9 = vadd.f32 %v4499_v14, %v4325_v37  ;;  %v3578_v20 = vmul.f32 %v6978_v15, %v8236_v19  ;;  %v4014_v53 = vadd.f32 %v3946_v29, %v3770_v32  ;;  %v3822_v45 = vmul.f32 %v6981_v23, %v8236_v19 }
 0x3a0   : > { %v3147_v11 = vrot.slane %v3022_v62, 1  ;;  %v3391_v8 = vrot.slane %v3266_v63, 2  ;;  %v4258_v49 = vsel %vm2193_vm7, %v4256_v5, %v4257_v34  ;;  %v4134_v52 = vmul.f32 %v6987_v47, %v8313_v41  ;;  %v5609_v21 = vpop.f32.mrf.mxu0 }
 0x3a1   : > { %5641 = vmatmul.mubr.msk.f32.gmra.mxu0 %vm776_vm2, %v4569_v9  ;;  %v3703_v51 = vrot.slane %v3578_v20, 1  ;;  %v4378_v44 = vmul.f32 %v6990_v61, %v8313_v41  ;;  %v4082_v38 = vadd.f32 %v4050_v57, %v4014_v53  ;;  %v3947_v48 = vrot.slane %v3822_v45, 2  ;;  %4902 = vst.msk [vmem:[%s8125_s18 + $0x28] sm:$0xff] %vm776_vm2, %v5609_v21  ;;  %v2932_v57 = vld [vmem:[#allocation4 + $0x198] sm:$0xff] }
 0x3a2   : > { %v3148_v25 = vsel %vm2193_vm7, %v3145_v59, %v3147_v11  ;;  %v3392_v7 = vsel %vm2270_vm8, %v3389_v24, %v3391_v8  ;;  %v4502_v22 = vsel %vm2270_vm8, %v4500_v4, %v4501_v17  ;;  %v4051_v27 = vmul.f32 %v6984_v0, %v8283_v18  ;;  %v4758_v54 = vpop.f32.mrf.mxu0  ;;  %v8366_v4 = vld [vmem:[#allocation4 + $0x1a0] sm:$0xff] }
 0x3a3   : > { %v3215_v26 = vadd.f32 %v3148_v25, %v2971_v13  ;;  %v3704_v16 = vsel %vm2193_vm7, %v3701_v10, %v3703_v51  ;;  %v4326_v30 = vadd.f32 %v4258_v49, %v4082_v38  ;;  %v4259_v55 = vrot.slane %v4134_v52, 1  ;;  %4901 = vst.msk [vmem:[%s8125_s18 + $0x20] sm:$0xff] %vm776_vm2, %v4758_v54 }
 0x3a4   : > { %v4503_v2 = vrot.slane %v4378_v44, 2  ;;  %v3023_v59 = vmul.f32 %v6959_v6, %v8195_v31  ;;  %v3948_v35 = vsel %vm2270_vm8, %v3945_v43, %v3947_v48  ;;  %v2972_v50 = vmul.f32 %v6969_v39, %v8195_v31 }
 0x3a5   : > { %v3459_v24 = vadd.f32 %v3392_v7, %v3215_v26  ;;  %v3024_v10 = vmul.f32 %v6959_v6, %v8201_v12  ;;  %v4570_v56 = vadd.f32 %v4502_v22, %v4326_v30  ;;  %v3267_v36 = vmul.f32 %v6972_v42, %v8195_v31 }
 0x3a6   : > { %v3149_v33 = vrot.slane %v3023_v59, 1  ;;  %v3268_v60 = vmul.f32 %v6972_v42, %v8201_v12  ;;  %v3496_v29 = vmul.f32 %v6975_v58, %v8278_v1  ;;  %v3579_v43 = vmul.f32 %v6978_v15, %v8278_v1 }
 0x3a7   : > { %v3527_v14 = vadd.f32 %v3495_v40, %v3459_v24  ;;  %v3150_v28 = vrot.slane %v3024_v10, 1  ;;  %5643 = vmatprep.mubr.msk.f32.mxu0 %vm776_vm2, %v4570_v56  ;;  %v3393_v37 = vrot.slane %v3267_v36, 2  ;;  %v3580_v13 = vmul.f32 %v6978_v15, %v8283_v18  ;;  %v2934_v10 = vld [vmem:[#allocation4 + $0x1a8] sm:$0x3] }
 0x3a8   : > { %v3394_v5 = vrot.slane %v3268_v60, 2  ;;  %v3823_v31 = vmul.f32 %v6981_v23, %v8278_v1  ;;  %v3705_v63 = vrot.slane %v3579_v43, 1  ;;  %v3824_v9 = vmul.f32 %v6981_v23, %v8283_v18 }
 0x3a9   : > { %v3771_v32 = vadd.f32 %v3704_v16, %v3527_v14  ;;  %v3151_v62 = vsel %vm2193_vm7, %v3149_v33, %v3150_v28  ;;  %v3706_v53 = vrot.slane %v3580_v13, 1  ;;  %v4135_v49 = vmul.f32 %v6987_v47, %v2932_v57 }
 0x3aa   : > { %v3216_v40 = vadd.f32 %v3151_v62, %v2972_v50  ;;  %v3395_v20 = vsel %vm2270_vm8, %v3393_v37, %v3394_v5  ;;  %v3949_v11 = vrot.slane %v3823_v31, 2  ;;  %v3950_v45 = vrot.slane %v3824_v9, 2 }
 0x3ab   : > { %v4015_v8 = vadd.f32 %v3948_v35, %v3771_v32  ;;  %v4260_v1 = vsel %vm2193_vm7, %v4257_v34, %v4259_v55  ;;  %v4136_v52 = vmul.f32 %v6987_v47, %v8366_v4  ;;  %v4379_v44 = vmul.f32 %v6990_v61, %v2932_v57 }
 0x3ac   : > { %v3460_v51 = vadd.f32 %v3395_v20, %v3216_v40  ;;  %v4504_v38 = vsel %vm2270_vm8, %v4501_v17, %v4503_v2  ;;  %v3707_v25 = vsel %vm2193_vm7, %v3705_v63, %v3706_v53  ;;  %v4380_v7 = vmul.f32 %v6990_v61, %v8366_v4 }
 0x3ad   : > { %v4083_v21 = vadd.f32 %v4051_v27, %v4015_v8  ;;  %v3951_v3 = vsel %vm2270_vm8, %v3949_v11, %v3950_v45  ;;  %v4052_v34 = vmul.f32 %v6984_v0, %v2932_v57  ;;  %v4261_v22 = vrot.slane %v4135_v49, 1 }
 0x3ae   : > { %v3528_v48 = vadd.f32 %v3496_v29, %v3460_v51  ;;  %v4262_v16 = vrot.slane %v4136_v52, 1  ;;  %v3025_v27 = vmul.f32 %v6959_v6, %v8236_v19  ;;  %v3269_v46 = vmul.f32 %v6972_v42, %v8236_v19 }
 0x3af   : > { %v4327_v26 = vadd.f32 %v4260_v1, %v4083_v21  ;;  %v4505_v54 = vrot.slane %v4379_v44, 2  ;;  %v2973_v30 = vmul.f32 %v6969_v39, %v8201_v12  ;;  %v3581_v55 = vmul.f32 %v6978_v15, %v8313_v41 }
 0x3b0   : > { %v3772_v17 = vadd.f32 %v3707_v25, %v3528_v48  ;;  %v4506_v59 = vrot.slane %v4380_v7, 2  ;;  %v3152_v24 = vrot.slane %v3025_v27, 1  ;;  %v3396_v35 = vrot.slane %v3269_v46, 2 }
 0x3b1   : > { %v4571_v2 = vadd.f32 %v4504_v38, %v4327_v26  ;;  %v3825_v6 = vmul.f32 %v6981_v23, %v8313_v41  ;;  %v4263_v19 = vsel %vm2193_vm7, %v4261_v22, %v4262_v16  ;;  %v3708_v15 = vrot.slane %v3581_v55, 1 }
 0x3b2   : > { %v4016_v50 = vadd.f32 %v3951_v3, %v3772_v17  ;;  %v5612_v42 = vpop.f32.mrf.mxu0  ;;  %v3153_v39 = vsel %vm2193_vm7, %v3150_v28, %v3152_v24  ;;  %v3397_v12 = vsel %vm2270_vm8, %v3394_v5, %v3396_v35  ;;  %v3497_v36 = vmul.f32 %v6975_v58, %v8283_v18 }
 0x3b3   : > { %5644 = vmatmul.mubr.msk.f32.gmra.mxu0 %vm776_vm2, %v4571_v2  ;;  %4904 = vst.msk [vmem:[%s8125_s18 + $0x38] sm:$0xff] %vm776_vm2, %v5612_v42  ;;  %v3217_v33 = vadd.f32 %v3153_v39, %v2973_v30  ;;  %v4507_v23 = vsel %vm2270_vm8, %v4505_v54, %v4506_v59  ;;  %v3952_v41 = vrot.slane %v3825_v6, 2  ;;  %v4137_v14 = vmul.f32 %v6987_v47, %v2934_v10 }
 0x3b4   : > { %v4084_v56 = vadd.f32 %v4052_v34, %v4016_v50  ;;  %v4768_v60 = vpop.f32.mrf.mxu0  ;;  %v3709_v43 = vsel %vm2193_vm7, %v3706_v53, %v3708_v15  ;;  %v4381_v57 = vmul.f32 %v6990_v61, %v2934_v10  ;;  %v4053_v47 = vmul.f32 %v6984_v0, %v8366_v4 }
 0x3b5   : > { %4903 = vst.msk [vmem:[%s8125_s18 + $0x30] sm:$0xff] %vm776_vm2, %v4768_v60  ;;  %v3461_v28 = vadd.f32 %v3397_v12, %v3217_v33  ;;  %v3953_v13 = vsel %vm2270_vm8, %v3950_v45, %v3952_v41  ;;  %v4264_v58 = vrot.slane %v4137_v14, 1 }
 0x3b6   : > { %v4328_v29 = vadd.f32 %v4263_v19, %v4084_v56  ;;  %v4508_v31 = vrot.slane %v4381_v57, 2 }
 0x3b7   : > { %v3529_v5 = vadd.f32 %v3497_v36, %v3461_v28  ;;  %v4265_v61 = vsel %vm2193_vm7, %v4262_v16, %v4264_v58 }
 0x3b8   : > { %v4572_v37 = vadd.f32 %v4507_v23, %v4328_v29  ;;  %v4509_v63 = vsel %vm2270_vm8, %v4506_v59, %v4508_v31 }
 0x3b9   : > { %v3773_v18 = vadd.f32 %v3709_v43, %v3529_v5 }
 0x3ba   : > { %5646 = vmatprep.mubr.msk.f32.mxu0 %vm776_vm2, %v4572_v37 }
 0x3bb   : > { %v4017_v32 = vadd.f32 %v3953_v13, %v3773_v18 }
 0x3bd   : > { %v4085_v62 = vadd.f32 %v4053_v47, %v4017_v32 }
 0x3bf   : > { %v4329_v9 = vadd.f32 %v4265_v61, %v4085_v62 }
 0x3c1   : > { %v4573_v40 = vadd.f32 %v4509_v63, %v4329_v9 }
 0x3c3   : > { %5647 = vmatmul.mubr.msk.f32.gmra.mxu0 %vm776_vm2, %v4573_v40  ;;  %v5615_v20 = vpop.f32.mrf.mxu0 }
 0x3c4   : > { %4906 = vst.msk [vmem:[%s8125_s18 + $0x48] sm:$0xff] %vm776_vm2, %v5615_v20 }
 0x3c5   : > { %v4778_v0 = vpop.f32.mrf.mxu0 }
 0x3c6   : > { %4905 = vst.msk [vmem:[%s8125_s18 + $0x40] sm:$0xff] %vm776_vm2, %v4778_v0 }
 0x3d5   : > { %v5618_v4 = vpop.f32.mrf.mxu0 }
 0x3d6   : > { %4908 = vst.msk [vmem:[%s8125_s18 + $0x58] sm:$0xff] %vm776_vm2, %v5618_v4 }
 0x3d7   : > { %v4788_v53 = vpop.f32.mrf.mxu0 }
 0x3d8   : > { %4907 = vst.msk [vmem:[%s8125_s18 + $0x50] sm:$0xff] %vm776_vm2, %v4788_v53 }
 0x3e7   : > { %v5621_v11 = vpop.f32.mrf.mxu0 }
 0x3e8   : > { %4910 = vst.msk [vmem:[%s8125_s18 + $0x68] sm:$0xff] %vm776_vm2, %v5621_v11 }
 0x3e9   : > { %v4798_v8 = vpop.f32.mrf.mxu0 }
 0x3ea   : > { %4909 = vst.msk [vmem:[%s8125_s18 + $0x60] sm:$0xff] %vm776_vm2, %v4798_v8 }
 0x3f7   : > { %v5624_v45 = vpop.f32.mrf.mxu0 }
 0x3f8   : > { %4912 = vst.msk [vmem:[%s8125_s18 + $0x78] sm:$0xff] %vm776_vm2, %v5624_v45 }
 0x3f9   : > { %v4808_v49 = vpop.f32.mrf.mxu0 }
 0x3fa   : > { %4911 = vst.msk [vmem:[%s8125_s18 + $0x70] sm:$0xff] %vm776_vm2, %v4808_v49 }
 0x409   : > { %v5627_v1 = vpop.f32.mrf.mxu0 }
 0x40a   : > { %5725 = shalt.err (!%p5722_p3)
}
 0x40b   : > { %s5726_s0 = scalar_lea.hbm %s8444_s2, 256  ;;  %s5730_s28 = scalar_lea.hbm %s8570_s17, 512 }
 0x40c   : > { %p5727_p4 = scmp.ne.s32.totalorder %s8444_s2, %s5726_s0  ;;  %p5731_p9 = scmp.lt.s32.totalorder %s8444_s2, %s8570_s17 }
 0x40d   : > { %p5732_p10 = scmp.lt.s32.totalorder %s5730_s28, %s5726_s0 }
 0x40e   : > { %p5728_p7 = pnand %p5727_p4, %p5947_p5 }
 0x40f   : > { %p5733_p11 = por %p5732_p10, %p5731_p9 }
 0x410   : > { %p5729_p8 = pneg %p5728_p7 }
 0x412   : > { %p5734_p12 = pnand %p5733_p11, %p5729_p8 }
 0x414   : > { %5737 = shalt.err (!%p5734_p12)
}
 0x415   : > { %s5806_s4 = smov 128   ;;  %s5807_s5 = smov 8   ;;  %4914 = vst.msk [vmem:[%s8125_s18 + $0x88] sm:$0xff] %vm776_vm2, %v5627_v1  ;;  %v4818_v51 = vpop.f32.mrf.mxu0 }
 0x416   : > { %s8610_s22 = scalar_lea.sflag [#allocation6], %s7139_s23  ;;  %s8611_s20 = sshll.u32 %s5930_s1, 10 }
 0x417   : > { %5665 = dma.vmem_to_hbm [thread:$0]  (%p5947_p5), %s8436_s26, 256, %s8444_s2, %s8610_s22, %s5806_s4, %s5806_s4, %s5807_s5  }
 0x418   : > { %s8612_s25 = sld [smem:[#allocation27_spill]]  ;;  %s4935_s28 = scalar_lea.sflag [#allocation8], %s7139_s23 }
 0x419   : > { %s5738_s6 = scalar_lea.vmem %s8438_s21, 1024  ;;  %s5808_s7 = smov [#allocation7]  }
 0x41a   : > { %p5739_p13 = scmp.ne.s32.totalorder %s8438_s21, %s5738_s6  ;;  %s5742_s8 = sshll.u32 %s5808_s7, 4  ;;  %s5743_s8 = int_to_ptr.vmem [resolvable:$false] %s5742_s8 }
 0x41b   : > { %s5744_s9 = scalar_lea.vmem %s5743_s8, 2048  ;;  %p5745_p2 = scmp.lt.s32.totalorder %s8438_s21, %s5743_s8 }
 0x41c   : > { %p5740_p0 = pnand %p5739_p13, %p5947_p5  ;;  %p5746_p3 = scmp.lt.s32.totalorder %s5744_s9, %s5738_s6 }
 0x41e   : > { %s8480_s24 = scalar_lea.hbm %s8612_s25, %s8611_s20  ;;  %p5741_p1 = pneg %p5740_p0 }
 0x41f   : > { %p5747_p4 = por %p5746_p3, %p5745_p2 }
 0x421   : > { %p5748_p7 = pnand %p5747_p4, %p5741_p1 }
 0x423   : > { %5751 = shalt.err (!%p5748_p7)
}
 0x424   : > { %s5752_s1 = scalar_lea.hbm %s8480_s24, 1024  ;;  %s5756_s7 = scalar_lea.hbm %s8612_s25, 2048 }
 0x425   : > { %p5753_p8 = scmp.ne.s32.totalorder %s8480_s24, %s5752_s1  ;;  %p5757_p11 = scmp.lt.s32.totalorder %s8480_s24, %s8612_s25 }
 0x426   : > { %p5758_p12 = scmp.lt.s32.totalorder %s5756_s7, %s5752_s1 }
 0x427   : > { %p5754_p9 = pnand %p5753_p8, %p5947_p5 }
 0x428   : > { %p5759_p13 = por %p5758_p12, %p5757_p11 }
 0x429   : > { %p5755_p10 = pneg %p5754_p9 }
 0x42b   : > { %p5760_p0 = pnand %p5759_p13, %p5755_p10 }
 0x42d   : > { %5763 = shalt.err (!%p5760_p0)
}
 0x42e   : > { %5666 = dma.vmem_to_hbm [thread:$0]  (%p5947_p5), %s8438_s21, 1024, %s8480_s24, %s4935_s28, %s5806_s4, %s5806_s4, %s5807_s5   ;;  %v5630_v52 = vpop.f32.mrf.mxu0 }
 0x42f   : > { %4913 = vst.msk [vmem:[%s8125_s18 + $0x80] sm:$0xff] %vm776_vm2, %v4818_v51  ;;  %4916 = vst.msk [vmem:[%s8125_s18 + $0x98] sm:$0xff] %vm776_vm2, %v5630_v52 }
 0x430   : > { %v4828_v44 = vpop.f32.mrf.mxu0 }
 0x431   : > { %4915 = vst.msk [vmem:[%s8125_s18 + $0x90] sm:$0xff] %vm776_vm2, %v4828_v44 }
 0x432   : > { %v5633_v21 = vpop.f32.mrf.mxu0 }
 0x433   : > { %4918 = vst.msk [vmem:[%s8125_s18 + $0xa8] sm:$0xff] %vm776_vm2, %v5633_v21 }
 0x434   : > { %v4838_v38 = vpop.f32.mrf.mxu0 }
 0x435   : > { %4917 = vst.msk [vmem:[%s8125_s18 + $0xa0] sm:$0xff] %vm776_vm2, %v4838_v38 }
 0x43d   : > { %v5636_v25 = vpop.f32.mrf.mxu0 }
 0x43e   : > { %4920 = vst.msk [vmem:[%s8125_s18 + $0xb8] sm:$0xff] %vm776_vm2, %v5636_v25 }
 0x43f   : > { %v4848_v7 = vpop.f32.mrf.mxu0 }
 0x440   : > { %4919 = vst.msk [vmem:[%s8125_s18 + $0xb0] sm:$0xff] %vm776_vm2, %v4848_v7 }
 0x44f   : > { %v5639_v48 = vpop.f32.mrf.mxu0 }
 0x450   : > { %4922 = vst.msk [vmem:[%s8125_s18 + $0xc8] sm:$0xff] %vm776_vm2, %v5639_v48 }
 0x451   : > { %v4858_v3 = vpop.f32.mrf.mxu0 }
 0x452   : > { %4921 = vst.msk [vmem:[%s8125_s18 + $0xc0] sm:$0xff] %vm776_vm2, %v4858_v3 }
 0x461   : > { %v5642_v34 = vpop.f32.mrf.mxu0 }
 0x462   : > { %4924 = vst.msk [vmem:[%s8125_s18 + $0xd8] sm:$0xff] %vm776_vm2, %v5642_v34 }
 0x463   : > { %v4868_v22 = vpop.f32.mrf.mxu0 }
 0x464   : > { %4923 = vst.msk [vmem:[%s8125_s18 + $0xd0] sm:$0xff] %vm776_vm2, %v4868_v22 }
 0x473   : > { %v5645_v26 = vpop.f32.mrf.mxu0 }
 0x474   : > { %4926 = vst.msk [vmem:[%s8125_s18 + $0xe8] sm:$0xff] %vm776_vm2, %v5645_v26 }
 0x475   : > { %v4878_v16 = vpop.f32.mrf.mxu0 }
 0x476   : > { %4925 = vst.msk [vmem:[%s8125_s18 + $0xe0] sm:$0xff] %vm776_vm2, %v4878_v16 }
 0x483   : > { %v5648_v27 = vpop.f32.mrf.mxu0 }
 0x484   : > { %4928 = vst.msk [vmem:[%s8125_s18 + $0xf8] sm:$0xff] %vm776_vm2, %v5648_v27 }
 0x485   : > { %v4888_v46 = vpop.f32.mrf.mxu0 }
 0x486   : > { %4927 = vst.msk [vmem:[%s8125_s18 + $0xf0] sm:$0xff] %vm776_vm2, %v4888_v46 }
 0x487 PF: > { %s8613_s6 = sld [smem:[#allocation13_spill]] }
 0x488   : > { %s8614_s8 = sld [smem:[#allocation11_spill]] }
 0x48d   : > { %p5676_p5 = scmp.ge.s32.totalorder %s8613_s6, 2 }
 0x48e   : > { %s4987_s3 = sand.u32 1, %s8614_s8  }
 0x48f   : > { %p5670_p1 = pnand %p5676_p5, %p5951_p6  ;;  %s4988_s21 = scalar_lea.sflag [#allocation6], %s4987_s3 }
 0x491   : > { %p5671_p2 = pneg %p5670_p1 }
 0x493   : > { %5781 = dma.done.wait (%p5671_p2), %s4988_s21, 256  }
 0x494   : > { %5783 = vsyncadd (%p5671_p2), %s4988_s21, 4294967040  ;;  %s4997_s4 = scalar_lea.sflag [#allocation8], %s4987_s3 }
 0x495   : > { %5785 = dma.done.wait (%p5671_p2), %s4997_s4, 1024  }
 0x496   : > { %5787 = vsyncadd (%p5671_p2), %s4997_s4, 4294966272  ;;  %s8616_s21 = sld [smem:[#allocation14_spill]]  ;;  %s8619_s0 = smov %s5794_s30 }
 0x497   : > { %s8617_s5 = sld [smem:[#allocation12_spill]] }
 0x498   : > { %s8618_s20 = sld [smem:[#allocation15_spill]] }
 0x49c   : > { %p33_p3 = scmp.ge.s32.totalorder %s8616_s21, 4  }
 0x49d   : > { %s8620_s30 = smov %s8617_s5 }
 0x49e   :  { %35 = sbr.rel (!%p33_p3) target bundleno = 17 (0x11), region = 161 }
 0x4a3   :  { %5010 = vsyncpa [#allocation6], 1 }
 0x4a4   :  { %5012 = vsyncpa [#allocation6 + $0x1], 1 }
 0x4a5   :  { %5013 = vsyncpa [#allocation8], 1 }
 0x4a6   :  { %5015 = vsyncpa [#allocation8 + $0x1], 1 }

</bundles_post_ra>
